<compile_context>
chip_gen: v7x
topology: tpu7x:2x2x1
jax: 0.10.0
libtpu: 0.0.40
codegen_flags: <defaults>
</compile_context>

<pallas_src>
import functools
import math

import jax
import jax.numpy as jnp
from jax.experimental import pallas as pl
from jax.experimental.pallas import tpu as pltpu

EPS = 1e-5
PREC = jax.lax.Precision.HIGHEST
VMEM_LIMIT = 32 * 1024 * 1024


# ------------------------------ Pallas kernels ------------------------------ #

def _matmul_shift_act_kernel(a_ref, b_ref, shift_ref, o_ref, *, relu):
    y = jnp.dot(a_ref[...], b_ref[...],
                preferred_element_type=jnp.float32, precision=PREC)
    y = y + shift_ref[...]
    if relu:
        y = jnp.maximum(y, 0.0)
    o_ref[...] = y.astype(o_ref.dtype)


def _pick_tile(m):
    for t in (1024, 512, 256, 128):
        if m % t == 0:
            return t
    return m


def matmul_shift_act(a, b, shift, *, relu):
    """(M,K) @ (K,N) + shift(1,N), optional ReLU. Tiled over M, lane-dense output."""
    M, K = a.shape
    Nc = b.shape[1]
    tm = _pick_tile(M)
    return pl.pallas_call(
        functools.partial(_matmul_shift_act_kernel, relu=relu),
        out_shape=jax.ShapeDtypeStruct((M, Nc), a.dtype),
        grid=(M // tm,),
        in_specs=[
            pl.BlockSpec((tm, K), lambda i: (i, 0)),
            pl.BlockSpec((K, Nc), lambda i: (0, 0)),
            pl.BlockSpec((1, Nc), lambda i: (0, 0)),
        ],
        out_specs=pl.BlockSpec((tm, Nc), lambda i: (i, 0)),
        compiler_params=pltpu.CompilerParams(
            dimension_semantics=("parallel",),
            vmem_limit_bytes=VMEM_LIMIT),
    )(a, b, shift)


def _dw_bn_relu_kernel(x_ref, wdw_ref, shift_ref, o_ref, xp_scr, *, D, H, W):
    """Depthwise 3x3x3, stride 1, pad 1 (padding built in VMEM) + BN shift + ReLU."""
    C = x_ref.shape[-1]
    xp_scr[...] = jnp.zeros(xp_scr.shape, xp_scr.dtype)
    xp_scr[1:D + 1, 1:H + 1, 1:W + 1, :] = x_ref[0].astype(jnp.float32)
    xp = xp_scr[...]
    wdw = wdw_ref[...]
    acc = jnp.zeros((D, H, W, C), jnp.float32)
    for kd in range(3):
        for kh in range(3):
            for kw in range(3):
                tap = kd * 9 + kh * 3 + kw
                acc = acc + xp[kd:kd + D, kh:kh + H, kw:kw + W, :] * wdw[tap, :]
    acc = jnp.maximum(acc + shift_ref[0, :], 0.0)
    o_ref[...] = acc[None].astype(o_ref.dtype)


def depthwise_bn_relu(x_cl, wdw27, shift):
    N, D, H, W, C = x_cl.shape
    return pl.pallas_call(
        functools.partial(_dw_bn_relu_kernel, D=D, H=H, W=W),
        out_shape=jax.ShapeDtypeStruct((N, D, H, W, C), x_cl.dtype),
        grid=(N,),
        in_specs=[
            pl.BlockSpec((1, D, H, W, C), lambda n: (n, 0, 0, 0, 0)),
            pl.BlockSpec((27, C), lambda n: (0, 0)),
            pl.BlockSpec((1, C), lambda n: (0, 0)),
        ],
        out_specs=pl.BlockSpec((1, D, H, W, C), lambda n: (n, 0, 0, 0, 0)),
        scratch_shapes=[pltpu.VMEM((D + 2, H + 2, W + 2, C), jnp.float32)],
        compiler_params=pltpu.CompilerParams(
            dimension_semantics=("parallel",),
            vmem_limit_bytes=VMEM_LIMIT),
    )(x_cl, wdw27, shift)


def _block_fused_kernel(x_ref, wdw_ref, shift1_ref, wpw_ref, shift2_ref, o_ref,
                        xp_scr, mid_scr, *, D, H, W):
    """Fused stride-1 Block: dw3x3x3 + BN + ReLU -> pw matmul + BN + ReLU.

    The depthwise result is written row-by-row into a flat (D*H*W, Cin) VMEM
    scratch so the pointwise matmul needs no in-kernel reshape; the activation
    never leaves VMEM between the two stages.
    """
    Cin = x_ref.shape[-1]
    xp_scr[...] = jnp.zeros(xp_scr.shape, xp_scr.dtype)
    xp_scr[1:D + 1, 1:H + 1, 1:W + 1, :] = x_ref[0].astype(jnp.float32)
    xp = xp_scr[...]
    wdw = wdw_ref[...]
    b1 = shift1_ref[0, :]
    for d in range(D):
        for h in range(H):
            acc = jnp.zeros((W, Cin), jnp.float32)
            for kd in range(3):
                for kh in range(3):
                    for kw in range(3):
                        tap = kd * 9 + kh * 3 + kw
                        acc = acc + xp[d + kd, h + kh, kw:kw + W, :] * wdw[tap, :]
            row = jnp.maximum(acc + b1, 0.0)
            off = (d * H + h) * W
            mid_scr[off:off + W, :] = row
    y = jnp.dot(mid_scr[...], wpw_ref[...],
                preferred_element_type=jnp.float32, precision=PREC)
    y = jnp.maximum(y + shift2_ref[...], 0.0)
    o_ref[...] = y[None].astype(o_ref.dtype)


def block_fused_stride1(x_cl, wdw27, shift1, wpw, shift2):
    N, D, H, W, Cin = x_cl.shape
    Cout = wpw.shape[1]
    M = D * H * W
    y = pl.pallas_call(
        functools.partial(_block_fused_kernel, D=D, H=H, W=W),
        out_shape=jax.ShapeDtypeStruct((N, M, Cout), x_cl.dtype),
        grid=(N,),
        in_specs=[
            pl.BlockSpec((1, D, H, W, Cin), lambda n: (n, 0, 0, 0, 0)),
            pl.BlockSpec((27, Cin), lambda n: (0, 0)),
            pl.BlockSpec((1, Cin), lambda n: (0, 0)),
            pl.BlockSpec((Cin, Cout), lambda n: (0, 0)),
            pl.BlockSpec((1, Cout), lambda n: (0, 0)),
        ],
        out_specs=pl.BlockSpec((1, M, Cout), lambda n: (n, 0, 0)),
        scratch_shapes=[
            pltpu.VMEM((D + 2, H + 2, W + 2, Cin), jnp.float32),
            pltpu.VMEM((M, Cin), jnp.float32),
        ],
        compiler_params=pltpu.CompilerParams(
            dimension_semantics=("parallel",),
            vmem_limit_bytes=VMEM_LIMIT),
    )(x_cl, wdw27, shift1, wpw, shift2)
    return y.reshape(N, D, H, W, Cout)


# ------------------------------- Module glue -------------------------------- #

def _fold_bn(bn):
    gamma, beta, mean, var = bn
    scale = gamma / jnp.sqrt(var + EPS)
    shift = beta - mean * scale
    return scale, shift


def _dw_weight_taps(w_dw, scale):
    # (C,1,3,3,3) -> (27, C), tap = kd*9 + kh*3 + kw, with BN scale folded per channel.
    C = w_dw.shape[0]
    w = jnp.transpose(w_dw[:, 0], (1, 2, 3, 0)).reshape(27, C)
    return w * scale


def _pw_weight(w_pw, scale):
    # (Cout, Cin, 1,1,1) -> (Cin, Cout) with BN scale folded per output column.
    return w_pw[:, :, 0, 0, 0].T * scale


def stem_conv_bn_relu(x_cl, w_stem, bn, stride):
    """Full 3x3x3 conv (pad 1, strided) + BN + ReLU via im2col + Pallas matmul."""
    N, D, H, W, Ci = x_cl.shape
    Co = w_stem.shape[0]
    sd, sh, sw = stride
    Do = (D - 1) // sd + 1
    Ho = (H - 1) // sh + 1
    Wo = (W - 1) // sw + 1
    xp = jnp.pad(x_cl, ((0, 0), (1, 1), (1, 1), (1, 1), (0, 0)))
    cols = []
    for kd in range(3):
        for kh in range(3):
            for kw in range(3):
                cols.append(
                    xp[:, kd:kd + (Do - 1) * sd + 1:sd,
                       kh:kh + (Ho - 1) * sh + 1:sh,
                       kw:kw + (Wo - 1) * sw + 1:sw, :])
    a = jnp.stack(cols, axis=-2).reshape(N * Do * Ho * Wo, 27 * Ci)
    scale, shift = _fold_bn(bn)
    w_mat = jnp.transpose(w_stem, (2, 3, 4, 1, 0)).reshape(27 * Ci, Co) * scale
    y = matmul_shift_act(a, w_mat, shift[None, :], relu=True)
    return y.reshape(N, Do, Ho, Wo, Co)


def block_forward(x_cl, bp):
    stride = bp['stride']
    s1, sh1 = _fold_bn(bp['bn1'])
    s2, sh2 = _fold_bn(bp['bn2'])
    wdw = _dw_weight_taps(bp['w_dw'], s1)
    wpw = _pw_weight(bp['w_pw'], s2)
    if stride == (1, 1, 1):
        # Whole Block in one fused pallas_call (VMEM-resident intermediate).
        return block_fused_stride1(x_cl, wdw, sh1[None, :], wpw, sh2[None, :])
    # Strided Block: depthwise at stride 1 (fused BN+ReLU), subsample in XLA,
    # then the pointwise stage as one big lane-dense matmul.
    y = depthwise_bn_relu(x_cl, wdw, sh1[None, :])
    y = y[:, ::stride[0], ::stride[1], ::stride[2], :]
    N, Do, Ho, Wo, C = y.shape
    z = matmul_shift_act(y.reshape(N * Do * Ho * Wo, C), wpw, sh2[None, :], relu=True)
    return z.reshape(N, Do, Ho, Wo, wpw.shape[1])


def mobilenet_forward(x, params):
    """x: (N, 3, D, H, W) NCDHW (PyTorch layout). Returns (N, num_classes) logits."""
    x_cl = jnp.transpose(x, (0, 2, 3, 4, 1))   # single layout change; blocks stay NDHWC
    y = stem_conv_bn_relu(x_cl, params['stem_w'], params['stem_bn'], (1, 2, 2))
    for bp in params['blocks']:
        y = block_forward(y, bp)
    pooled = jnp.mean(y, axis=(1, 2, 3))        # F.avg_pool3d over full spatial extent
    # Dropout(0.2): inference-mode identity.
    logits = matmul_shift_act(pooled, params['fc_w'].T, params['fc_b'][None, :],
                              relu=False)
    return logits


# --------------------------- Reference (pure JAX) ---------------------------- #

def reference_forward(x, params):
    def conv(x, w, stride, padding, groups=1):
        return jax.lax.conv_general_dilated(
            x, w, stride, [(padding, padding)] * 3,
            dimension_numbers=('NCDHW', 'OIDHW', 'NCDHW'),
            feature_group_count=groups, precision=PREC)

    def bn(x, p):
        g, b, m, v = p
        rs = lambda a: a.reshape(1, -1, 1, 1, 1)
        return (x - rs(m)) / jnp.sqrt(rs(v) + EPS) * rs(g) + rs(b)

    y = jnp.maximum(bn(conv(x, params['stem_w'], (1, 2, 2), 1), params['stem_bn']), 0.0)
    for bp in params['blocks']:
        cin = bp['w_dw'].shape[0]
        y = jnp.maximum(bn(conv(y, bp['w_dw'], bp['stride'], 1, groups=cin), bp['bn1']), 0.0)
        y = jnp.maximum(bn(conv(y, bp['w_pw'], (1, 1, 1), 0), bp['bn2']), 0.0)
    pooled = jnp.mean(y, axis=(2, 3, 4))
    return jnp.dot(pooled, params['fc_w'].T, precision=PREC) + params['fc_b']


# -------------------------------- Param init --------------------------------- #

def init_params(key, num_classes=600, width_mult=1.0):
    input_channel = int(32 * width_mult)
    last_channel = int(1024 * width_mult)
    cfg = [[64, 1, (2, 2, 2)], [128, 2, (2, 2, 2)], [256, 2, (2, 2, 2)],
           [512, 6, (2, 2, 2)], [1024, 2, (1, 1, 1)]]

    n_blocks = sum(n for _, n, _ in cfg)
    keys = iter(jax.random.split(key, 4 * (n_blocks + 1) + 2))

    def conv_w(shape):
        fan_in = shape[1] * shape[2] * shape[3] * shape[4]
        bound = 1.0 / math.sqrt(fan_in)
        return jax.random.uniform(next(keys), shape, jnp.float32, -bound, bound)

    def bn_p(c):
        k1, k2, k3, k4 = jax.random.split(next(keys), 4)
        gamma = jax.random.uniform(k1, (c,), jnp.float32, 0.5, 1.5)
        beta = jax.random.uniform(k2, (c,), jnp.float32, -0.2, 0.2)
        mean = 0.1 * jax.random.normal(k3, (c,), jnp.float32)
        var = jax.random.uniform(k4, (c,), jnp.float32, 0.5, 1.5)
        return (gamma, beta, mean, var)

    params = {
        'stem_w': conv_w((input_channel, 3, 3, 3, 3)),
        'stem_bn': bn_p(input_channel),
    }
    blocks = []
    in_c = input_channel
    for c, n, s in cfg:
        out_c = int(c * width_mult)
        for i in range(n):
            stride = tuple(s) if i == 0 else (1, 1, 1)
            blocks.append({
                'stride': stride,
                'w_dw': conv_w((in_c, 1, 3, 3, 3)),
                'bn1': bn_p(in_c),
                'w_pw': conv_w((out_c, in_c, 1, 1, 1)),
                'bn2': bn_p(out_c),
            })
            in_c = out_c
    params['blocks'] = blocks
    fb = 1.0 / math.sqrt(last_channel)
    params['fc_w'] = jax.random.uniform(next(keys), (num_classes, last_channel),
                                        jnp.float32, -fb, fb)
    params['fc_b'] = jax.random.uniform(next(keys), (num_classes,),
                                        jnp.float32, -fb, fb)
    return params


if __name__ == "__main__":
    key = jax.random.PRNGKey(0)
    kx, kp = jax.random.split(key)

    # Small NCDHW video clip consistent with the module (3 input channels).
    N, C, D, H, W = 2, 3, 8, 32, 32
    x = jax.random.normal(kx, (N, C, D, H, W), jnp.float32)
    params = init_params(kp, num_classes=600, width_mult=1.0)

    out = mobilenet_forward(x, params)
    out = jax.block_until_ready(out)
    assert out.shape == (N, 600), out.shape

    ref = jax.block_until_ready(reference_forward(x, params))
    err = float(jnp.max(jnp.abs(out - ref)))
    scale = float(jnp.max(jnp.abs(ref)))
    assert err <= 1e-3 + 2e-2 * scale, f"max abs err {err} (ref scale {scale})"

    print("KERNEL_OK")
</pallas_src>

<mosaic_0001>
module attributes {stable_mosaic.version = 11 : i64} {
  func.func @_matmul_shift_act_kernel(%arg0: i32, %arg1: memref<1024x81xf32, #tpu.memory_space<vmem>>, %arg2: memref<81x32xf32, #tpu.memory_space<vmem>>, %arg3: memref<1x32xf32, #tpu.memory_space<vmem>>, %arg4: memref<1024x32xf32, #tpu.memory_space<vmem>>) attributes {dimension_semantics = [#tpu.dimension_semantics<parallel>], iteration_bounds = array<i64: 4>, scalar_prefetch = 0 : i64, scratch_operands = 0 : i64, tpu.core_type = #tpu.core_type<tc>, window_params = [{transform_indices = @transform_0, window_bounds = array<i64: 1024, 81>}, {pipeline_mode = #tpu.pipeline_mode<synchronous>, transform_indices = @transform_1, window_bounds = array<i64: 81, 32>}, {pipeline_mode = #tpu.pipeline_mode<synchronous>, transform_indices = @transform_2, window_bounds = array<i64: 1, 32>}, {transform_indices = @transform_3, window_bounds = array<i64: 1024, 32>}]} {
    %c0 = arith.constant 0 : index
    %c0_0 = arith.constant 0 : index
    %0 = vector.load %arg1[%c0, %c0_0] : memref<1024x81xf32, #tpu.memory_space<vmem>>, vector<1024x81xf32>
    %c0_1 = arith.constant 0 : index
    %c0_2 = arith.constant 0 : index
    %1 = vector.load %arg2[%c0_1, %c0_2] : memref<81x32xf32, #tpu.memory_space<vmem>>, vector<81x32xf32>
    %cst = arith.constant dense<0.000000e+00> : vector<1024x32xf32>
    %2 = tpu.matmul %0, %1, %cst {dimension_numbers = #tpu.dot_dimension_numbers<[1], [0], [0], [1], [0, 0, 1, 1], [], []>, precision = #tpu.contract_precision<fp32>} : vector<1024x81xf32>, vector<81x32xf32>, vector<1024x32xf32> -> vector<1024x32xf32>
    %c0_3 = arith.constant 0 : index
    %c0_4 = arith.constant 0 : index
    %3 = vector.load %arg3[%c0_3, %c0_4] : memref<1x32xf32, #tpu.memory_space<vmem>>, vector<1x32xf32>
    %4 = vector.broadcast %3 : vector<1x32xf32> to vector<1024x32xf32>
    %5 = arith.addf %2, %4 : vector<1024x32xf32>
    %cst_5 = arith.constant 0.000000e+00 : f32
    %6 = vector.broadcast %cst_5 : f32 to vector<1024x32xf32>
    %7 = arith.maximumf %5, %6 : vector<1024x32xf32>
    %c0_6 = arith.constant 0 : index
    %c0_7 = arith.constant 0 : index
    %8 = vector.load %arg4[%c0_6, %c0_7] : memref<1024x32xf32, #tpu.memory_space<vmem>>, vector<1024x32xf32>
    tpu.vector_store %arg4[%c0_6, %c0_7], %7 {strides = array<i32>} : memref<1024x32xf32, #tpu.memory_space<vmem>>, vector<1024x32xf32>,
    return
  }
  func.func @transform_0(%arg0: i32) -> (i32, i32) {
    %c0_i32 = arith.constant 0 : i32
    %c0_i32_0 = arith.constant 0 : i32
    return %arg0, %c0_i32 : i32, i32
  }
  func.func @transform_1(%arg0: i32) -> (i32, i32) {
    %c0_i32 = arith.constant 0 : i32
    %c0_i32_0 = arith.constant 0 : i32
    %c0_i32_1 = arith.constant 0 : i32
    return %c0_i32, %c0_i32_0 : i32, i32
  }
  func.func @transform_2(%arg0: i32) -> (i32, i32) {
    %c0_i32 = arith.constant 0 : i32
    %c0_i32_0 = arith.constant 0 : i32
    %c0_i32_1 = arith.constant 0 : i32
    return %c0_i32, %c0_i32_0 : i32, i32
  }
  func.func @transform_3(%arg0: i32) -> (i32, i32) {
    %c0_i32 = arith.constant 0 : i32
    %c0_i32_0 = arith.constant 0 : i32
    return %arg0, %c0_i32 : i32, i32
  }
}

</mosaic_0001>

<bundles_post_ra>
// kernel: tpu_custom_call.1
= control target key start
LH: loop header
LB: loop body
LE: loop exit
PB: predicated region body
PF: predicated region fallthrough
CT: control target
= control target key end

     0   :  { %s10118_s12 = smov 0   ;;  %s12709_s0 = inlined_call_operand.vmem [shape: f32[4096,81], index: 0, kind: input, shape index: {}]   ;;  %s12710_s1 = inlined_call_operand.vmem [shape: f32[81,32], index: 1, kind: input, shape index: {}]   ;;  %s12711_s2 = inlined_call_operand.vmem [shape: f32[1,32], index: 2, kind: input, shape index: {}]   ;;  %s12712_s3 = inlined_call_operand.vmem [shape: f32[4096,32], index: 3, kind: output, shape index: {}]  }
   0x1 LB: > { %s7059_s13 = sadd.s32 4294967295, %s10096_s12   ;;  %p7063_p0 = scmp.ge.s32.totalorder %s10096_s12, 1  ;;  %s10096_s12 = sphi %s10118_s12, %s13_s12  }
   0x2   : > { %p138_p1 = scmp.lt.s32.totalorder %s10096_s12, 5 }
   0x4   : > { %p139_p2 = pnand %p7063_p0, %p138_p1 }
   0x6   : > { %142 = sbr.rel (%p139_p2) target bundleno = 1024 (0x400), region = 32 }
   0xd   : > { %v302_v0 = vld [vmem:[%s12710_s1] sm:$0xff]  ;;  %v303_v1 = vld [vmem:[%s12710_s1 + $0x8] sm:$0xff]  ;;  %v304_v2 = vld [vmem:[%s12710_s1 + $0x10] sm:$0xff]  ;;  %s7064_s20 = sshll.u32 %s7059_s13, 7  ;;  %vm705_vm0 = vcmask 1040384   ;;  %vm320_vm1 = vcmask 662528  }
   0xe   : > { %v710_v3 = vand.u32 4294901760, %v302_v0  ;;  %v713_v4 = vand.u32 4294901760, %v303_v1  ;;  %v305_v5 = vld [vmem:[%s12710_s1 + $0x18] sm:$0xff]  ;;  %v716_v6 = vand.u32 4294901760, %v304_v2  ;;  %v10141_v7 = vld [vmem:[%s12710_s1 + $0x20] sm:$0xff]  ;;  %v10146_v8 = vld [vmem:[%s12710_s1 + $0x28] sm:$0xff] }
   0xf   : > { %v719_v9 = vand.u32 4294901760, %v305_v5  ;;  %v10151_v10 = vld [vmem:[%s12710_s1 + $0x30] sm:$0xff]  ;;  %v12718_v12 = vand.u32 4294901760, %v10141_v7  ;;  %v12717_v13 = vand.u32 4294901760, %v10146_v8  ;;  %v10160_v14 = vld [vmem:[%s12710_s1 + $0x38] sm:$0xff]  ;;  %v10165_v15 = vld [vmem:[%s12710_s1 + $0x40] sm:$0xff] }
  0x10   : > { %v10153_v11 = vpack.c.bf16 %v713_v4, %v710_v3  ;;  %v10170_v16 = vld [vmem:[%s12710_s1 + $0x48] sm:$0xff]  ;;  %p163_p3 = scmp.lt.s32.totalorder %s7064_s20, 511  ;;  %v10176_v18 = vsub.f32 %v302_v0, %v710_v3  ;;  %v10178_v19 = vsub.f32 %v303_v1, %v713_v4  ;;  %v12716_v20 = vand.u32 4294901760, %v10151_v10  ;;  %v312_v25 = vld [vmem:[%s12710_s1 + $0x50] sm:$0x1] }
  0x11   : > { %v10172_v17 = vpack.c.bf16 %v719_v9, %v716_v6  ;;  %v12715_v21 = vand.u32 4294901760, %v10160_v14  ;;  %v12714_v22 = vand.u32 4294901760, %v10165_v15  ;;  %v12713_v23 = vand.u32 4294901760, %v10170_v16 }
  0x12   : > { %9190 = vmatprep.subr.bf16.mxu1 %v10153_v11  ;;  %9250 = vmatprep.subr.bf16.mxu0 %v10153_v11  ;;  %s13823_s20 = smov (!%p163_p3, %s7064_s20), 511  ;;  %v10194_v24 = vpack.c.bf16 %v12717_v13, %v12718_v12  ;;  %v2068_v26 = vand.u32 4294901760, %v10176_v18  ;;  %v2075_v27 = vand.u32 4294901760, %v10178_v19  ;;  %v10228_v31 = vsel %vm705_vm0, %v312_v25, 0 }
  0x13   : > { %9192 = vmatpush3.bf16.msra.mxu1 %v10153_v11  ;;  %9252 = vmatpush3.bf16.msra.mxu0 %v10153_v11  ;;  %s7065_s10 = sshll.u32 %s13823_s20, 3  ;;  %v10220_v29 = vpack.c.bf16 %v12715_v21, %v12716_v20  ;;  %v10226_v30 = vpack.c.bf16 %v12713_v23, %v12714_v22  ;;  %v10233_v35 = vsub.f32 %v304_v2, %v716_v6  ;;  %v10305_v25 = vand.u32 4294901760, %v10228_v31 }
  0x14   : > { %9194 = vmatprep.subr.bf16.mxu1 %v10172_v17  ;;  %9254 = vmatprep.subr.bf16.mxu0 %v10172_v17  ;;  %s10207_s14 = scalar_lea.vmem %s12709_s0, %s7065_s10  ;;  %v10212_v28 = vsub.f32 %v10176_v18, %v2068_v26  ;;  %v2076_v38 = vsub.f32 %v10178_v19, %v2075_v27  ;;  %v10244_v41 = vsub.f32 %v305_v5, %v719_v9  ;;  %s12279_s28 = scalar_lea.vmem %s12712_s3, %s7065_s10  ;;  %vm6874_vm2 = vcmask 261120  }
  0x15   : > { %v174_v32 = vld [vmem:[%s10207_s14] sm:$0xff]  ;;  %v175_v33 = vld [vmem:[%s10207_s14 + $0x8] sm:$0xff]  ;;  %v176_v34 = vld [vmem:[%s10207_s14 + $0x10] sm:$0xff] }
  0x16   : > { %v322_v36 = vsel %vm320_vm1, %v174_v32, 0  ;;  %v325_v37 = vsel %vm320_vm1, %v175_v33, 0  ;;  %v177_v39 = vld [vmem:[%s10207_s14 + $0x18] sm:$0xff]  ;;  %v178_v40 = vld [vmem:[%s10207_s14 + $0x20] sm:$0xff]  ;;  %v328_v44 = vsel %vm320_vm1, %v176_v34, 0  ;;  %v179_v46 = vld [vmem:[%s10207_s14 + $0x28] sm:$0xff] }
  0x17   : > { %9196 = vmatpush3.bf16.msra.mxu1 %v10172_v17  ;;  %9256 = vmatpush3.bf16.msra.mxu0 %v10172_v17  ;;  %v10246_v42 = vand.u32 4294901760, %v322_v36  ;;  %v10248_v43 = vand.u32 4294901760, %v325_v37  ;;  %v331_v45 = vsel %vm320_vm1, %v177_v39, 0  ;;  %v180_v47 = vld [vmem:[%s10207_s14 + $0x30] sm:$0xff]  ;;  %v2070_v48 = vand.u32 4294901760, %v10212_v28  ;;  %v181_v56 = vld [vmem:[%s10207_s14 + $0x38] sm:$0xff] }
  0x18   : > { %9198 = vmatprep.subr.bf16.mxu1 %v10194_v24  ;;  %9258 = vmatprep.subr.bf16.mxu0 %v10194_v24  ;;  %v10255_v49 = vand.u32 4294901760, %v328_v44  ;;  %v10257_v50 = vand.u32 4294901760, %v331_v45  ;;  %v334_v51 = vsel %vm320_vm1, %v178_v40, 0  ;;  %v337_v55 = vsel %vm320_vm1, %v179_v46, 0  ;;  %v182_v33 = vld [vmem:[%s10207_s14 + $0x40] sm:$0xff]  ;;  %v183_v34 = vld [vmem:[%s10207_s14 + $0x48] sm:$0xff] }
  0x19   : > { %v10263_v52 = vsub.f32 %v322_v36, %v10246_v42  ;;  %v10266_v53 = vsub.f32 %v325_v37, %v10248_v43  ;;  %v10268_v54 = vand.u32 4294901760, %v334_v51  ;;  %v10280_v59 = vand.u32 4294901760, %v337_v55  ;;  %v188_v21 = vld [vmem:[%s10207_s14 + $0x70] sm:$0xff] }
  0x1a   : > { %v10275_v57 = vsub.f32 %v328_v44, %v10255_v49  ;;  %v10278_v58 = vsub.f32 %v331_v45, %v10257_v50  ;;  %v340_v60 = vsel %vm320_vm1, %v180_v47, 0  ;;  %v2077_v1 = vand.u32 4294901760, %v2076_v38  ;;  %v184_v47 = vld [vmem:[%s10207_s14 + $0x50] sm:$0xff] }
  0x1b   : > { %9200 = vmatpush3.bf16.msra.mxu1 %v10194_v24  ;;  %9260 = vmatpush3.bf16.msra.mxu0 %v10194_v24  ;;  %13142 = vst [vmem:[#allocation2_spill] sm:$0xff] %v10263_v52  ;;  %13143 = vst [vmem:[#allocation3_spill] sm:$0xff] %v10266_v53  ;;  %v787_v61 = vand.u32 4294901760, %v10263_v52  ;;  %v797_v62 = vand.u32 4294901760, %v10266_v53  ;;  %v10286_v63 = vsub.f32 %v334_v51, %v10268_v54  ;;  %v10288_v0 = vand.u32 4294901760, %v340_v60  ;;  %v185_v51 = vld [vmem:[%s10207_s14 + $0x58] sm:$0xff] }
  0x1c   : > { %9202 = vmatprep.subr.bf16.mxu1 %v10220_v29  ;;  %9262 = vmatprep.subr.bf16.mxu0 %v10220_v29  ;;  %13144 = vst [vmem:[#allocation4_spill] sm:$0xff] %v10275_v57  ;;  %13145 = vst [vmem:[#allocation5_spill] sm:$0xff] %v10278_v58  ;;  %v807_v2 = vand.u32 4294901760, %v10275_v57  ;;  %v817_v3 = vand.u32 4294901760, %v10278_v58  ;;  %v343_v4 = vsel %vm320_vm1, %v181_v56, 0  ;;  %v10300_v9 = vsub.f32 %v337_v55, %v10280_v59  ;;  %v186_v55 = vld [vmem:[%s10207_s14 + $0x60] sm:$0xff] }
  0x1d   : > { %13146 = vst [vmem:[#allocation6_spill] sm:$0xff] %v10286_v63  ;;  %v788_v5 = vsub.f32 %v10263_v52, %v787_v61  ;;  %v798_v6 = vsub.f32 %v10266_v53, %v797_v62  ;;  %v12722_v28 = vand.u32 4294901760, %v10286_v63  ;;  %v10308_v32 = vand.u32 4294901760, %v343_v4  ;;  %8569 = vmatprep.mubr.f32.mxu0 %v787_v61 }
  0x1e   : > { %13147 = vst [vmem:[#allocation7_spill] sm:$0xff] %v10300_v9  ;;  %v10313_v37 = vsub.f32 %v340_v60, %v10288_v0  ;;  %v12720_v38 = vand.u32 4294901760, %v10233_v35  ;;  %v12719_v39 = vand.u32 4294901760, %v10244_v41  ;;  %v9209_v40 = vpack.c.bf16 %v2077_v1, %v2070_v48 }
  0x1f   : > { %9204 = vmatpush3.bf16.msra.mxu1 %v10220_v29  ;;  %9264 = vmatpush3.bf16.msra.mxu0 %v10220_v29  ;;  %v789_v36 = vand.u32 4294901760, %v788_v5  ;;  %v9269_v44 = vpack.c.bf16 %v2075_v27, %v2068_v26  ;;  %v808_v45 = vsub.f32 %v10275_v57, %v807_v2  ;;  %v818_v46 = vsub.f32 %v10278_v58, %v817_v3 }
  0x20   : > { %9206 = vmatprep.subr.bf16.mxu1 %v10226_v30  ;;  %9266 = vmatprep.subr.bf16.mxu0 %v10226_v30  ;;  %13148 = vst [vmem:[#allocation8_spill] sm:$0xff] %v10313_v37  ;;  %v799_v48 = vand.u32 4294901760, %v798_v6  ;;  %v12721_v26 = vand.u32 4294901760, %v10300_v9  ;;  %v346_v27 = vsel %vm320_vm1, %v182_v33, 0  ;;  %v349_v56 = vsel %vm320_vm1, %v183_v34, 0  ;;  %v187_v6 = vld [vmem:[%s10207_s14 + $0x68] sm:$0xff] }
  0x21   : > { %v828_v60 = vsub.f32 %v10286_v63, %v12722_v28  ;;  %v10341_v61 = vsub.f32 %v343_v4, %v10308_v32  ;;  %v10343_v1 = vand.u32 4294901760, %v346_v27  ;;  %v10345_v5 = vand.u32 4294901760, %v349_v56  ;;  %7927 = vmatprep.mubr.f32.mxu1 %v789_v36 }
  0x22   : > { %v12723_v33 = vand.u32 4294901760, %v10313_v37  ;;  %v352_v34 = vsel %vm320_vm1, %v184_v47, 0  ;;  %v355_v23 = vsel %vm320_vm1, %v185_v51, 0  ;;  %v358_v22 = vsel %vm320_vm1, %v186_v55, 0 }
  0x23   : > { %9208 = vmatpush3.bf16.msra.mxu1 %v10226_v30  ;;  %9268 = vmatpush3.bf16.msra.mxu0 %v10226_v30  ;;  %13149 = vst [vmem:[#allocation9_spill] sm:$0xff] %v10341_v61  ;;  %v809_v20 = vand.u32 4294901760, %v808_v45  ;;  %v10354_v13 = vsub.f32 %v346_v27, %v10343_v1  ;;  %v10356_v4 = vand.u32 4294901760, %v352_v34  ;;  %v9273_v36 = vpack.c.bf16 %v12719_v39, %v12720_v38 }
  0x24   : > { %7925 = vmatprep.subr.mxu1 %v10305_v25  ;;  %8567 = vmatprep.subr.mxu0 %v10305_v25  ;;  %v819_v47 = vand.u32 4294901760, %v818_v46  ;;  %v838_v45 = vsub.f32 %v10300_v9, %v12721_v26  ;;  %v10367_v51 = vand.u32 4294901760, %v355_v23  ;;  %v361_v55 = vsel %vm320_vm1, %v187_v6, 0 }
  0x25   : > { %13150 = vst [vmem:[#allocation10_spill] sm:$0xff] %v10354_v13  ;;  %v12724_v27 = vand.u32 4294901760, %v10341_v61  ;;  %v10372_v12 = vsub.f32 %v349_v56, %v10345_v5  ;;  %v10374_v39 = vand.u32 4294901760, %v358_v22  ;;  %v364_v46 = vsel %vm320_vm1, %v188_v21, 0  ;;  %v189_v56 = vld [vmem:[%s10207_s14 + $0x78] sm:$0xff] }
  0x26   : > { %13151 = vst [vmem:[#allocation11_spill] sm:$0xff] %v10367_v51  ;;  %v829_v38 = vand.u32 4294901760, %v828_v60  ;;  %v12725_v6 = vand.u32 4294901760, %v10354_v13  ;;  %v10384_v26 = vsub.f32 %v352_v34, %v10356_v4  ;;  %v10388_v21 = vsub.f32 %v355_v23, %v10367_v51  ;;  %v190_v60 = vld [vmem:[%s10207_s14 + $0x80] sm:$0xff] }
  0x27   : > { %7926 = vmatpush3.msra.mxu1 %v10305_v25  ;;  %8568 = vmatpush3.msra.mxu0 %v10305_v25  ;;  %13152 = vst [vmem:[#allocation12_spill] sm:$0xff] %v10372_v12  ;;  %13153 = vst [vmem:[#allocation13_spill] sm:$0xff] %v10374_v39  ;;  %v10390_v28 = vand.u32 4294901760, %v361_v55  ;;  %v10402_v34 = vsub.f32 %v358_v22, %v10374_v39  ;;  %v370_v23 = vsel %vm320_vm1, %v190_v60, 0  ;;  %v13164_v60 = vand.u32 4294901760, %v10300_v9  ;;  %v213_v39 = vld [vmem:[%s10207_s14 + $0x138] sm:$0xff] }
  0x28   : > { %7928 = vmatmul.mubr.f32.vlgmr.msra.gmra.mrb[0].mxu1 %v799_v48  ;;  %9210 = vmatprep.subr.bf16.mxu1 %v9209_v40  ;;  %v848_v48 = vsub.f32 %v10313_v37, %v12723_v33  ;;  %13154 = vst [vmem:[#allocation14_spill] sm:$0xff] %v10384_v26  ;;  %13155 = vst [vmem:[#allocation15_spill] sm:$0xff] %v10388_v21  ;;  %v367_v33 = vsel %vm320_vm1, %v189_v56, 0  ;;  %v10433_v57 = vand.u32 4294901760, %v370_v23 }
  0x29   : > { %8570 = vmatmul.mubr.f32.vlgmr.msra.gmra.mrb[0].mxu0 %v797_v62  ;;  %9212 = vmatpush3.bf16.msra.mxu1 %v9209_v40  ;;  %13156 = vst [vmem:[#allocation16_spill] sm:$0xff] %v10390_v28  ;;  %v839_v62 = vand.u32 4294901760, %v838_v45  ;;  %v10394_v40 = vand.u32 4294901760, %v364_v46  ;;  %13158 = vst [vmem:[#allocation18_spill] sm:$0xff] %v10402_v34  ;;  %v191_v45 = vld [vmem:[%s10207_s14 + $0x88] sm:$0xff]  ;;  %v10416_v56 = vsub.f32 %v361_v55, %v10390_v28  ;;  %v198_v28 = vld [vmem:[%s10207_s14 + $0xc0] sm:$0xff] }
  0x2a   : > { %9270 = vmatprep.subr.bf16.mxu0 %v9269_v44  ;;  %7930 = vmatprep.mubr.f32.mxu1 %v809_v20  ;;  %v858_v20 = vsub.f32 %v10341_v61, %v12724_v27  ;;  %v13159_v27 = vand.u32 4294901760, %v10286_v63  ;;  %v13163_v63 = vand.u32 4294901760, %v10372_v12  ;;  %v373_v55 = vsel %vm320_vm1, %v191_v45, 0  ;;  %13165 = vst [vmem:[#allocation22_spill] sm:$0xff] %v10433_v57 }
  0x2b   : > { %8572 = vmatprep.mubr.f32.mxu0 %v807_v2  ;;  %9272 = vmatpush3.bf16.msra.mxu0 %v9269_v44  ;;  %13157 = vst [vmem:[#allocation17_spill] sm:$0xff] %v10394_v40  ;;  %v849_v2 = vand.u32 4294901760, %v848_v48  ;;  %v868_v44 = vsub.f32 %v10354_v13, %v12725_v6  ;;  %13160 = vst [vmem:[#allocation19_spill] sm:$0xff] %v10416_v56  ;;  %v10423_v48 = vand.u32 4294901760, %v367_v33  ;;  %v13172_v45 = vand.u32 4294901760, %v10244_v41 }
  0x2c   : > { %7931 = vmatmul.mubr.f32.gmra.mrb[2].mxu1 %v819_v47  ;;  %9274 = vmatprep.subr.bf16.mxu0 %v9273_v36  ;;  %v887_v47 = vand.u32 4294901760, %v10384_v26  ;;  %v859_v6 = vand.u32 4294901760, %v858_v20  ;;  %v13166_v20 = vand.u32 4294901760, %v10313_v37 }
  0x2d   : > { %8573 = vmatmul.mubr.f32.gmra.mrb[2].mxu0 %v817_v3  ;;  %7933 = vmatprep.mubr.f32.mxu1 %v829_v38  ;;  %v192_v3 = vld [vmem:[%s10207_s14 + $0x90] sm:$0xff]  ;;  %v10421_v38 = vsub.f32 %v364_v46, %v10394_v40  ;;  %13162 = vst [vmem:[#allocation21_spill] sm:$0xff] %v10423_v48  ;;  %v869_v46 = vand.u32 4294901760, %v868_v44  ;;  %v2090_v53 = vsub.f32 %v10244_v41, %v13172_v45  ;;  %v13177_v45 = vand.u32 4294901760, %v10416_v56 }
  0x2e   : > { %8575 = vmatprep.mubr.f32.mxu0 %v13159_v27  ;;  %v878_v27 = vsub.f32 %v10372_v12, %v13163_v63  ;;  %v888_v58 = vsub.f32 %v10384_v26, %v887_v47  ;;  %v13167_v63 = vand.u32 4294901760, %v10388_v21  ;;  %v10450_v26 = vand.u32 4294901760, %v373_v55 }
  0x2f   : > { %13161 = vst [vmem:[#allocation20_spill] sm:$0xff] %v10421_v38  ;;  %9276 = vmatpush3.bf16.msra.mxu0 %v9273_v36  ;;  %v376_v36 = vsel %vm320_vm1, %v192_v3, 0  ;;  %v10448_v3 = vsub.f32 %v367_v33, %v10423_v48  ;;  %v13174_v33 = vand.u32 4294901760, %v10402_v34  ;;  %v196_v48 = vld [vmem:[%s10207_s14 + $0xb0] sm:$0xff] }
  0x30   : > { %7934 = vmatmul.mubr.f32.gmra.mrb[4].mxu1 %v839_v62  ;;  %v193_v62 = vld [vmem:[%s10207_s14 + $0x98] sm:$0xff]  ;;  %v898_v22 = vsub.f32 %v10388_v21, %v13167_v63  ;;  %13170 = vst [vmem:[#allocation24_spill] sm:$0xff] %v10450_v26  ;;  %v879_v37 = vand.u32 4294901760, %v878_v27  ;;  %v10453_v9 = vand.u32 4294901760, %v376_v36  ;;  %v889_v44 = vand.u32 4294901760, %v888_v58  ;;  %v195_v27 = vld [vmem:[%s10207_s14 + $0xa8] sm:$0xff] }
  0x31   : > { %8576 = vmatmul.mubr.f32.gmra.mrb[4].mxu0 %v13164_v60  ;;  %7936 = vmatprep.mubr.f32.mxu1 %v849_v2  ;;  %v13168_v60 = vand.u32 4294901760, %v10233_v35  ;;  %13169 = vst [vmem:[#allocation23_spill] sm:$0xff] %v10448_v3  ;;  %v379_v63 = vsel %vm320_vm1, %v193_v62, 0  ;;  %v908_v52 = vsub.f32 %v10402_v34, %v13174_v33  ;;  %v13176_v62 = vand.u32 4294901760, %v10354_v13 }
  0x32   : > { %8578 = vmatprep.mubr.f32.mxu0 %v13166_v20  ;;  %v194_v20 = vld [vmem:[%s10207_s14 + $0xa0] sm:$0xff]  ;;  %13171 = vst [vmem:[#allocation25_spill] sm:$0xff] %v10453_v9  ;;  %v899_v40 = vand.u32 4294901760, %v898_v22  ;;  %v10485_v22 = vsub.f32 %v376_v36, %v10453_v9 }
  0x33   : > { %v2083_v2 = vsub.f32 %v10233_v35, %v13168_v60  ;;  %v13173_v60 = vand.u32 4294901760, %v10341_v61  ;;  %v918_v61 = vsub.f32 %v10416_v56, %v13177_v45  ;;  %v2091_v45 = vand.u32 4294901760, %v2090_v53 }
  0x34   : > { %7937 = vmatmul.mubr.f32.gmra.mrb[6].mxu1 %v859_v6  ;;  %v10465_v6 = vsub.f32 %v370_v23, %v10433_v57  ;;  %v10480_v57 = vsub.f32 %v373_v55, %v10450_v26  ;;  %13181 = vst [vmem:[#allocation29_spill] sm:$0xff] %v10485_v22  ;;  %v909_v23 = vand.u32 4294901760, %v908_v52  ;;  %v13186_v52 = vand.u32 4294901760, %v10448_v3 }
  0x35   : > { %8579 = vmatmul.mubr.f32.gmra.mrb[6].mxu0 %v13173_v60  ;;  %7939 = vmatprep.mubr.f32.mxu1 %v869_v46  ;;  %v382_v46 = vsel %vm320_vm1, %v194_v20, 0  ;;  %v2084_v58 = vand.u32 4294901760, %v2083_v2  ;;  %v13178_v60 = vand.u32 4294901760, %v10421_v38  ;;  %v385_v20 = vsel %vm320_vm1, %v195_v27, 0 }
  0x36   : > { %13175 = vst [vmem:[#allocation26_spill] sm:$0xff] %v10465_v6  ;;  %8581 = vmatprep.mubr.f32.mxu0 %v13176_v62  ;;  %13179 = vst [vmem:[#allocation27_spill] sm:$0xff] %v10480_v57  ;;  %v10482_v62 = vand.u32 4294901760, %v379_v63  ;;  %v388_v2 = vsel %vm320_vm1, %v196_v48, 0  ;;  %v947_v13 = vand.u32 4294901760, %v10465_v6  ;;  %v10492_v55 = vand.u32 4294901760, %v382_v46 }
  0x37   : > { %v928_v33 = vsub.f32 %v10421_v38, %v13178_v60  ;;  %v13182_v60 = vand.u32 4294901760, %v10372_v12  ;;  %v9213_v26 = vpack.c.bf16 %v2091_v45, %v2084_v58  ;;  %v919_v36 = vand.u32 4294901760, %v918_v61 }
  0x38   : > { %13180 = vst [vmem:[#allocation28_spill] sm:$0xff] %v10482_v62  ;;  %7940 = vmatmul.mubr.f32.gmra.mrb[8].mxu1 %v879_v37  ;;  %13183 = vst [vmem:[#allocation30_spill] sm:$0xff] %v10492_v55  ;;  %v197_v37 = vld [vmem:[%s10207_s14 + $0xb8] sm:$0xff]  ;;  %v12750_v9 = vand.u32 4294901760, %v10480_v57  ;;  %v10497_v27 = vand.u32 4294901760, %v385_v20  ;;  %v10499_v53 = vand.u32 4294901760, %v388_v2  ;;  %v10506_v58 = vsub.f32 %v379_v63, %v10482_v62 }
  0x39   : > { %8582 = vmatmul.mubr.f32.gmra.mrb[8].mxu0 %v13182_v60  ;;  %7942 = vmatprep.mubr.f32.mxu1 %v889_v44  ;;  %v929_v48 = vand.u32 4294901760, %v928_v33  ;;  %v938_v44 = vsub.f32 %v10448_v3, %v13186_v52  ;;  %v13188_v61 = vand.u32 4294901760, %v10388_v21  ;;  %v948_v45 = vsub.f32 %v10465_v6, %v947_v13  ;;  %v199_v63 = vld [vmem:[%s10207_s14 + $0xc8] sm:$0xff]  ;;  %v201_v6 = vld [vmem:[%s10207_s14 + $0xd8] sm:$0xff] }
  0x3a   : > { %8584 = vmatprep.mubr.f32.mxu0 %v887_v47  ;;  %13184 = vst [vmem:[#allocation31_spill] sm:$0xff] %v10497_v27  ;;  %13185 = vst [vmem:[#allocation32_spill] sm:$0xff] %v10499_v53  ;;  %9214 = vmatprep.subr.bf16.mxu1 %v9213_v26  ;;  %v391_v33 = vsel %vm320_vm1, %v197_v37, 0  ;;  %v394_v60 = vsel %vm320_vm1, %v198_v28, 0  ;;  %v13190_v52 = vand.u32 4294901760, %v10402_v34  ;;  %v958_v47 = vsub.f32 %v10480_v57, %v12750_v9 }
  0x3b   : > { %13187 = vst [vmem:[#allocation33_spill] sm:$0xff] %v10506_v58  ;;  %9216 = vmatpush3.bf16.msra.mxu1 %v9213_v26  ;;  %v939_v37 = vand.u32 4294901760, %v938_v44  ;;  %v977_v28 = vand.u32 4294901760, %v10506_v58  ;;  %v10533_v26 = vand.u32 4294901760, %v394_v60  ;;  %v13195_v34 = vand.u32 4294901760, %v10416_v56 }
  0x3c   : > { %7943 = vmatmul.mubr.f32.gmra.mrb[10].mxu1 %v899_v40  ;;  %v10512_v40 = vsub.f32 %v382_v46, %v10492_v55  ;;  %v200_v46 = vld [vmem:[%s10207_s14 + $0xd0] sm:$0xff]  ;;  %v13196_v9 = vand.u32 4294901760, %v10485_v22  ;;  %v397_v44 = vsel %vm320_vm1, %v199_v63, 0  ;;  %v13197_v21 = vand.u32 4294901760, %v10421_v38 }
  0x3d   : > { %8585 = vmatmul.mubr.f32.gmra.mrb[10].mxu0 %v13188_v61  ;;  %7945 = vmatprep.mubr.f32.mxu1 %v909_v23  ;;  %v10523_v23 = vsub.f32 %v385_v20, %v10497_v27  ;;  %v10526_v61 = vsub.f32 %v388_v2, %v10499_v53  ;;  %13194 = vst [vmem:[#allocation38_spill] sm:$0xff] %v10533_v26  ;;  %v949_v20 = vand.u32 4294901760, %v948_v45  ;;  %v400_v12 = vsel %vm320_vm1, %v200_v46, 0  ;;  %v202_v53 = vld [vmem:[%s10207_s14 + $0xe0] sm:$0xff]  ;;  %v203_v46 = vld [vmem:[%s10207_s14 + $0xe8] sm:$0xff]  ;;  %v204_v38 = vld [vmem:[%s10207_s14 + $0xf0] sm:$0xff] }
  0x3e   : > { %13189 = vst [vmem:[#allocation34_spill] sm:$0xff] %v10512_v40  ;;  %8587 = vmatprep.mubr.f32.mxu0 %v13190_v52  ;;  %v10531_v52 = vand.u32 4294901760, %v391_v33  ;;  %v968_v2 = vsub.f32 %v10485_v22, %v13196_v9  ;;  %v403_v56 = vsel %vm320_vm1, %v201_v6, 0  ;;  %v978_v9 = vsub.f32 %v10506_v58, %v977_v28 }
  0x3f   : > { %13191 = vst [vmem:[#allocation35_spill] sm:$0xff] %v10523_v23  ;;  %13192 = vst [vmem:[#allocation36_spill] sm:$0xff] %v10526_v61  ;;  %v10554_v63 = vsub.f32 %v394_v60, %v10533_v26  ;;  %v13201_v6 = vand.u32 4294901760, %v10448_v3  ;;  %v13204_v60 = vand.u32 4294901760, %v10523_v23  ;;  %v13205_v26 = vand.u32 4294901760, %v10526_v61 }
  0x40   : > { %7946 = vmatmul.mubr.f32.gmra.mrb[12].mxu1 %v919_v36  ;;  %13193 = vst [vmem:[#allocation37_spill] sm:$0xff] %v10531_v52  ;;  %v987_v36 = vand.u32 4294901760, %v10512_v40  ;;  %v10551_v27 = vsub.f32 %v391_v33, %v10531_v52  ;;  %v406_v33 = vsel %vm320_vm1, %v202_v53, 0 }
  0x41   : > { %8588 = vmatmul.mubr.f32.gmra.mrb[12].mxu0 %v13195_v34  ;;  %7948 = vmatprep.mubr.f32.mxu1 %v929_v48  ;;  %v959_v34 = vand.u32 4294901760, %v958_v47  ;;  %13199 = vst [vmem:[#allocation40_spill] sm:$0xff] %v10554_v63  ;;  %v969_v47 = vand.u32 4294901760, %v968_v2  ;;  %v10565_v48 = vand.u32 4294901760, %v403_v56  ;;  %v998_v58 = vsub.f32 %v10523_v23, %v13204_v60 }
  0x42   : > { %8590 = vmatprep.mubr.f32.mxu0 %v13197_v21  ;;  %13198 = vst [vmem:[#allocation39_spill] sm:$0xff] %v10551_v27  ;;  %v10556_v21 = vand.u32 4294901760, %v397_v44  ;;  %v988_v45 = vsub.f32 %v10512_v40, %v987_v36  ;;  %v412_v2 = vsel %vm320_vm1, %v204_v38, 0  ;;  %v979_v40 = vand.u32 4294901760, %v978_v9  ;;  %v205_v9 = vld [vmem:[%s10207_s14 + $0xf8] sm:$0xff] }
  0x43   : > { %13203 = vst [vmem:[#allocation43_spill] sm:$0xff] %v10565_v48  ;;  %v13207_v60 = vand.u32 4294901760, %v10480_v57  ;;  %v10587_v38 = vsub.f32 %v403_v56, %v10565_v48  ;;  %v13214_v56 = vand.u32 4294901760, %v10554_v63 }
  0x44   : > { %7949 = vmatmul.mubr.f32.gmra.mrb[14].mxu1 %v939_v37  ;;  %13200 = vst [vmem:[#allocation41_spill] sm:$0xff] %v10556_v21  ;;  %v10563_v37 = vand.u32 4294901760, %v400_v12  ;;  %v10579_v3 = vsub.f32 %v397_v44, %v10556_v21  ;;  %v989_v52 = vand.u32 4294901760, %v988_v45  ;;  %v10596_v44 = vand.u32 4294901760, %v412_v2 }
  0x45   : > { %8591 = vmatmul.mubr.f32.gmra.mrb[14].mxu0 %v13201_v6  ;;  %7951 = vmatprep.mubr.f32.mxu1 %v949_v20  ;;  %v1008_v6 = vsub.f32 %v10526_v61, %v13205_v26  ;;  %v409_v20 = vsel %vm320_vm1, %v203_v46, 0  ;;  %13209 = vst [vmem:[#allocation46_spill] sm:$0xff] %v10587_v38  ;;  %v13211_v46 = vand.u32 4294901760, %v10485_v22  ;;  %v1028_v57 = vsub.f32 %v10554_v63, %v13214_v56 }
  0x46   : > { %13202 = vst [vmem:[#allocation42_spill] sm:$0xff] %v10563_v37  ;;  %8593 = vmatprep.mubr.f32.mxu0 %v947_v13  ;;  %v1017_v13 = vand.u32 4294901760, %v10551_v27  ;;  %13206 = vst [vmem:[#allocation44_spill] sm:$0xff] %v10579_v3  ;;  %v10584_v26 = vsub.f32 %v400_v12, %v10563_v37  ;;  %v10594_v53 = vand.u32 4294901760, %v409_v20  ;;  %v12775_v48 = vand.u32 4294901760, %v10579_v3 }
  0x47   : > { %13213 = vst [vmem:[#allocation49_spill] sm:$0xff] %v10596_v44  ;;  %v1009_v45 = vand.u32 4294901760, %v1008_v6  ;;  %v207_v6 = vld [vmem:[%s10207_s14 + $0x108] sm:$0xff]  ;;  %v10616_v56 = vsub.f32 %v412_v2, %v10596_v44  ;;  %v13220_v37 = vand.u32 4294901760, %v10146_v8  ;;  %v1029_v22 = vand.u32 4294901760, %v1028_v57 }
  0x48   : > { %7952 = vmatmul.mubr.f32.gmra.mrb[16].mxu1 %v959_v34  ;;  %13208 = vst [vmem:[#allocation45_spill] sm:$0xff] %v10584_v26  ;;  %v10589_v34 = vand.u32 4294901760, %v406_v33  ;;  %13212 = vst [vmem:[#allocation48_spill] sm:$0xff] %v10594_v53  ;;  %v1018_v12 = vsub.f32 %v10551_v27, %v1017_v13  ;;  %v10613_v27 = vsub.f32 %v409_v20, %v10594_v53  ;;  %v13223_v44 = vand.u32 4294901760, %v10584_v26 }
  0x49   : > { %8594 = vmatmul.mubr.f32.gmra.mrb[16].mxu0 %v13207_v60  ;;  %7954 = vmatprep.mubr.f32.mxu1 %v969_v47  ;;  %v206_v60 = vld [vmem:[%s10207_s14 + $0x100] sm:$0xff]  ;;  %v999_v47 = vand.u32 4294901760, %v998_v58  ;;  %13217 = vst [vmem:[#allocation52_spill] sm:$0xff] %v10616_v56  ;;  %v1038_v20 = vsub.f32 %v10579_v3, %v12775_v48  ;;  %v209_v48 = vld [vmem:[%s10207_s14 + $0x118] sm:$0xff]  ;;  %v13225_v53 = vand.u32 4294901760, %v10526_v61  ;;  %v13236_v62 = vand.u32 4294901760, %v10579_v3 }
  0x4a   : > { %13210 = vst [vmem:[#allocation47_spill] sm:$0xff] %v10589_v34  ;;  %8596 = vmatprep.mubr.f32.mxu0 %v13211_v46  ;;  %v415_v46 = vsel %vm320_vm1, %v205_v9, 0  ;;  %v10608_v58 = vsub.f32 %v406_v33, %v10589_v34  ;;  %13216 = vst [vmem:[#allocation51_spill] sm:$0xff] %v10613_v27  ;;  %v208_v33 = vld [vmem:[%s10207_s14 + $0x110] sm:$0xff] }
  0x4b   : > { %v10623_v9 = vand.u32 4294901760, %v415_v46  ;;  %v424_v57 = vsel %vm320_vm1, %v208_v33, 0 }
  0x4c   : > { %7955 = vmatmul.mubr.f32.gmra.mrb[18].mxu1 %v979_v40  ;;  %13215 = vst [vmem:[#allocation50_spill] sm:$0xff] %v10608_v58  ;;  %v418_v40 = vsel %vm320_vm1, %v206_v60, 0  ;;  %v10629_v60 = vsub.f32 %v10146_v8, %v13220_v37  ;;  %v1048_v8 = vsub.f32 %v10584_v26, %v13223_v44  ;;  %v13224_v37 = vand.u32 4294901760, %v10587_v38 }
  0x4d   : > { %8597 = vmatmul.mubr.f32.gmra.mrb[18].mxu0 %v977_v28  ;;  %7957 = vmatprep.mubr.f32.mxu1 %v989_v52  ;;  %v13218_v28 = vand.u32 4294901760, %v10141_v7  ;;  %13219 = vst [vmem:[#allocation53_spill] sm:$0xff] %v10623_v9  ;;  %v10634_v2 = vand.u32 4294901760, %v418_v40  ;;  %v10654_v44 = vsub.f32 %v415_v46, %v10623_v9  ;;  %v13229_v46 = vand.u32 4294901760, %v10608_v58 }
  0x4e   : > { %8599 = vmatprep.mubr.f32.mxu0 %v987_v36  ;;  %v1019_v36 = vand.u32 4294901760, %v1018_v12  ;;  %v1039_v12 = vand.u32 4294901760, %v1038_v20  ;;  %v1049_v33 = vand.u32 4294901760, %v1048_v8  ;;  %v10668_v21 = vand.u32 4294901760, %v424_v57 }
  0x4f   : > { %v10621_v52 = vsub.f32 %v10141_v7, %v13218_v28  ;;  %13221 = vst [vmem:[#allocation54_spill] sm:$0xff] %v10634_v2  ;;  %v421_v7 = vsel %vm320_vm1, %v207_v6, 0  ;;  %v13222_v28 = vand.u32 4294901760, %v10523_v23  ;;  %13226 = vst [vmem:[#allocation55_spill] sm:$0xff] %v10654_v44  ;;  %v10660_v61 = vsub.f32 %v418_v40, %v10634_v2  ;;  %v211_v6 = vld [vmem:[%s10207_s14 + $0x128] sm:$0xff] }
  0x50   : > { %7958 = vmatmul.mubr.f32.gmra.mrb[20].mxu1 %v999_v47  ;;  %v1058_v47 = vsub.f32 %v10587_v38, %v13224_v37  ;;  %v10656_v23 = vand.u32 4294901760, %v421_v7  ;;  %v210_v37 = vld [vmem:[%s10207_s14 + $0x120] sm:$0xff]  ;;  %v1068_v9 = vsub.f32 %v10608_v58, %v13229_v46  ;;  %13230 = vst [vmem:[#allocation58_spill] sm:$0xff] %v10668_v21  ;;  %v13231_v20 = vand.u32 4294901760, %v10554_v63 }
  0x51   : > { %8600 = vmatmul.mubr.f32.gmra.mrb[20].mxu0 %v13222_v28  ;;  %7960 = vmatprep.mubr.f32.mxu1 %v1009_v45  ;;  %v2096_v28 = vand.u32 4294901760, %v10621_v52  ;;  %13228 = vst [vmem:[#allocation57_spill] sm:$0xff] %v10660_v61  ;;  %v2103_v45 = vand.u32 4294901760, %v10629_v60  ;;  %v13232_v40 = vand.u32 4294901760, %v10613_v27  ;;  %v13233_v2 = vand.u32 4294901760, %v10616_v56 }
  0x52   : > { %8602 = vmatprep.mubr.f32.mxu0 %v13225_v53  ;;  %13227 = vst [vmem:[#allocation56_spill] sm:$0xff] %v10656_v23  ;;  %v427_v53 = vsel %vm320_vm1, %v209_v48, 0  ;;  %v1059_v34 = vand.u32 4294901760, %v1058_v47  ;;  %v10683_v46 = vsub.f32 %v421_v7, %v10656_v23  ;;  %v1069_v47 = vand.u32 4294901760, %v1068_v9 }
  0x53   : > { %v1078_v48 = vsub.f32 %v10613_v27, %v13232_v40  ;;  %v2097_v8 = vsub.f32 %v10621_v52, %v2096_v28  ;;  %v10685_v63 = vand.u32 4294901760, %v427_v53  ;;  %v10694_v7 = vsub.f32 %v424_v57, %v10668_v21  ;;  %v215_v21 = vld [vmem:[%s10207_s14 + $0x148] sm:$0xff] }
  0x54   : > { %7961 = vmatmul.mubr.f32.gmra.mrb[22].mxu1 %v1019_v36  ;;  %v212_v36 = vld [vmem:[%s10207_s14 + $0x130] sm:$0xff]  ;;  %13234 = vst [vmem:[#allocation59_spill] sm:$0xff] %v10683_v46  ;;  %v13239_v51 = vand.u32 4294901760, %v10654_v44 }
  0x55   : > { %8603 = vmatmul.mubr.f32.gmra.mrb[22].mxu0 %v1017_v13  ;;  %7963 = vmatprep.mubr.f32.mxu1 %v1029_v22  ;;  %v1088_v22 = vsub.f32 %v10616_v56, %v13233_v2  ;;  %v430_v13 = vsel %vm320_vm1, %v210_v37, 0  ;;  %13235 = vst [vmem:[#allocation60_spill] sm:$0xff] %v10685_v63  ;;  %v436_v2 = vsel %vm320_vm1, %v212_v36, 0  ;;  %v2098_v55 = vand.u32 4294901760, %v2097_v8  ;;  %13237 = vst [vmem:[#allocation61_spill] sm:$0xff] %v10694_v7  ;;  %v214_v36 = vld [vmem:[%s10207_s14 + $0x140] sm:$0xff] }
  0x56   : > { %8605 = vmatprep.mubr.f32.mxu0 %v13231_v20  ;;  %v433_v20 = vsel %vm320_vm1, %v211_v6, 0  ;;  %v2104_v37 = vsub.f32 %v10629_v60, %v2103_v45  ;;  %v10696_v23 = vand.u32 4294901760, %v430_v13  ;;  %v1079_v6 = vand.u32 4294901760, %v1078_v48 }
  0x57   : > { %v1089_v40 = vand.u32 4294901760, %v1088_v22  ;;  %v1098_v3 = vsub.f32 %v10654_v44, %v13239_v51  ;;  %v10708_v9 = vand.u32 4294901760, %v433_v20  ;;  %v10710_v57 = vand.u32 4294901760, %v436_v2 }
  0x58   : > { %7964 = vmatmul.mubr.f32.gmra.mrb[24].mxu1 %v1039_v12  ;;  %v13238_v12 = vand.u32 4294901760, %v10584_v26  ;;  %v2105_v8 = vand.u32 4294901760, %v2104_v37  ;;  %v1117_v22 = vand.u32 4294901760, %v10683_v46  ;;  %v439_v37 = vsel %vm320_vm1, %v213_v39, 0  ;;  %v217_v39 = vld [vmem:[%s10207_s14 + $0x158] sm:$0xff] }
  0x59   : > { %8606 = vmatmul.mubr.f32.gmra.mrb[24].mxu0 %v13236_v62  ;;  %7966 = vmatprep.mubr.f32.mxu1 %v1049_v33  ;;  %v10706_v62 = vsub.f32 %v427_v53, %v10685_v63  ;;  %13241 = vst [vmem:[#allocation63_spill] sm:$0xff] %v10708_v9  ;;  %13242 = vst [vmem:[#allocation64_spill] sm:$0xff] %v10710_v57  ;;  %v13243_v33 = vand.u32 4294901760, %v10660_v61  ;;  %v13244_v51 = vand.u32 4294901760, %v10587_v38  ;;  %v1127_v53 = vand.u32 4294901760, %v10694_v7  ;;  %v221_v38 = vld [vmem:[%s10207_s14 + $0x178] sm:$0xff] }
  0x5a   : > { %8608 = vmatprep.mubr.f32.mxu0 %v13238_v12  ;;  %v9217_v12 = vpack.c.bf16 %v2105_v8, %v2098_v55  ;;  %v10721_v26 = vsub.f32 %v430_v13, %v10696_v23  ;;  %v9277_v63 = vpack.c.bf16 %v2103_v45, %v2096_v28  ;;  %v10729_v55 = vsub.f32 %v433_v20, %v10708_v9  ;;  %v216_v13 = vld [vmem:[%s10207_s14 + $0x150] sm:$0xff] }
  0x5b   : > { %13240 = vst [vmem:[#allocation62_spill] sm:$0xff] %v10706_v62  ;;  %v1108_v48 = vsub.f32 %v10660_v61, %v13243_v33  ;;  %v13246_v33 = vand.u32 4294901760, %v10608_v58  ;;  %v10734_v8 = vand.u32 4294901760, %v439_v37  ;;  %v1099_v45 = vand.u32 4294901760, %v1098_v3 }
  0x5c   : > { %7967 = vmatmul.mubr.f32.gmra.mrb[26].mxu1 %v1059_v34  ;;  %13245 = vst [vmem:[#allocation65_spill] sm:$0xff] %v10721_v26  ;;  %v442_v34 = vsel %vm320_vm1, %v214_v36, 0  ;;  %9218 = vmatprep.subr.bf16.mxu1 %v9217_v12  ;;  %13247 = vst [vmem:[#allocation66_spill] sm:$0xff] %v10729_v55  ;;  %v1118_v28 = vsub.f32 %v10683_v46, %v1117_v22  ;;  %v13251_v20 = vand.u32 4294901760, %v10613_v27  ;;  %v448_v3 = vsel %vm320_vm1, %v216_v13, 0  ;;  %v219_v27 = vld [vmem:[%s10207_s14 + $0x168] sm:$0xff] }
  0x5d   : > { %8609 = vmatmul.mubr.f32.gmra.mrb[26].mxu0 %v13244_v51  ;;  %7969 = vmatprep.mubr.f32.mxu1 %v1069_v47  ;;  %v10732_v47 = vsub.f32 %v436_v2, %v10710_v57  ;;  %13249 = vst [vmem:[#allocation68_spill] sm:$0xff] %v10734_v8  ;;  %v10738_v36 = vand.u32 4294901760, %v442_v34  ;;  %v1109_v2 = vand.u32 4294901760, %v1108_v48  ;;  %v1128_v51 = vsub.f32 %v10694_v7, %v1127_v53  ;;  %v218_v7 = vld [vmem:[%s10207_s14 + $0x160] sm:$0xff] }
  0x5e   : > { %8611 = vmatprep.mubr.f32.mxu0 %v13246_v33  ;;  %9220 = vmatpush3.bf16.msra.mxu1 %v9217_v12  ;;  %v1147_v33 = vand.u32 4294901760, %v10721_v26  ;;  %v445_v12 = vsel %vm320_vm1, %v215_v21, 0  ;;  %v13253_v46 = vand.u32 4294901760, %v10706_v62  ;;  %v1119_v21 = vand.u32 4294901760, %v1118_v28 }
  0x5f   : > { %13248 = vst [vmem:[#allocation67_spill] sm:$0xff] %v10732_v47  ;;  %9278 = vmatprep.subr.bf16.mxu0 %v9277_v63  ;;  %13250 = vst [vmem:[#allocation69_spill] sm:$0xff] %v10738_v36  ;;  %v10761_v13 = vand.u32 4294901760, %v445_v12  ;;  %v10766_v48 = vand.u32 4294901760, %v448_v3  ;;  %v13260_v58 = vand.u32 4294901760, %v10729_v55 }
  0x60   : > { %7970 = vmatmul.mubr.f32.gmra.mrb[28].mxu1 %v1079_v6  ;;  %9280 = vmatpush3.bf16.msra.mxu0 %v9277_v63  ;;  %v13252_v6 = vand.u32 4294901760, %v10616_v56  ;;  %v1138_v63 = vsub.f32 %v10706_v62, %v13253_v46  ;;  %v13257_v56 = vand.u32 4294901760, %v10654_v44  ;;  %v1129_v46 = vand.u32 4294901760, %v1128_v51 }
  0x61   : > { %8612 = vmatmul.mubr.f32.gmra.mrb[28].mxu0 %v13251_v20  ;;  %7972 = vmatprep.mubr.f32.mxu1 %v1089_v40  ;;  %v10755_v20 = vsub.f32 %v439_v37, %v10734_v8  ;;  %13256 = vst [vmem:[#allocation72_spill] sm:$0xff] %v10761_v13  ;;  %v1148_v40 = vsub.f32 %v10721_v26, %v1147_v33  ;;  %13258 = vst [vmem:[#allocation73_spill] sm:$0xff] %v10766_v48  ;;  %v451_v37 = vsel %vm320_vm1, %v217_v39, 0  ;;  %v220_v39 = vld [vmem:[%s10207_s14 + $0x170] sm:$0xff]  ;;  %v225_v8 = vld [vmem:[%s10207_s14 + $0x198] sm:$0xff] }
  0x62   : > { %8614 = vmatprep.mubr.f32.mxu0 %v13252_v6  ;;  %v10759_v6 = vsub.f32 %v442_v34, %v10738_v36  ;;  %v454_v34 = vsel %vm320_vm1, %v218_v7, 0  ;;  %v1139_v28 = vand.u32 4294901760, %v1138_v63  ;;  %v10785_v7 = vand.u32 4294901760, %v451_v37 }
  0x63   : > { %13254 = vst [vmem:[#allocation70_spill] sm:$0xff] %v10755_v20  ;;  %v1177_v26 = vand.u32 4294901760, %v10755_v20  ;;  %v457_v63 = vsel %vm320_vm1, %v219_v27, 0  ;;  %v10791_v44 = vand.u32 4294901760, %v454_v34 }
  0x64   : > { %7973 = vmatmul.mubr.f32.gmra.mrb[30].mxu1 %v1099_v45  ;;  %13255 = vst [vmem:[#allocation71_spill] sm:$0xff] %v10759_v6  ;;  %v13259_v45 = vand.u32 4294901760, %v10660_v61  ;;  %13263 = vst [vmem:[#allocation75_spill] sm:$0xff] %v10785_v7  ;;  %v222_v61 = vld [vmem:[%s10207_s14 + $0x180] sm:$0xff]  ;;  %v10797_v27 = vand.u32 4294901760, %v457_v63 }
  0x65   : > { %8615 = vmatmul.mubr.f32.gmra.mrb[30].mxu0 %v13257_v56  ;;  %7975 = vmatprep.mubr.f32.mxu1 %v1109_v2  ;;  %v1158_v56 = vsub.f32 %v10729_v55, %v13260_v58  ;;  %v13261_v2 = vand.u32 4294901760, %v10732_v47  ;;  %v1149_v58 = vand.u32 4294901760, %v1148_v40  ;;  %13265 = vst [vmem:[#allocation77_spill] sm:$0xff] %v10791_v44  ;;  %v1178_v36 = vsub.f32 %v10755_v20, %v1177_v26 }
  0x66   : > { %8617 = vmatprep.mubr.f32.mxu0 %v13259_v45  ;;  %v10783_v45 = vsub.f32 %v445_v12, %v10761_v13  ;;  %13266 = vst [vmem:[#allocation78_spill] sm:$0xff] %v10797_v27  ;;  %v466_v20 = vsel %vm320_vm1, %v222_v61, 0  ;;  %v226_v61 = vld [vmem:[%s10207_s14 + $0x1a0] sm:$0xff] }
  0x67   : > { %v1168_v51 = vsub.f32 %v10732_v47, %v13261_v2  ;;  %v10789_v2 = vsub.f32 %v448_v3, %v10766_v48  ;;  %v1159_v12 = vand.u32 4294901760, %v1158_v56  ;;  %v13269_v56 = vand.u32 4294901760, %v10706_v62 }
  0x68   : > { %7976 = vmatmul.mubr.f32.gmra.mrb[32].mxu1 %v1119_v21  ;;  %13262 = vst [vmem:[#allocation74_spill] sm:$0xff] %v10783_v45  ;;  %v460_v21 = vsel %vm320_vm1, %v220_v39, 0  ;;  %v1197_v40 = vand.u32 4294901760, %v10783_v45  ;;  %v223_v39 = vld [vmem:[%s10207_s14 + $0x188] sm:$0xff] }
  0x69   : > { %8618 = vmatmul.mubr.f32.gmra.mrb[32].mxu0 %v1117_v22  ;;  %7978 = vmatprep.mubr.f32.mxu1 %v1129_v46  ;;  %13264 = vst [vmem:[#allocation76_spill] sm:$0xff] %v10789_v2  ;;  %v1169_v13 = vand.u32 4294901760, %v1168_v51  ;;  %v13267_v22 = vand.u32 4294901760, %v10759_v6  ;;  %v10804_v46 = vsub.f32 %v451_v37, %v10785_v7  ;;  %v1207_v51 = vand.u32 4294901760, %v10789_v2  ;;  %v224_v37 = vld [vmem:[%s10207_s14 + $0x190] sm:$0xff] }
  0x6a   : > { %8620 = vmatprep.mubr.f32.mxu0 %v1127_v53  ;;  %v463_v53 = vsel %vm320_vm1, %v221_v38, 0  ;;  %v1179_v7 = vand.u32 4294901760, %v1178_v36  ;;  %v10819_v38 = vsub.f32 %v457_v63, %v10797_v27  ;;  %v1198_v48 = vsub.f32 %v10783_v45, %v1197_v40 }
  0x6b   : > { %v1188_v3 = vsub.f32 %v10759_v6, %v13267_v22  ;;  %13268 = vst [vmem:[#allocation79_spill] sm:$0xff] %v10804_v46  ;;  %v10814_v22 = vand.u32 4294901760, %v460_v21  ;;  %v10821_v62 = vand.u32 4294901760, %v463_v53  ;;  %v1208_v36 = vsub.f32 %v10789_v2, %v1207_v51 }
  0x6c   : > { %7979 = vmatmul.mubr.f32.gmra.mrb[34].mxu1 %v1139_v28  ;;  %v10812_v28 = vsub.f32 %v454_v34, %v10791_v44  ;;  %13272 = vst [vmem:[#allocation82_spill] sm:$0xff] %v10819_v38  ;;  %v1217_v34 = vand.u32 4294901760, %v10804_v46  ;;  %v10826_v44 = vand.u32 4294901760, %v466_v20 }
  0x6d   : > { %8621 = vmatmul.mubr.f32.gmra.mrb[34].mxu0 %v13269_v56  ;;  %7981 = vmatprep.mubr.f32.mxu1 %v1149_v58  ;;  %13271 = vst [vmem:[#allocation81_spill] sm:$0xff] %v10814_v22  ;;  %13273 = vst [vmem:[#allocation83_spill] sm:$0xff] %v10821_v62  ;;  %v469_v58 = vsel %vm320_vm1, %v223_v39, 0  ;;  %v1189_v56 = vand.u32 4294901760, %v1188_v3  ;;  %v10835_v39 = vsub.f32 %v460_v21, %v10814_v22  ;;  %v13277_v3 = vand.u32 4294901760, %v10732_v47 }
  0x6e   : > { %13270 = vst [vmem:[#allocation80_spill] sm:$0xff] %v10812_v28  ;;  %8623 = vmatprep.mubr.f32.mxu0 %v1147_v33  ;;  %13274 = vst [vmem:[#allocation84_spill] sm:$0xff] %v10826_v44  ;;  %v13275_v33 = vand.u32 4294901760, %v10729_v55  ;;  %v1227_v63 = vand.u32 4294901760, %v10812_v28  ;;  %v10840_v45 = vand.u32 4294901760, %v469_v58  ;;  %v10844_v55 = vsub.f32 %v463_v53, %v10821_v62 }
  0x6f   : > { %13276 = vst [vmem:[#allocation85_spill] sm:$0xff] %v10835_v39  ;;  %v1199_v21 = vand.u32 4294901760, %v1198_v48  ;;  %v10850_v2 = vsub.f32 %v466_v20, %v10826_v44  ;;  %v1209_v27 = vand.u32 4294901760, %v1208_v36  ;;  %v13282_v47 = vand.u32 4294901760, %v10759_v6  ;;  %v229_v44 = vld [vmem:[%s10207_s14 + $0x1b8] sm:$0xff] }
  0x70   : > { %7982 = vmatmul.mubr.f32.gmra.mrb[36].mxu1 %v1159_v12  ;;  %v472_v12 = vsel %vm320_vm1, %v224_v37, 0  ;;  %13278 = vst [vmem:[#allocation86_spill] sm:$0xff] %v10840_v45  ;;  %13279 = vst [vmem:[#allocation87_spill] sm:$0xff] %v10844_v55  ;;  %v1218_v37 = vsub.f32 %v10804_v46, %v1217_v34  ;;  %v1228_v53 = vsub.f32 %v10812_v28, %v1227_v63  ;;  %v12843_v36 = vand.u32 4294901760, %v10844_v55  ;;  %v228_v28 = vld [vmem:[%s10207_s14 + $0x1b0] sm:$0xff] }
  0x71   : > { %8624 = vmatmul.mubr.f32.gmra.mrb[36].mxu0 %v13275_v33  ;;  %7984 = vmatprep.mubr.f32.mxu1 %v1169_v13  ;;  %v475_v13 = vsel %vm320_vm1, %v225_v8, 0  ;;  %v478_v33 = vsel %vm320_vm1, %v226_v61, 0  ;;  %13280 = vst [vmem:[#allocation88_spill] sm:$0xff] %v10850_v2  ;;  %v10859_v48 = vsub.f32 %v469_v58, %v10840_v45  ;;  %v227_v61 = vld [vmem:[%s10207_s14 + $0x1a8] sm:$0xff]  ;;  %v13288_v6 = vand.u32 4294901760, %v10835_v39 }
  0x72   : > { %8626 = vmatprep.mubr.f32.mxu0 %v13277_v3  ;;  %v10852_v3 = vand.u32 4294901760, %v472_v12  ;;  %v10863_v20 = vand.u32 4294901760, %v478_v33  ;;  %v1219_v8 = vand.u32 4294901760, %v1218_v37  ;;  %v1229_v46 = vand.u32 4294901760, %v1228_v53 }
  0x73   : > { %13283 = vst [vmem:[#allocation90_spill] sm:$0xff] %v10859_v48  ;;  %v1248_v45 = vsub.f32 %v10835_v39, %v13288_v6  ;;  %v13289_v37 = vand.u32 4294901760, %v10151_v10  ;;  %v484_v6 = vsel %vm320_vm1, %v228_v28, 0 }
  0x74   : > { %7985 = vmatmul.mubr.f32.gmra.mrb[38].mxu1 %v1179_v7  ;;  %13281 = vst [vmem:[#allocation89_spill] sm:$0xff] %v10852_v3  ;;  %v10861_v7 = vand.u32 4294901760, %v475_v13  ;;  %13285 = vst [vmem:[#allocation92_spill] sm:$0xff] %v10863_v20  ;;  %v10873_v58 = vsub.f32 %v472_v12, %v10852_v3  ;;  %v10892_v12 = vsub.f32 %v478_v33, %v10863_v20  ;;  %v230_v3 = vld [vmem:[%s10207_s14 + $0x1c0] sm:$0xff]  ;;  %v13293_v33 = vand.u32 4294901760, %v10850_v2 }
  0x75   : > { %8627 = vmatmul.mubr.f32.gmra.mrb[38].mxu0 %v1177_v26  ;;  %7987 = vmatprep.mubr.f32.mxu1 %v1189_v56  ;;  %v13286_v26 = vand.u32 4294901760, %v10819_v38  ;;  %v10914_v20 = vand.u32 4294901760, %v484_v6 }
  0x76   : > { %8629 = vmatprep.mubr.f32.mxu0 %v13282_v47  ;;  %13284 = vst [vmem:[#allocation91_spill] sm:$0xff] %v10861_v7  ;;  %13287 = vst [vmem:[#allocation93_spill] sm:$0xff] %v10873_v58  ;;  %v1268_v28 = vsub.f32 %v10850_v2, %v13293_v33 }
  0x77   : > { %v1238_v56 = vsub.f32 %v10819_v38, %v13286_v26  ;;  %v481_v26 = vsel %vm320_vm1, %v227_v61, 0  ;;  %13291 = vst [vmem:[#allocation95_spill] sm:$0xff] %v10892_v12  ;;  %v1258_v61 = vsub.f32 %v10844_v55, %v12843_v36  ;;  %v487_v36 = vsel %vm320_vm1, %v229_v44, 0  ;;  %13295 = vst [vmem:[#allocation97_spill] sm:$0xff] %v10914_v20 }
  0x78   : > { %7988 = vmatmul.mubr.f32.gmra.mrb[40].mxu1 %v1199_v21  ;;  %v10085_v21 = vld [vmem:[%s12710_s1 + $0x30] sm:$0xff]  ;;  %v490_v44 = vsel %vm320_vm1, %v230_v3, 0  ;;  %v1269_v57 = vand.u32 4294901760, %v1268_v28  ;;  %v13300_v3 = vand.u32 4294901760, %v10819_v38  ;;  %v13303_v28 = vand.u32 4294901760, %v10835_v39 }
  0x79   : > { %8630 = vmatmul.mubr.f32.gmra.mrb[40].mxu0 %v1197_v40  ;;  %7990 = vmatprep.mubr.f32.mxu1 %v1209_v27  ;;  %v10885_v47 = vsub.f32 %v10085_v21, %v13289_v37  ;;  %v10889_v27 = vsub.f32 %v475_v13, %v10861_v7  ;;  %v1239_v53 = vand.u32 4294901760, %v1238_v56  ;;  %v13292_v13 = vand.u32 4294901760, %v10160_v14 }
  0x7a   : > { %8632 = vmatprep.mubr.f32.mxu0 %v1207_v51  ;;  %v10086_v51 = vld [vmem:[%s12710_s1 + $0x38] sm:$0xff]  ;;  %v10911_v37 = vand.u32 4294901760, %v481_v26  ;;  %v1249_v40 = vand.u32 4294901760, %v1248_v45  ;;  %v10925_v45 = vand.u32 4294901760, %v487_v36  ;;  %v10940_v9 = vand.u32 4294901760, %v490_v44 }
  0x7b   : > { %13290 = vst [vmem:[#allocation94_spill] sm:$0xff] %v10889_v27  ;;  %v2110_v10 = vand.u32 4294901760, %v10885_v47  ;;  %v10905_v21 = vsub.f32 %v10086_v51, %v13292_v13  ;;  %v13296_v51 = vand.u32 4294901760, %v10859_v48  ;;  %v13308_v39 = vand.u32 4294901760, %v10844_v55  ;;  %v237_v55 = vld [vmem:[%s10207_s14 + $0x1f8] sm:$0xff] }
  0x7c   : > { %7991 = vmatmul.mubr.f32.gmra.mrb[42].mxu1 %v1219_v8  ;;  %13294 = vst [vmem:[#allocation96_spill] sm:$0xff] %v10911_v37  ;;  %13297 = vst [vmem:[#allocation98_spill] sm:$0xff] %v10925_v45  ;;  %v10933_v56 = vsub.f32 %v481_v26, %v10911_v37 }
  0x7d   : > { %8633 = vmatmul.mubr.f32.gmra.mrb[42].mxu0 %v1217_v34  ;;  %7993 = vmatprep.mubr.f32.mxu1 %v1229_v46  ;;  %v2111_v14 = vsub.f32 %v10885_v47, %v2110_v10  ;;  %v2117_v8 = vand.u32 4294901760, %v10905_v21  ;;  %v1278_v13 = vsub.f32 %v10859_v48, %v13296_v51  ;;  %v231_v34 = vld [vmem:[%s10207_s14 + $0x1c8] sm:$0xff]  ;;  %v232_v46 = vld [vmem:[%s10207_s14 + $0x1d0] sm:$0xff]  ;;  %v13298_v51 = vand.u32 4294901760, %v10873_v58  ;;  %13302 = vst [vmem:[#allocation101_spill] sm:$0xff] %v10940_v9 }
  0x7e   : > { %8635 = vmatprep.mubr.f32.mxu0 %v1227_v63  ;;  %v1259_v63 = vand.u32 4294901760, %v1258_v61  ;;  %13299 = vst [vmem:[#allocation99_spill] sm:$0xff] %v10933_v56  ;;  %v233_v61 = vld [vmem:[%s10207_s14 + $0x1d8] sm:$0xff]  ;;  %v496_v26 = vsel %vm320_vm1, %v232_v46, 0  ;;  %v1317_v46 = vand.u32 4294901760, %v10933_v56 }
  0x7f   : > { %v2112_v7 = vand.u32 4294901760, %v2111_v14  ;;  %v2118_v62 = vsub.f32 %v10905_v21, %v2117_v8  ;;  %v9281_v22 = vpack.c.bf16 %v2117_v8, %v2110_v10  ;;  %v1288_v33 = vsub.f32 %v10873_v58, %v13298_v51  ;;  %v234_v51 = vld [vmem:[%s10207_s14 + $0x1e0] sm:$0xff] }
  0x80   : > { %7994 = vmatmul.mubr.f32.gmra.mrb[44].mxu1 %v1239_v53  ;;  %v10938_v14 = vsub.f32 %v484_v6, %v10914_v20  ;;  %v493_v53 = vsel %vm320_vm1, %v231_v34, 0  ;;  %v1279_v8 = vand.u32 4294901760, %v1278_v13  ;;  %v13305_v6 = vand.u32 4294901760, %v10892_v12 }
  0x81   : > { %8636 = vmatmul.mubr.f32.gmra.mrb[44].mxu0 %v13300_v3  ;;  %7996 = vmatprep.mubr.f32.mxu1 %v1249_v40  ;;  %v2119_v10 = vand.u32 4294901760, %v2118_v62  ;;  %v13304_v3 = vand.u32 4294901760, %v10889_v27  ;;  %v10955_v34 = vsub.f32 %v487_v36, %v10925_v45  ;;  %v1289_v13 = vand.u32 4294901760, %v1288_v33  ;;  %v235_v33 = vld [vmem:[%s10207_s14 + $0x1e8] sm:$0xff] }
  0x82   : > { %13301 = vst [vmem:[#allocation100_spill] sm:$0xff] %v10938_v14  ;;  %8638 = vmatprep.mubr.f32.mxu0 %v13303_v28  ;;  %9282 = vmatprep.subr.bf16.mxu0 %v9281_v22  ;;  %v1308_v38 = vsub.f32 %v10892_v12, %v13305_v6  ;;  %v10958_v28 = vand.u32 4294901760, %v493_v53  ;;  %v1327_v6 = vand.u32 4294901760, %v10938_v14  ;;  %v10965_v36 = vsub.f32 %v490_v44, %v10940_v9 }
  0x83   : > { %v1298_v40 = vsub.f32 %v10889_v27, %v13304_v3  ;;  %13306 = vst [vmem:[#allocation102_spill] sm:$0xff] %v10955_v34  ;;  %v9221_v62 = vpack.c.bf16 %v2119_v10, %v2112_v7  ;;  %9284 = vmatpush3.bf16.msra.mxu0 %v9281_v22  ;;  %v499_v3 = vsel %vm320_vm1, %v233_v61, 0  ;;  %v10967_v7 = vand.u32 4294901760, %v496_v26  ;;  %v236_v10 = vld [vmem:[%s10207_s14 + $0x1f0] sm:$0xff] }
  0x84   : > { %7997 = vmatmul.mubr.f32.gmra.mrb[46].mxu1 %v1259_v63  ;;  %13307 = vst [vmem:[#allocation103_spill] sm:$0xff] %v10958_v28  ;;  %13309 = vst [vmem:[#allocation104_spill] sm:$0xff] %v10965_v36  ;;  %v502_v22 = vsel %vm320_vm1, %v234_v51, 0  ;;  %v13311_v63 = vand.u32 4294901760, %v10850_v2  ;;  %v1309_v45 = vand.u32 4294901760, %v1308_v38  ;;  %v1318_v44 = vsub.f32 %v10933_v56, %v1317_v46 }
  0x85   : > { %8639 = vmatmul.mubr.f32.gmra.mrb[46].mxu0 %v13308_v39  ;;  %7999 = vmatprep.mubr.f32.mxu1 %v1269_v57  ;;  %13310 = vst [vmem:[#allocation105_spill] sm:$0xff] %v10967_v7  ;;  %v1299_v61 = vand.u32 4294901760, %v1298_v40  ;;  %v10975_v57 = vand.u32 4294901760, %v499_v3  ;;  %v10980_v51 = vsub.f32 %v493_v53, %v10958_v28  ;;  %v10982_v9 = vand.u32 4294901760, %v502_v22 }
  0x86   : > { %8641 = vmatprep.mubr.f32.mxu0 %v13311_v63  ;;  %9222 = vmatprep.subr.bf16.mxu1 %v9221_v62  ;;  %v505_v63 = vsel %vm320_vm1, %v235_v33, 0  ;;  %v13315_v40 = vand.u32 4294901760, %v10859_v48  ;;  %v1328_v38 = vsub.f32 %v10938_v14, %v1327_v6  ;;  %v508_v39 = vsel %vm320_vm1, %v236_v10, 0  ;;  %v238_v48 = vld [vmem:[%s10207_s14 + $0x200] sm:$0xff] }
  0x87   : > { %13312 = vst [vmem:[#allocation106_spill] sm:$0xff] %v10975_v57  ;;  %9224 = vmatpush3.bf16.msra.mxu1 %v9221_v62  ;;  %13313 = vst [vmem:[#allocation107_spill] sm:$0xff] %v10980_v51  ;;  %v1347_v62 = vand.u32 4294901760, %v10965_v36  ;;  %v13317_v53 = vand.u32 4294901760, %v10873_v58  ;;  %v511_v56 = vsel %vm320_vm1, %v237_v55, 0  ;;  %v13318_v33 = vand.u32 4294901760, %v10955_v34 }
  0x88   : > { %8000 = vmatmul.mubr.f32.gmra.mrb[48].mxu1 %v1279_v8  ;;  %13314 = vst [vmem:[#allocation108_spill] sm:$0xff] %v10982_v9  ;;  %v10990_v8 = vsub.f32 %v496_v26, %v10967_v7  ;;  %v11002_v14 = vand.u32 4294901760, %v505_v63  ;;  %v1319_v26 = vand.u32 4294901760, %v1318_v44  ;;  %v1357_v10 = vand.u32 4294901760, %v10980_v51  ;;  %v239_v55 = vld [vmem:[%s10207_s14 + $0x208] sm:$0xff] }
  0x89   : > { %8642 = vmatmul.mubr.f32.gmra.mrb[48].mxu0 %v13315_v40  ;;  %8002 = vmatprep.mubr.f32.mxu1 %v1289_v13  ;;  %v1338_v40 = vsub.f32 %v10955_v34, %v13318_v33  ;;  %v11000_v13 = vsub.f32 %v499_v3, %v10975_v57  ;;  %v11007_v58 = vsub.f32 %v502_v22, %v10982_v9  ;;  %v13323_v2 = vand.u32 4294901760, %v10889_v27 }
  0x8a   : > { %13316 = vst [vmem:[#allocation109_spill] sm:$0xff] %v10990_v8  ;;  %8644 = vmatprep.mubr.f32.mxu0 %v13317_v53  ;;  %13320 = vst [vmem:[#allocation111_spill] sm:$0xff] %v11002_v14  ;;  %v11009_v53 = vand.u32 4294901760, %v508_v39  ;;  %v1329_v33 = vand.u32 4294901760, %v1328_v38  ;;  %v1348_v3 = vsub.f32 %v10965_v36, %v1347_v62  ;;  %v1367_v57 = vand.u32 4294901760, %v10990_v8 }
  0x8b   : > { %13319 = vst [vmem:[#allocation110_spill] sm:$0xff] %v11000_v13  ;;  %13321 = vst [vmem:[#allocation112_spill] sm:$0xff] %v11007_v58  ;;  %v11016_v7 = vand.u32 4294901760, %v511_v56  ;;  %v13325_v44 = vand.u32 4294901760, %v10892_v12  ;;  %v514_v22 = vsel %vm320_vm1, %v238_v48, 0  ;;  %v1339_v9 = vand.u32 4294901760, %v1338_v40 }
  0x8c   : > { %8003 = vmatmul.mubr.f32.gmra.mrb[50].mxu1 %v1299_v61  ;;  %13322 = vst [vmem:[#allocation113_spill] sm:$0xff] %v11009_v53  ;;  %v240_v61 = vld [vmem:[%s10207_s14 + $0x210] sm:$0xff]  ;;  %v1358_v38 = vsub.f32 %v10980_v51, %v1357_v10  ;;  %v11030_v12 = vsub.f32 %v508_v39, %v11009_v53  ;;  %v1349_v40 = vand.u32 4294901760, %v1348_v3  ;;  %v13331_v39 = vand.u32 4294901760, %v11000_v13  ;;  %v242_v3 = vld [vmem:[%s10207_s14 + $0x220] sm:$0xff] }
  0x8d   : > { %8645 = vmatmul.mubr.f32.gmra.mrb[50].mxu0 %v13323_v2  ;;  %8005 = vmatprep.mubr.f32.mxu1 %v1309_v45  ;;  %13324 = vst [vmem:[#allocation114_spill] sm:$0xff] %v11016_v7  ;;  %v11024_v2 = vsub.f32 %v505_v63, %v11002_v14  ;;  %v517_v45 = vsel %vm320_vm1, %v239_v55, 0  ;;  %v520_v48 = vsel %vm320_vm1, %v240_v61, 0  ;;  %v11035_v63 = vsub.f32 %v511_v56, %v11016_v7  ;;  %v249_v14 = vld [vmem:[%s10207_s14 + $0x258] sm:$0xff] }
  0x8e   : > { %8647 = vmatprep.mubr.f32.mxu0 %v13325_v44  ;;  %13327 = vst [vmem:[#allocation116_spill] sm:$0xff] %v11030_v12  ;;  %v1368_v44 = vsub.f32 %v10990_v8, %v1367_v57  ;;  %v11037_v55 = vand.u32 4294901760, %v514_v22  ;;  %v11040_v28 = vand.u32 4294901760, %v517_v45  ;;  %v1378_v36 = vsub.f32 %v11000_v13, %v13331_v39 }
  0x8f   : > { %13326 = vst [vmem:[#allocation115_spill] sm:$0xff] %v11024_v2  ;;  %13328 = vst [vmem:[#allocation117_spill] sm:$0xff] %v11035_v63  ;;  %v1359_v56 = vand.u32 4294901760, %v1358_v38  ;;  %v13333_v61 = vand.u32 4294901760, %v11007_v58  ;;  %v13334_v27 = vand.u32 4294901760, %v10955_v34  ;;  %v13341_v34 = vand.u32 4294901760, %v11035_v63 }
  0x90   : > { %8006 = vmatmul.mubr.f32.gmra.mrb[52].mxu1 %v1319_v26  ;;  %13329 = vst [vmem:[#allocation118_spill] sm:$0xff] %v11037_v55  ;;  %v241_v26 = vld [vmem:[%s10207_s14 + $0x218] sm:$0xff]  ;;  %13330 = vst [vmem:[#allocation119_spill] sm:$0xff] %v11040_v28  ;;  %v1369_v39 = vand.u32 4294901760, %v1368_v44  ;;  %v11058_v7 = vsub.f32 %v514_v22, %v11037_v55  ;;  %v11062_v38 = vsub.f32 %v517_v45, %v11040_v28  ;;  %v1379_v22 = vand.u32 4294901760, %v1378_v36  ;;  %v246_v28 = vld [vmem:[%s10207_s14 + $0x240] sm:$0xff] }
  0x91   : > { %8648 = vmatmul.mubr.f32.gmra.mrb[52].mxu0 %v1317_v46  ;;  %8008 = vmatprep.mubr.f32.mxu1 %v1329_v33  ;;  %v11046_v33 = vand.u32 4294901760, %v520_v48  ;;  %v1388_v8 = vsub.f32 %v11007_v58, %v13333_v61  ;;  %v523_v51 = vsel %vm320_vm1, %v241_v26, 0  ;;  %v526_v61 = vsel %vm320_vm1, %v242_v3, 0  ;;  %v247_v55 = vld [vmem:[%s10207_s14 + $0x248] sm:$0xff] }
  0x92   : > { %8650 = vmatprep.mubr.f32.mxu0 %v1327_v6  ;;  %13335 = vst [vmem:[#allocation121_spill] sm:$0xff] %v11058_v7  ;;  %13336 = vst [vmem:[#allocation122_spill] sm:$0xff] %v11062_v38  ;;  %v244_v6 = vld [vmem:[%s10207_s14 + $0x230] sm:$0xff]  ;;  %v13337_v26 = vand.u32 4294901760, %v11024_v2  ;;  %v11072_v44 = vand.u32 4294901760, %v523_v51  ;;  %v13349_v53 = vand.u32 4294901760, %v11058_v7 }
  0x93   : > { %13332 = vst [vmem:[#allocation120_spill] sm:$0xff] %v11046_v33  ;;  %v1389_v46 = vand.u32 4294901760, %v1388_v8  ;;  %v532_v36 = vsel %vm320_vm1, %v244_v6, 0  ;;  %v245_v8 = vld [vmem:[%s10207_s14 + $0x238] sm:$0xff]  ;;  %v13346_v6 = vand.u32 4294901760, %v10165_v15 }
  0x94   : > { %8009 = vmatmul.mubr.f32.gmra.mrb[54].mxu1 %v1339_v9  ;;  %v243_v9 = vld [vmem:[%s10207_s14 + $0x228] sm:$0xff]  ;;  %13339 = vst [vmem:[#allocation124_spill] sm:$0xff] %v11072_v44  ;;  %v1428_v15 = vsub.f32 %v11058_v7, %v13349_v53 }
  0x95   : > { %8651 = vmatmul.mubr.f32.gmra.mrb[54].mxu0 %v13334_v27  ;;  %8011 = vmatprep.mubr.f32.mxu1 %v1349_v40  ;;  %v1398_v27 = vsub.f32 %v11024_v2, %v13337_v26  ;;  %v11070_v40 = vsub.f32 %v520_v48, %v11046_v33  ;;  %v529_v3 = vsel %vm320_vm1, %v243_v9, 0  ;;  %v1418_v48 = vsub.f32 %v11035_v63, %v13341_v34 }
  0x96   : > { %8653 = vmatprep.mubr.f32.mxu0 %v1347_v62  ;;  %v13340_v62 = vand.u32 4294901760, %v11030_v12  ;;  %v11082_v33 = vand.u32 4294901760, %v526_v61  ;;  %v11094_v34 = vand.u32 4294901760, %v532_v36  ;;  %v535_v26 = vsel %vm320_vm1, %v245_v8, 0 }
  0x97   : > { %13338 = vst [vmem:[#allocation123_spill] sm:$0xff] %v11070_v40  ;;  %v13347_v9 = vand.u32 4294901760, %v10170_v16  ;;  %v13352_v16 = vand.u32 4294901760, %v11062_v38 }
  0x98   : > { %8012 = vmatmul.mubr.f32.gmra.mrb[56].mxu1 %v1359_v56  ;;  %v1408_v45 = vsub.f32 %v11030_v12, %v13340_v62  ;;  %13342 = vst [vmem:[#allocation125_spill] sm:$0xff] %v11082_v33  ;;  %v1399_v62 = vand.u32 4294901760, %v1398_v27  ;;  %13345 = vst [vmem:[#allocation128_spill] sm:$0xff] %v11094_v34  ;;  %v13348_v56 = vand.u32 4294901760, %v11000_v13 }
  0x99   : > { %8654 = vmatmul.mubr.f32.gmra.mrb[56].mxu0 %v1357_v10  ;;  %8014 = vmatprep.mubr.f32.mxu1 %v1369_v39  ;;  %v11089_v10 = vsub.f32 %v523_v51, %v11072_v44  ;;  %v11091_v39 = vand.u32 4294901760, %v529_v3  ;;  %v10088_v51 = vld [vmem:[%s12710_s1 + $0x48] sm:$0xff]  ;;  %v1419_v44 = vand.u32 4294901760, %v1418_v48 }
  0x9a   : > { %8656 = vmatprep.mubr.f32.mxu0 %v1367_v57  ;;  %v10087_v57 = vld [vmem:[%s12710_s1 + $0x40] sm:$0xff]  ;;  %v1409_v8 = vand.u32 4294901760, %v1408_v45 }
  0x9b   : > { %13343 = vst [vmem:[#allocation126_spill] sm:$0xff] %v11089_v10  ;;  %13344 = vst [vmem:[#allocation127_spill] sm:$0xff] %v11091_v39  ;;  %v11103_v27 = vsub.f32 %v10087_v57, %v13346_v6  ;;  %v11118_v57 = vsub.f32 %v526_v61, %v11082_v33  ;;  %v13351_v6 = vand.u32 4294901760, %v11007_v58  ;;  %v11130_v53 = vsub.f32 %v529_v3, %v11091_v39 }
  0x9c   : > { %8015 = vmatmul.mubr.f32.gmra.mrb[58].mxu1 %v1379_v22  ;;  %v11110_v22 = vsub.f32 %v10088_v51, %v13347_v9  ;;  %v1438_v9 = vsub.f32 %v11062_v38, %v13352_v16  ;;  %v538_v51 = vsel %vm320_vm1, %v246_v28, 0  ;;  %v11132_v61 = vand.u32 4294901760, %v535_v26 }
  0x9d   : > { %8657 = vmatmul.mubr.f32.gmra.mrb[58].mxu0 %v13348_v56  ;;  %8017 = vmatprep.mubr.f32.mxu1 %v1389_v46  ;;  %13350 = vst [vmem:[#allocation129_spill] sm:$0xff] %v11118_v57  ;;  %v2124_v46 = vand.u32 4294901760, %v11103_v27  ;;  %13353 = vst [vmem:[#allocation130_spill] sm:$0xff] %v11130_v53  ;;  %v541_v56 = vsel %vm320_vm1, %v247_v55, 0  ;;  %v13355_v16 = vand.u32 4294901760, %v11070_v40  ;;  %v11140_v58 = vsub.f32 %v532_v36, %v11094_v34 }
  0x9e   : > { %8659 = vmatprep.mubr.f32.mxu0 %v13351_v6  ;;  %v2131_v45 = vand.u32 4294901760, %v11110_v22  ;;  %13354 = vst [vmem:[#allocation131_spill] sm:$0xff] %v11132_v61  ;;  %v248_v6 = vld [vmem:[%s10207_s14 + $0x250] sm:$0xff]  ;;  %v13357_v3 = vand.u32 4294901760, %v11024_v2  ;;  %v1429_v55 = vand.u32 4294901760, %v1428_v15  ;;  %v12909_v39 = vand.u32 4294901760, %v11118_v57 }
  0x9f   : > { %v1448_v28 = vsub.f32 %v11070_v40, %v13355_v16  ;;  %13356 = vst [vmem:[#allocation132_spill] sm:$0xff] %v11140_v58  ;;  %v2125_v13 = vsub.f32 %v11103_v27, %v2124_v46  ;;  %v13359_v16 = vand.u32 4294901760, %v11030_v12  ;;  %v11151_v36 = vand.u32 4294901760, %v541_v56 }
  0xa0   : > { %8018 = vmatmul.mubr.f32.gmra.mrb[60].mxu1 %v1399_v62  ;;  %v2132_v48 = vsub.f32 %v11110_v22, %v2131_v45  ;;  %v11147_v62 = vand.u32 4294901760, %v538_v51  ;;  %v9285_v33 = vpack.c.bf16 %v2131_v45, %v2124_v46  ;;  %v544_v34 = vsel %vm320_vm1, %v248_v6, 0  ;;  %v250_v46 = vld [vmem:[%s10207_s14 + $0x260] sm:$0xff] }
  0xa1   : > { %8660 = vmatmul.mubr.f32.gmra.mrb[60].mxu0 %v13357_v3  ;;  %8020 = vmatprep.mubr.f32.mxu1 %v1409_v8  ;;  %13360 = vst [vmem:[#allocation134_spill] sm:$0xff] %v11151_v36  ;;  %v2126_v20 = vand.u32 4294901760, %v2125_v13  ;;  %v13361_v2 = vand.u32 4294901760, %v11089_v10  ;;  %v11160_v3 = vsub.f32 %v535_v26, %v11132_v61  ;;  %v1439_v45 = vand.u32 4294901760, %v1438_v9  ;;  %v251_v9 = vld [vmem:[%s10207_s14 + $0x268] sm:$0xff] }
  0xa2   : > { %13358 = vst [vmem:[#allocation133_spill] sm:$0xff] %v11147_v62  ;;  %8662 = vmatprep.mubr.f32.mxu0 %v13359_v16  ;;  %v2133_v37 = vand.u32 4294901760, %v2132_v48  ;;  %9286 = vmatprep.subr.bf16.mxu0 %v9285_v33  ;;  %v1449_v16 = vand.u32 4294901760, %v1448_v28  ;;  %v12911_v6 = vand.u32 4294901760, %v11140_v58  ;;  %v13363_v48 = vand.u32 4294901760, %v11035_v63  ;;  %v252_v28 = vld [vmem:[%s10207_s14 + $0x270] sm:$0xff] }
  0xa3   : > { %v1458_v8 = vsub.f32 %v11089_v10, %v13361_v2  ;;  %13362 = vst [vmem:[#allocation135_spill] sm:$0xff] %v11160_v3  ;;  %9288 = vmatpush3.bf16.msra.mxu0 %v9285_v33  ;;  %v1468_v2 = vsub.f32 %v11118_v57, %v12909_v39  ;;  %v11170_v26 = vsub.f32 %v538_v51, %v11147_v62  ;;  %v11172_v15 = vand.u32 4294901760, %v544_v34 }
  0xa4   : > { %8021 = vmatmul.mubr.f32.gmra.mrb[62].mxu1 %v1419_v44  ;;  %v9225_v13 = vpack.c.bf16 %v2133_v37, %v2126_v20  ;;  %v547_v44 = vsel %vm320_vm1, %v249_v14, 0  ;;  %v13366_v20 = vand.u32 4294901760, %v11058_v7  ;;  %v11180_v37 = vsub.f32 %v541_v56, %v11151_v36 }
  0xa5   : > { %8663 = vmatmul.mubr.f32.gmra.mrb[62].mxu0 %v13363_v48  ;;  %8023 = vmatprep.mubr.f32.mxu1 %v1429_v55  ;;  %13364 = vst [vmem:[#allocation136_spill] sm:$0xff] %v11170_v26  ;;  %13365 = vst [vmem:[#allocation137_spill] sm:$0xff] %v11172_v15  ;;  %v550_v33 = vsel %vm320_vm1, %v250_v46, 0  ;;  %v1459_v55 = vand.u32 4294901760, %v1458_v8  ;;  %v13368_v51 = vand.u32 4294901760, %v11130_v53  ;;  %v1497_v39 = vand.u32 4294901760, %v11160_v3 }
  0xa6   : > { %8665 = vmatprep.mubr.f32.mxu0 %v13366_v20  ;;  %13367 = vst [vmem:[#allocation138_spill] sm:$0xff] %v11180_v37  ;;  %9226 = vmatprep.subr.bf16.mxu1 %v9225_v13  ;;  %v1488_v14 = vsub.f32 %v11140_v58, %v12911_v6  ;;  %v11190_v56 = vand.u32 4294901760, %v547_v44  ;;  %v553_v46 = vsel %vm320_vm1, %v251_v9, 0  ;;  %v556_v20 = vsel %vm320_vm1, %v252_v28, 0  ;;  %v253_v6 = vld [vmem:[%s10207_s14 + $0x278] sm:$0xff]  ;;  %v254_v28 = vld [vmem:[%s10207_s14 + $0x280] sm:$0xff] }
  0xa7   : > { %v1478_v48 = vsub.f32 %v11130_v53, %v13368_v51  ;;  %9228 = vmatpush3.bf16.msra.mxu1 %v9225_v13  ;;  %v13370_v8 = vand.u32 4294901760, %v11062_v38  ;;  %v1469_v51 = vand.u32 4294901760, %v1468_v2  ;;  %v1507_v7 = vand.u32 4294901760, %v11170_v26 }
  0xa8   : > { %8024 = vmatmul.mubr.f32.gmra.mrb[64].mxu1 %v1439_v45  ;;  %13369 = vst [vmem:[#allocation139_spill] sm:$0xff] %v11190_v56  ;;  %v11198_v45 = vsub.f32 %v544_v34, %v11172_v15  ;;  %v11200_v13 = vand.u32 4294901760, %v550_v33  ;;  %v13373_v63 = vand.u32 4294901760, %v11070_v40  ;;  %v11207_v38 = vand.u32 4294901760, %v553_v46  ;;  %v255_v40 = vld [vmem:[%s10207_s14 + $0x288] sm:$0xff] }
  0xa9   : > { %8666 = vmatmul.mubr.f32.gmra.mrb[64].mxu0 %v13370_v8  ;;  %8026 = vmatprep.mubr.f32.mxu1 %v1449_v16  ;;  %v1479_v12 = vand.u32 4294901760, %v1478_v48  ;;  %v11209_v16 = vand.u32 4294901760, %v556_v20  ;;  %v1489_v2 = vand.u32 4294901760, %v1488_v14  ;;  %v1498_v34 = vsub.f32 %v11160_v3, %v1497_v39  ;;  %v256_v3 = vld [vmem:[%s10207_s14 + $0x290] sm:$0xff] }
  0xaa   : > { %13371 = vst [vmem:[#allocation140_spill] sm:$0xff] %v11198_v45  ;;  %13372 = vst [vmem:[#allocation141_spill] sm:$0xff] %v11200_v13  ;;  %8668 = vmatprep.mubr.f32.mxu0 %v13373_v63  ;;  %v11213_v8 = vsub.f32 %v547_v44, %v11190_v56  ;;  %v559_v15 = vsel %vm320_vm1, %v253_v6, 0  ;;  %v13377_v63 = vand.u32 4294901760, %v11089_v10  ;;  %v1508_v48 = vsub.f32 %v11170_v26, %v1507_v7 }
  0xab   : > { %13374 = vst [vmem:[#allocation142_spill] sm:$0xff] %v11207_v38  ;;  %13375 = vst [vmem:[#allocation143_spill] sm:$0xff] %v11209_v16  ;;  %v1527_v9 = vand.u32 4294901760, %v11198_v45  ;;  %v11222_v36 = vsub.f32 %v550_v33, %v11200_v13  ;;  %v13379_v14 = vand.u32 4294901760, %v11118_v57  ;;  %v13380_v44 = vand.u32 4294901760, %v11180_v37 }
  0xac   : > { %8027 = vmatmul.mubr.f32.gmra.mrb[66].mxu1 %v1459_v55  ;;  %13376 = vst [vmem:[#allocation144_spill] sm:$0xff] %v11213_v8  ;;  %v562_v55 = vsel %vm320_vm1, %v254_v28, 0  ;;  %v11237_v26 = vand.u32 4294901760, %v559_v15  ;;  %v565_v33 = vsel %vm320_vm1, %v255_v40, 0  ;;  %v1499_v28 = vand.u32 4294901760, %v1498_v34 }
  0xad   : > { %8669 = vmatmul.mubr.f32.gmra.mrb[66].mxu0 %v13377_v63  ;;  %8029 = vmatprep.mubr.f32.mxu1 %v1469_v51  ;;  %13378 = vst [vmem:[#allocation145_spill] sm:$0xff] %v11222_v36  ;;  %v1518_v6 = vsub.f32 %v11180_v37, %v13380_v44  ;;  %v11232_v51 = vsub.f32 %v553_v46, %v11207_v38  ;;  %v11241_v57 = vand.u32 4294901760, %v562_v55  ;;  %v13385_v44 = vand.u32 4294901760, %v11130_v53  ;;  %v257_v38 = vld [vmem:[%s10207_s14 + $0x298] sm:$0xff] }
  0xae   : > { %8671 = vmatprep.mubr.f32.mxu0 %v13379_v14  ;;  %v11235_v63 = vsub.f32 %v556_v20, %v11209_v16  ;;  %13383 = vst [vmem:[#allocation148_spill] sm:$0xff] %v11237_v26  ;;  %v1537_v14 = vand.u32 4294901760, %v11213_v8  ;;  %v1509_v46 = vand.u32 4294901760, %v1508_v48  ;;  %v1528_v10 = vsub.f32 %v11198_v45, %v1527_v9  ;;  %v258_v48 = vld [vmem:[%s10207_s14 + $0x2a0] sm:$0xff] }
  0xaf   : > { %13381 = vst [vmem:[#allocation146_spill] sm:$0xff] %v11232_v51  ;;  %13384 = vst [vmem:[#allocation149_spill] sm:$0xff] %v11241_v57  ;;  %v1547_v20 = vand.u32 4294901760, %v11222_v36  ;;  %v568_v16 = vsel %vm320_vm1, %v256_v3, 0  ;;  %v11251_v40 = vand.u32 4294901760, %v565_v33  ;;  %v1519_v34 = vand.u32 4294901760, %v1518_v6 }
  0xb0   : > { %13382 = vst [vmem:[#allocation147_spill] sm:$0xff] %v11235_v63  ;;  %8030 = vmatmul.mubr.f32.gmra.mrb[68].mxu1 %v1479_v12  ;;  %v13386_v12 = vand.u32 4294901760, %v11140_v58  ;;  %v1538_v45 = vsub.f32 %v11213_v8, %v1537_v14  ;;  %v11261_v3 = vsub.f32 %v562_v55, %v11241_v57  ;;  %v571_v6 = vsel %vm320_vm1, %v257_v38, 0  ;;  %v259_v8 = vld [vmem:[%s10207_s14 + $0x2a8] sm:$0xff] }
  0xb1   : > { %8672 = vmatmul.mubr.f32.gmra.mrb[68].mxu0 %v13385_v44  ;;  %8032 = vmatprep.mubr.f32.mxu1 %v1489_v2  ;;  %13387 = vst [vmem:[#allocation150_spill] sm:$0xff] %v11251_v40  ;;  %v11256_v2 = vsub.f32 %v559_v15, %v11237_v26  ;;  %v1529_v13 = vand.u32 4294901760, %v1528_v10  ;;  %v1548_v44 = vsub.f32 %v11222_v36, %v1547_v20  ;;  %v13392_v55 = vand.u32 4294901760, %v11232_v51  ;;  %v261_v10 = vld [vmem:[%s10207_s14 + $0x2b8] sm:$0xff] }
  0xb2   : > { %8674 = vmatprep.mubr.f32.mxu0 %v13386_v12  ;;  %13389 = vst [vmem:[#allocation152_spill] sm:$0xff] %v11261_v3  ;;  %v11263_v12 = vand.u32 4294901760, %v568_v16  ;;  %v11268_v15 = vsub.f32 %v565_v33, %v11251_v40  ;;  %v13393_v53 = vand.u32 4294901760, %v11235_v63  ;;  %v1539_v33 = vand.u32 4294901760, %v1538_v45  ;;  %v265_v26 = vld [vmem:[%s10207_s14 + $0x2d8] sm:$0xff] }
  0xb3   : > { %13388 = vst [vmem:[#allocation151_spill] sm:$0xff] %v11256_v2  ;;  %v1558_v58 = vsub.f32 %v11232_v51, %v13392_v55  ;;  %v13396_v36 = vand.u32 4294901760, %v11180_v37  ;;  %v1549_v55 = vand.u32 4294901760, %v1548_v44 }
  0xb4   : > { %8033 = vmatmul.mubr.f32.gmra.mrb[70].mxu1 %v1499_v28  ;;  %13390 = vst [vmem:[#allocation153_spill] sm:$0xff] %v11263_v12  ;;  %13391 = vst [vmem:[#allocation154_spill] sm:$0xff] %v11268_v15  ;;  %v574_v28 = vsel %vm320_vm1, %v258_v48, 0  ;;  %v1568_v38 = vsub.f32 %v11235_v63, %v13393_v53  ;;  %v11284_v48 = vsub.f32 %v568_v16, %v11263_v12  ;;  %v577_v53 = vsel %vm320_vm1, %v259_v8, 0 }
  0xb5   : > { %8675 = vmatmul.mubr.f32.gmra.mrb[70].mxu0 %v1497_v39  ;;  %8035 = vmatprep.mubr.f32.mxu1 %v1509_v46  ;;  %v11279_v39 = vand.u32 4294901760, %v571_v6  ;;  %v11288_v40 = vand.u32 4294901760, %v574_v28  ;;  %v12944_v57 = vand.u32 4294901760, %v11268_v15  ;;  %v1559_v46 = vand.u32 4294901760, %v1558_v58 }
  0xb6   : > { %8677 = vmatprep.mubr.f32.mxu0 %v1507_v7  ;;  %v260_v7 = vld [vmem:[%s10207_s14 + $0x2b0] sm:$0xff]  ;;  %13395 = vst [vmem:[#allocation156_spill] sm:$0xff] %v11284_v48  ;;  %v1569_v16 = vand.u32 4294901760, %v1568_v38  ;;  %v13398_v12 = vand.u32 4294901760, %v11256_v2  ;;  %v13400_v8 = vand.u32 4294901760, %v11261_v3  ;;  %v583_v58 = vsel %vm320_vm1, %v261_v10, 0 }
  0xb7   : > { %13394 = vst [vmem:[#allocation155_spill] sm:$0xff] %v11279_v39  ;;  %13397 = vst [vmem:[#allocation157_spill] sm:$0xff] %v11288_v40  ;;  %v580_v45 = vsel %vm320_vm1, %v260_v7, 0  ;;  %v11305_v7 = vand.u32 4294901760, %v577_v53  ;;  %v11309_v38 = vsub.f32 %v574_v28, %v11288_v40  ;;  %v1598_v44 = vsub.f32 %v11268_v15, %v12944_v57 }
  0xb8   : > { %8036 = vmatmul.mubr.f32.gmra.mrb[72].mxu1 %v1519_v34  ;;  %v262_v34 = vld [vmem:[%s10207_s14 + $0x2c0] sm:$0xff]  ;;  %v11323_v28 = vand.u32 4294901760, %v583_v58  ;;  %v13408_v57 = vand.u32 4294901760, %v11232_v51  ;;  %v13418_v51 = vand.u32 4294901760, %v11261_v3 }
  0xb9   : > { %8678 = vmatmul.mubr.f32.gmra.mrb[72].mxu0 %v13396_v36  ;;  %8038 = vmatprep.mubr.f32.mxu1 %v1529_v13  ;;  %v1578_v36 = vsub.f32 %v11256_v2, %v13398_v12  ;;  %v11299_v13 = vsub.f32 %v571_v6, %v11279_v39  ;;  %13401 = vst [vmem:[#allocation159_spill] sm:$0xff] %v11305_v7  ;;  %13402 = vst [vmem:[#allocation160_spill] sm:$0xff] %v11309_v38  ;;  %v11311_v12 = vand.u32 4294901760, %v580_v45 }
  0xba   : > { %8680 = vmatprep.mubr.f32.mxu0 %v1527_v9  ;;  %v1588_v9 = vsub.f32 %v11261_v3, %v13400_v8  ;;  %v586_v6 = vsel %vm320_vm1, %v262_v34, 0  ;;  %v11317_v8 = vsub.f32 %v10228_v31, %v10305_v25  ;;  %13404 = vst [vmem:[#allocation162_spill] sm:$0xff] %v11323_v28  ;;  %v13405_v34 = vand.u32 4294901760, %v11284_v48 }
  0xbb   : > { %13399 = vst [vmem:[#allocation158_spill] sm:$0xff] %v11299_v13  ;;  %13403 = vst [vmem:[#allocation161_spill] sm:$0xff] %v11311_v12  ;;  %v11333_v40 = vand.u32 4294901760, %v586_v6 }
  0xbc   : > { %8039 = vmatmul.mubr.f32.gmra.mrb[74].mxu1 %v1539_v33  ;;  %v263_v33 = vld [vmem:[%s10207_s14 + $0x2c8] sm:$0xff]  ;;  %v2138_v37 = vand.u32 4294901760, %v11317_v8  ;;  %v1608_v31 = vsub.f32 %v11284_v48, %v13405_v34  ;;  %v1589_v10 = vand.u32 4294901760, %v1588_v9  ;;  %v11352_v9 = vsub.f32 %v583_v58, %v11323_v28 }
  0xbd   : > { %8681 = vmatmul.mubr.f32.gmra.mrb[74].mxu0 %v1537_v14  ;;  %8041 = vmatprep.mubr.f32.mxu1 %v1549_v55  ;;  %v1579_v14 = vand.u32 4294901760, %v1578_v36  ;;  %v264_v55 = vld [vmem:[%s10207_s14 + $0x2d0] sm:$0xff]  ;;  %13407 = vst [vmem:[#allocation164_spill] sm:$0xff] %v11333_v40  ;;  %v589_v36 = vsel %vm320_vm1, %v263_v33, 0  ;;  %v266_v33 = vld [vmem:[%s10207_s14 + $0x2e0] sm:$0xff]  ;;  %v13415_v58 = vand.u32 4294901760, %v11256_v2 }
  0xbe   : > { %8683 = vmatprep.mubr.f32.mxu0 %v1547_v20  ;;  %v11331_v20 = vsub.f32 %v577_v53, %v11305_v7  ;;  %v2139_v34 = vsub.f32 %v11317_v8, %v2138_v37  ;;  %v13410_v53 = vand.u32 4294901760, %v11235_v63  ;;  %v1599_v7 = vand.u32 4294901760, %v1598_v44  ;;  %8781 = vmatprep.subr.mxu0 %v2138_v37  ;;  %13412 = vst [vmem:[#allocation166_spill] sm:$0xff] %v11352_v9 }
  0xbf   : > { %v592_v56 = vsel %vm320_vm1, %v264_v55, 0  ;;  %8782 = vmatpush3.msra.mxu0 %v2138_v37  ;;  %v1609_v63 = vand.u32 4294901760, %v1608_v31  ;;  %v11358_v55 = vsub.f32 %v586_v6, %v11333_v40  ;;  %v598_v6 = vsel %vm320_vm1, %v266_v33, 0 }
  0xc0   : > { %8042 = vmatmul.mubr.f32.gmra.mrb[76].mxu1 %v1559_v46  ;;  %13406 = vst [vmem:[#allocation163_spill] sm:$0xff] %v11331_v20  ;;  %v11340_v46 = vsub.f32 %v580_v45, %v11311_v12  ;;  %v11354_v45 = vand.u32 4294901760, %v589_v36  ;;  %v2140_v39 = vand.u32 4294901760, %v2139_v34  ;;  %v1637_v44 = vand.u32 4294901760, %v11331_v20  ;;  %9290 = vmatprep.subr.bf16.mxu0 %v10153_v11  ;;  %v267_v34 = vld [vmem:[%s10207_s14 + $0x2e8] sm:$0xff] }
  0xc1   : > { %8684 = vmatmul.mubr.f32.gmra.mrb[76].mxu0 %v13408_v57  ;;  %8044 = vmatprep.mubr.f32.mxu1 %v1569_v16  ;;  %v13411_v57 = vand.u32 4294901760, %v11299_v13  ;;  %13414 = vst [vmem:[#allocation168_spill] sm:$0xff] %v11358_v55  ;;  %v11368_v31 = vand.u32 4294901760, %v592_v56  ;;  %v1667_v33 = vand.u32 4294901760, %v11358_v55  ;;  %v11383_v3 = vand.u32 4294901760, %v598_v6 }
  0xc2   : > { %13409 = vst [vmem:[#allocation165_spill] sm:$0xff] %v11340_v46  ;;  %8686 = vmatprep.mubr.f32.mxu0 %v13410_v53  ;;  %13413 = vst [vmem:[#allocation167_spill] sm:$0xff] %v11354_v45  ;;  %v595_v53 = vsel %vm320_vm1, %v265_v26, 0  ;;  %8139 = vmatprep.subr.mxu1 %v2140_v39  ;;  %v1638_v40 = vsub.f32 %v11331_v20, %v1637_v44  ;;  %v269_v20 = vld [vmem:[%s10207_s14 + $0x2f8] sm:$0xff]  ;;  %v13425_v28 = vand.u32 4294901760, %v11352_v9 }
  0xc3   : > { %v1618_v16 = vsub.f32 %v11299_v13, %v13411_v57  ;;  %v13416_v57 = vand.u32 4294901760, %v11309_v38  ;;  %13417 = vst [vmem:[#allocation169_spill] sm:$0xff] %v11368_v31  ;;  %8140 = vmatpush3.msra.mxu1 %v2140_v39  ;;  %13421 = vst [vmem:[#allocation172_spill] sm:$0xff] %v11383_v3  ;;  %v13424_v39 = vand.u32 4294901760, %v11284_v48  ;;  %v13429_v48 = vand.u32 4294901760, %v11299_v13 }
  0xc4   : > { %8045 = vmatmul.mubr.f32.gmra.mrb[78].mxu1 %v1579_v14  ;;  %v1647_v14 = vand.u32 4294901760, %v11340_v46 }
  0xc5   : > { %8687 = vmatmul.mubr.f32.gmra.mrb[78].mxu0 %v13415_v58  ;;  %8047 = vmatprep.mubr.f32.mxu1 %v1589_v10  ;;  %v1628_v37 = vsub.f32 %v11309_v38, %v13416_v57  ;;  %v1619_v26 = vand.u32 4294901760, %v1618_v16  ;;  %v11376_v10 = vsub.f32 %v589_v36, %v11354_v45  ;;  %v11378_v58 = vand.u32 4294901760, %v595_v53  ;;  %v268_v57 = vld [vmem:[%s10207_s14 + $0x2f0] sm:$0xff] }
  0xc6   : > { %8689 = vmatprep.mubr.f32.mxu0 %v13418_v51  ;;  %v601_v51 = vsel %vm320_vm1, %v267_v34, 0  ;;  %v13422_v16 = vand.u32 4294901760, %v11268_v15  ;;  %v1648_v2 = vsub.f32 %v11340_v46, %v1647_v14  ;;  %v11390_v45 = vsub.f32 %v592_v56, %v11368_v31  ;;  %v270_v56 = vld [vmem:[%s10207_s14 + $0x300] sm:$0xff] }
  0xc7   : > { %13419 = vst [vmem:[#allocation170_spill] sm:$0xff] %v11376_v10  ;;  %13420 = vst [vmem:[#allocation171_spill] sm:$0xff] %v11378_v58  ;;  %v1629_v36 = vand.u32 4294901760, %v1628_v37  ;;  %v1658_v34 = vsub.f32 %v11352_v9, %v13425_v28  ;;  %v11403_v37 = vand.u32 4294901760, %v601_v51  ;;  %v1639_v46 = vand.u32 4294901760, %v1638_v40 }
  0xc8   : > { %8048 = vmatmul.mubr.f32.gmra.mrb[80].mxu1 %v1599_v7  ;;  %13423 = vst [vmem:[#allocation173_spill] sm:$0xff] %v11390_v45  ;;  %v604_v7 = vsel %vm320_vm1, %v268_v57, 0  ;;  %v11408_v57 = vsub.f32 %v598_v6, %v11383_v3  ;;  %v1649_v28 = vand.u32 4294901760, %v1648_v2  ;;  %v607_v15 = vsel %vm320_vm1, %v269_v20, 0 }
  0xc9   : > { %8690 = vmatmul.mubr.f32.gmra.mrb[80].mxu0 %v13422_v16  ;;  %8050 = vmatprep.mubr.f32.mxu1 %v1609_v63  ;;  %v11401_v63 = vsub.f32 %v595_v53, %v11378_v58  ;;  %13427 = vst [vmem:[#allocation175_spill] sm:$0xff] %v11403_v37  ;;  %v1687_v16 = vand.u32 4294901760, %v11390_v45  ;;  %v11413_v53 = vand.u32 4294901760, %v604_v7  ;;  %v271_v58 = vld [vmem:[%s10207_s14 + $0x308] sm:$0xff]  ;;  %v610_v40 = vsel %vm320_vm1, %v270_v56, 0 }
  0xca   : > { %8692 = vmatprep.mubr.f32.mxu0 %v13424_v39  ;;  %v1668_v39 = vsub.f32 %v11358_v55, %v1667_v33  ;;  %13428 = vst [vmem:[#allocation176_spill] sm:$0xff] %v11408_v57  ;;  %v272_v55 = vld [vmem:[%s10207_s14 + $0x310] sm:$0xff]  ;;  %v1659_v6 = vand.u32 4294901760, %v1658_v34  ;;  %v13432_v13 = vand.u32 4294901760, %v11376_v10  ;;  %v613_v56 = vsel %vm320_vm1, %v271_v58, 0  ;;  %v274_v58 = vld [vmem:[%s10207_s14 + $0x320] sm:$0xff] }
  0xcb   : > { %13426 = vst [vmem:[#allocation174_spill] sm:$0xff] %v11401_v63  ;;  %13430 = vst [vmem:[#allocation177_spill] sm:$0xff] %v11413_v53  ;;  %v1697_v2 = vand.u32 4294901760, %v11401_v63  ;;  %v1688_v34 = vsub.f32 %v11390_v45, %v1687_v16  ;;  %v11436_v3 = vand.u32 4294901760, %v610_v40 }
  0xcc   : > { %8051 = vmatmul.mubr.f32.gmra.mrb[82].mxu1 %v1619_v26  ;;  %v13431_v26 = vand.u32 4294901760, %v11309_v38  ;;  %v1669_v20 = vand.u32 4294901760, %v1668_v39 }
  0xcd   : > { %8693 = vmatmul.mubr.f32.gmra.mrb[82].mxu0 %v13429_v48  ;;  %8053 = vmatprep.mubr.f32.mxu1 %v1629_v36  ;;  %v1678_v48 = vsub.f32 %v11376_v10, %v13432_v13  ;;  %v11426_v36 = vsub.f32 %v601_v51, %v11403_v37  ;;  %v11434_v13 = vsub.f32 %v604_v7, %v11413_v53  ;;  %v616_v51 = vsel %vm320_vm1, %v272_v55, 0  ;;  %v275_v53 = vld [vmem:[%s10207_s14 + $0x328] sm:$0xff] }
  0xce   : > { %8695 = vmatprep.mubr.f32.mxu0 %v13431_v26  ;;  %v11429_v26 = vand.u32 4294901760, %v607_v15  ;;  %13436 = vst [vmem:[#allocation181_spill] sm:$0xff] %v11436_v3  ;;  %v1698_v38 = vsub.f32 %v11401_v63, %v1697_v2  ;;  %v13438_v7 = vand.u32 4294901760, %v11408_v57  ;;  %v11451_v55 = vand.u32 4294901760, %v616_v51 }
  0xcf   : > { %13433 = vst [vmem:[#allocation178_spill] sm:$0xff] %v11426_v36  ;;  %13435 = vst [vmem:[#allocation180_spill] sm:$0xff] %v11434_v13  ;;  %v1679_v39 = vand.u32 4294901760, %v1678_v48  ;;  %v13441_v48 = vand.u32 4294901760, %v11352_v9  ;;  %v1689_v37 = vand.u32 4294901760, %v1688_v34  ;;  %v1727_v63 = vand.u32 4294901760, %v11434_v13 }
  0xd0   : > { %8054 = vmatmul.mubr.f32.gmra.mrb[84].mxu1 %v1639_v46  ;;  %13434 = vst [vmem:[#allocation179_spill] sm:$0xff] %v11429_v26  ;;  %v273_v46 = vld [vmem:[%s10207_s14 + $0x318] sm:$0xff]  ;;  %v11449_v45 = vsub.f32 %v607_v15, %v11429_v26  ;;  %13440 = vst [vmem:[#allocation184_spill] sm:$0xff] %v11451_v55  ;;  %v276_v15 = vld [vmem:[%s10207_s14 + $0x330] sm:$0xff]  ;;  %v1699_v26 = vand.u32 4294901760, %v1698_v38  ;;  %v13443_v31 = vand.u32 4294901760, %v11426_v36 }
  0xd1   : > { %8696 = vmatmul.mubr.f32.gmra.mrb[84].mxu0 %v1637_v44  ;;  %8056 = vmatprep.mubr.f32.mxu1 %v1649_v28  ;;  %v11442_v44 = vand.u32 4294901760, %v613_v56  ;;  %v1708_v28 = vsub.f32 %v11408_v57, %v13438_v7  ;;  %v622_v7 = vsel %vm320_vm1, %v274_v58, 0  ;;  %v625_v58 = vsel %vm320_vm1, %v275_v53, 0 }
  0xd2   : > { %8698 = vmatprep.mubr.f32.mxu0 %v1647_v14  ;;  %13439 = vst [vmem:[#allocation183_spill] sm:$0xff] %v11449_v45  ;;  %v619_v14 = vsel %vm320_vm1, %v273_v46, 0  ;;  %v1718_v46 = vsub.f32 %v11426_v36, %v13443_v31  ;;  %v13447_v38 = vand.u32 4294901760, %v11376_v10  ;;  %v1728_v31 = vsub.f32 %v11434_v13, %v1727_v63 }
  0xd3   : > { %13437 = vst [vmem:[#allocation182_spill] sm:$0xff] %v11442_v44  ;;  %v1709_v34 = vand.u32 4294901760, %v1708_v28  ;;  %v11480_v9 = vand.u32 4294901760, %v622_v7  ;;  %v277_v28 = vld [vmem:[%s10207_s14 + $0x338] sm:$0xff]  ;;  %v11488_v53 = vand.u32 4294901760, %v625_v58 }
  0xd4   : > { %8057 = vmatmul.mubr.f32.gmra.mrb[86].mxu1 %v1659_v6  ;;  %v11458_v6 = vsub.f32 %v610_v40, %v11436_v3  ;;  %v1737_v40 = vand.u32 4294901760, %v11449_v45 }
  0xd5   : > { %8699 = vmatmul.mubr.f32.gmra.mrb[86].mxu0 %v13441_v48  ;;  %8059 = vmatprep.mubr.f32.mxu1 %v1669_v20  ;;  %v11467_v48 = vsub.f32 %v613_v56, %v11442_v44  ;;  %v11469_v20 = vand.u32 4294901760, %v619_v14  ;;  %13448 = vst [vmem:[#allocation189_spill] sm:$0xff] %v11480_v9  ;;  %v1719_v44 = vand.u32 4294901760, %v1718_v46  ;;  %13450 = vst [vmem:[#allocation191_spill] sm:$0xff] %v11488_v53 }
  0xd6   : > { %13442 = vst [vmem:[#allocation185_spill] sm:$0xff] %v11458_v6  ;;  %8701 = vmatprep.mubr.f32.mxu0 %v1667_v33  ;;  %v11473_v33 = vsub.f32 %v616_v51, %v11451_v55  ;;  %v1747_v56 = vand.u32 4294901760, %v11458_v6  ;;  %v11498_v46 = vsub.f32 %v622_v7, %v11480_v9  ;;  %v13453_v51 = vand.u32 4294901760, %v11408_v57  ;;  %v282_v9 = vld [vmem:[%s10207_s14 + $0x360] sm:$0xff] }
  0xd7   : > { %13444 = vst [vmem:[#allocation186_spill] sm:$0xff] %v11467_v48  ;;  %13445 = vst [vmem:[#allocation187_spill] sm:$0xff] %v11469_v20  ;;  %v11486_v55 = vsub.f32 %v619_v14, %v11469_v20  ;;  %v11513_v7 = vsub.f32 %v625_v58, %v11488_v53 }
  0xd8   : > { %8060 = vmatmul.mubr.f32.gmra.mrb[88].mxu1 %v1679_v39  ;;  %13446 = vst [vmem:[#allocation188_spill] sm:$0xff] %v11473_v33  ;;  %v628_v39 = vsel %vm320_vm1, %v276_v15, 0  ;;  %v1729_v15 = vand.u32 4294901760, %v1728_v31  ;;  %v1748_v14 = vsub.f32 %v11458_v6, %v1747_v56  ;;  %13452 = vst [vmem:[#allocation193_spill] sm:$0xff] %v11498_v46  ;;  %v1787_v6 = vand.u32 4294901760, %v11498_v46 }
  0xd9   : > { %8702 = vmatmul.mubr.f32.gmra.mrb[88].mxu0 %v13447_v38  ;;  %8062 = vmatprep.mubr.f32.mxu1 %v1689_v37  ;;  %13449 = vst [vmem:[#allocation190_spill] sm:$0xff] %v11486_v55  ;;  %v278_v37 = vld [vmem:[%s10207_s14 + $0x340] sm:$0xff]  ;;  %v1738_v38 = vsub.f32 %v11449_v45, %v1737_v40  ;;  %v11493_v10 = vand.u32 4294901760, %v628_v39  ;;  %v279_v45 = vld [vmem:[%s10207_s14 + $0x348] sm:$0xff]  ;;  %13455 = vst [vmem:[#allocation194_spill] sm:$0xff] %v11513_v7 }
  0xda   : > { %8704 = vmatprep.mubr.f32.mxu0 %v1687_v16  ;;  %v631_v16 = vsel %vm320_vm1, %v277_v28, 0  ;;  %v634_v13 = vsel %vm320_vm1, %v278_v37, 0  ;;  %v13454_v28 = vand.u32 4294901760, %v11467_v48  ;;  %v1749_v58 = vand.u32 4294901760, %v1748_v14 }
  0xdb   : > { %13451 = vst [vmem:[#allocation192_spill] sm:$0xff] %v11493_v10  ;;  %v11515_v31 = vand.u32 4294901760, %v631_v16  ;;  %v11528_v57 = vand.u32 4294901760, %v634_v13  ;;  %v637_v53 = vsel %vm320_vm1, %v279_v45, 0 }
  0xdc   : > { %8063 = vmatmul.mubr.f32.gmra.mrb[90].mxu1 %v1699_v26  ;;  %v11502_v26 = vpack.c.bf16 %v10178_v19, %v10176_v18  ;;  %v280_v18 = vld [vmem:[%s10207_s14 + $0x350] sm:$0xff]  ;;  %v1739_v19 = vand.u32 4294901760, %v1738_v38 }
  0xdd   : > { %8705 = vmatmul.mubr.f32.gmra.mrb[90].mxu0 %v1697_v2  ;;  %8065 = vmatprep.mubr.f32.mxu1 %v1709_v34  ;;  %v1758_v2 = vsub.f32 %v11467_v48, %v13454_v28  ;;  %13456 = vst [vmem:[#allocation195_spill] sm:$0xff] %v11515_v31  ;;  %v11523_v28 = vsub.f32 %v628_v39, %v11493_v10  ;;  %v13459_v34 = vand.u32 4294901760, %v11426_v36  ;;  %13460 = vst [vmem:[#allocation197_spill] sm:$0xff] %v11528_v57 }
  0xde   : > { %8707 = vmatprep.mubr.f32.mxu0 %v13453_v51  ;;  %9230 = vmatprep.subr.bf16.mxu1 %v11502_v26  ;;  %v13457_v51 = vand.u32 4294901760, %v11473_v33  ;;  %v640_v38 = vsel %vm320_vm1, %v280_v18, 0  ;;  %v13461_v39 = vand.u32 4294901760, %v11486_v55  ;;  %v11539_v14 = vsub.f32 %v631_v16, %v11515_v31 }
  0xdf   : > { %13458 = vst [vmem:[#allocation196_spill] sm:$0xff] %v11523_v28  ;;  %v1807_v45 = vand.u32 4294901760, %v11523_v28  ;;  %v11549_v10 = vand.u32 4294901760, %v640_v38  ;;  %v646_v16 = vsel %vm320_vm1, %v282_v9, 0 }
  0xe0   : > { %8066 = vmatmul.mubr.f32.gmra.mrb[92].mxu1 %v1719_v44  ;;  %v1768_v37 = vsub.f32 %v11473_v33, %v13457_v51  ;;  %v281_v44 = vld [vmem:[%s10207_s14 + $0x358] sm:$0xff]  ;;  %v1759_v51 = vand.u32 4294901760, %v1758_v2  ;;  %v1778_v36 = vsub.f32 %v11486_v55, %v13461_v39  ;;  %13462 = vst [vmem:[#allocation198_spill] sm:$0xff] %v11539_v14  ;;  %v1788_v2 = vsub.f32 %v11498_v46, %v1787_v6 }
  0xe1   : > { %8708 = vmatmul.mubr.f32.gmra.mrb[92].mxu0 %v13459_v34  ;;  %8068 = vmatprep.mubr.f32.mxu1 %v1729_v15  ;;  %v1797_v15 = vand.u32 4294901760, %v11513_v7  ;;  %v643_v18 = vsel %vm320_vm1, %v281_v44, 0  ;;  %v11547_v39 = vsub.f32 %v634_v13, %v11528_v57  ;;  %13465 = vst [vmem:[#allocation201_spill] sm:$0xff] %v11549_v10  ;;  %v1817_v20 = vand.u32 4294901760, %v11539_v14 }
  0xe2   : > { %8710 = vmatprep.mubr.f32.mxu0 %v1727_v63  ;;  %v1769_v34 = vand.u32 4294901760, %v1768_v37  ;;  %v11542_v63 = vand.u32 4294901760, %v637_v53  ;;  %v1779_v37 = vand.u32 4294901760, %v1778_v36  ;;  %v1808_v13 = vsub.f32 %v11523_v28, %v1807_v45 }
  0xe3   : > { %13464 = vst [vmem:[#allocation200_spill] sm:$0xff] %v11547_v39  ;;  %v1798_v31 = vsub.f32 %v11513_v7, %v1797_v15  ;;  %v11562_v46 = vand.u32 4294901760, %v646_v16  ;;  %v13469_v36 = vand.u32 4294901760, %v11467_v48  ;;  %v1827_v7 = vand.u32 4294901760, %v11547_v39 }
  0xe4   : > { %8069 = vmatmul.mubr.f32.gmra.mrb[94].mxu1 %v1739_v19  ;;  %13463 = vst [vmem:[#allocation199_spill] sm:$0xff] %v11542_v63  ;;  %v283_v19 = vld [vmem:[%s10207_s14 + $0x368] sm:$0xff]  ;;  %v11560_v44 = vsub.f32 %v637_v53, %v11542_v63  ;;  %v11569_v57 = vsub.f32 %v640_v38, %v11549_v10  ;;  %v13471_v28 = vand.u32 4294901760, %v11473_v33  ;;  %v286_v63 = vld [vmem:[%s10207_s14 + $0x380] sm:$0xff] }
  0xe5   : > { %8711 = vmatmul.mubr.f32.gmra.mrb[94].mxu0 %v1737_v40  ;;  %8071 = vmatprep.mubr.f32.mxu1 %v1749_v58  ;;  %v11555_v40 = vand.u32 4294901760, %v643_v18  ;;  %v284_v58 = vld [vmem:[%s10207_s14 + $0x370] sm:$0xff]  ;;  %13468 = vst [vmem:[#allocation204_spill] sm:$0xff] %v11562_v46  ;;  %v649_v9 = vsel %vm320_vm1, %v283_v19, 0  ;;  %v1799_v3 = vand.u32 4294901760, %v1798_v31  ;;  %v1818_v19 = vsub.f32 %v11539_v14, %v1817_v20 }
  0xe6   : > { %8713 = vmatprep.mubr.f32.mxu0 %v1747_v56  ;;  %13467 = vst [vmem:[#allocation203_spill] sm:$0xff] %v11560_v44  ;;  %v1789_v56 = vand.u32 4294901760, %v1788_v2  ;;  %13470 = vst [vmem:[#allocation205_spill] sm:$0xff] %v11569_v57  ;;  %v652_v53 = vsel %vm320_vm1, %v284_v58, 0  ;;  %v1809_v2 = vand.u32 4294901760, %v1808_v13  ;;  %v1837_v38 = vand.u32 4294901760, %v11560_v44 }
  0xe7   : > { %13466 = vst [vmem:[#allocation202_spill] sm:$0xff] %v11555_v40  ;;  %v11584_v33 = vsub.f32 %v646_v16, %v11562_v46  ;;  %v13475_v58 = vand.u32 4294901760, %v11486_v55  ;;  %v1828_v31 = vsub.f32 %v11547_v39, %v1827_v7  ;;  %v11591_v14 = vand.u32 4294901760, %v652_v53  ;;  %v287_v13 = vld [vmem:[%s10207_s14 + $0x388] sm:$0xff]  ;;  %v289_v16 = vld [vmem:[%s10207_s14 + $0x398] sm:$0xff] }
  0xe8   : > { %8072 = vmatmul.mubr.f32.gmra.mrb[96].mxu1 %v1759_v51  ;;  %v285_v51 = vld [vmem:[%s10207_s14 + $0x378] sm:$0xff]  ;;  %v1819_v48 = vand.u32 4294901760, %v1818_v19 }
  0xe9   : > { %8714 = vmatmul.mubr.f32.gmra.mrb[96].mxu0 %v13469_v36  ;;  %8074 = vmatprep.mubr.f32.mxu1 %v1769_v34  ;;  %v11578_v36 = vsub.f32 %v643_v18, %v11555_v40  ;;  %v11580_v34 = vand.u32 4294901760, %v649_v9  ;;  %13474 = vst [vmem:[#allocation208_spill] sm:$0xff] %v11584_v33  ;;  %v1847_v18 = vand.u32 4294901760, %v11569_v57  ;;  %13476 = vst [vmem:[#allocation209_spill] sm:$0xff] %v11591_v14 }
  0xea   : > { %8716 = vmatprep.mubr.f32.mxu0 %v13471_v28  ;;  %v655_v28 = vsel %vm320_vm1, %v285_v51, 0 }
  0xeb   : > { %13472 = vst [vmem:[#allocation206_spill] sm:$0xff] %v11578_v36  ;;  %13473 = vst [vmem:[#allocation207_spill] sm:$0xff] %v11580_v34  ;;  %v11597_v51 = vsub.f32 %v649_v9, %v11580_v34  ;;  %v11599_v55 = vand.u32 4294901760, %v655_v28  ;;  %v1848_v19 = vsub.f32 %v11569_v57, %v1847_v18  ;;  %v11609_v9 = vsub.f32 %v652_v53, %v11591_v14 }
  0xec   : > { %8075 = vmatmul.mubr.f32.gmra.mrb[98].mxu1 %v1779_v37  ;;  %v658_v37 = vsel %vm320_vm1, %v286_v63, 0  ;;  %v1829_v63 = vand.u32 4294901760, %v1828_v31  ;;  %v290_v31 = vld [vmem:[%s10207_s14 + $0x3a0] sm:$0xff]  ;;  %v667_v57 = vsel %vm320_vm1, %v289_v16, 0 }
  0xed   : > { %8717 = vmatmul.mubr.f32.gmra.mrb[98].mxu0 %v13475_v58  ;;  %8077 = vmatprep.mubr.f32.mxu1 %v1789_v56  ;;  %13477 = vst [vmem:[#allocation210_spill] sm:$0xff] %v11597_v51  ;;  %13478 = vst [vmem:[#allocation211_spill] sm:$0xff] %v11599_v55  ;;  %v288_v56 = vld [vmem:[%s10207_s14 + $0x390] sm:$0xff]  ;;  %v1838_v58 = vsub.f32 %v11560_v44, %v1837_v38  ;;  %v11604_v46 = vand.u32 4294901760, %v658_v37  ;;  %v13481_v44 = vand.u32 4294901760, %v11578_v36  ;;  %v1887_v34 = vand.u32 4294901760, %v11609_v9 }
  0xee   : > { %8719 = vmatprep.mubr.f32.mxu0 %v1787_v6  ;;  %v661_v6 = vsel %vm320_vm1, %v287_v13, 0  ;;  %13480 = vst [vmem:[#allocation213_spill] sm:$0xff] %v11609_v9 }
  0xef   : > { %13479 = vst [vmem:[#allocation212_spill] sm:$0xff] %v11604_v46  ;;  %v1858_v39 = vsub.f32 %v11578_v36, %v13481_v44  ;;  %v1839_v53 = vand.u32 4294901760, %v1838_v58  ;;  %v1849_v44 = vand.u32 4294901760, %v1848_v19  ;;  %v292_v58 = vld [vmem:[%s10207_s14 + $0x3b0] sm:$0xff] }
  0xf0   : > { %8078 = vmatmul.mubr.f32.gmra.mrb[100].mxu1 %v1799_v3  ;;  %v664_v3 = vsel %vm320_vm1, %v288_v56, 0  ;;  %v11627_v56 = vsub.f32 %v658_v37, %v11604_v46 }
  0xf1   : > { %8720 = vmatmul.mubr.f32.gmra.mrb[100].mxu0 %v1797_v15  ;;  %8080 = vmatprep.mubr.f32.mxu1 %v1809_v2  ;;  %v11618_v15 = vsub.f32 %v655_v28, %v11599_v55  ;;  %v11620_v2 = vand.u32 4294901760, %v661_v6  ;;  %v11630_v28 = vand.u32 4294901760, %v664_v3  ;;  %v291_v55 = vld [vmem:[%s10207_s14 + $0x3a8] sm:$0xff]  ;;  %v1859_v14 = vand.u32 4294901760, %v1858_v39 }
  0xf2   : > { %8722 = vmatprep.mubr.f32.mxu0 %v1807_v45  ;;  %v13484_v45 = vand.u32 4294901760, %v11584_v33  ;;  %13485 = vst [vmem:[#allocation216_spill] sm:$0xff] %v11627_v56  ;;  %v1907_v16 = vand.u32 4294901760, %v11627_v56  ;;  %v1888_v39 = vsub.f32 %v11609_v9, %v1887_v34 }
  0xf3   : > { %13482 = vst [vmem:[#allocation214_spill] sm:$0xff] %v11618_v15  ;;  %13483 = vst [vmem:[#allocation215_spill] sm:$0xff] %v11620_v2 }
  0xf4   : > { %8081 = vmatmul.mubr.f32.gmra.mrb[102].mxu1 %v1819_v48  ;;  %v1868_v13 = vsub.f32 %v11584_v33, %v13484_v45  ;;  %13486 = vst [vmem:[#allocation217_spill] sm:$0xff] %v11630_v28  ;;  %v670_v48 = vsel %vm320_vm1, %v290_v31, 0  ;;  %v13487_v45 = vand.u32 4294901760, %v11597_v51  ;;  %v673_v31 = vsel %vm320_vm1, %v291_v55, 0 }
  0xf5   : > { %8723 = vmatmul.mubr.f32.gmra.mrb[102].mxu0 %v1817_v20  ;;  %8083 = vmatprep.mubr.f32.mxu1 %v1829_v63  ;;  %v1897_v20 = vand.u32 4294901760, %v11618_v15  ;;  %v11641_v63 = vsub.f32 %v661_v6, %v11620_v2  ;;  %v11651_v46 = vand.u32 4294901760, %v670_v48  ;;  %v676_v6 = vsel %vm320_vm1, %v292_v58, 0  ;;  %v293_v2 = vld [vmem:[%s10207_s14 + $0x3b8] sm:$0xff] }
  0xf6   : > { %8725 = vmatprep.mubr.f32.mxu0 %v1827_v7  ;;  %v1878_v37 = vsub.f32 %v11597_v51, %v13487_v45  ;;  %v1869_v19 = vand.u32 4294901760, %v1868_v13  ;;  %v11644_v7 = vand.u32 4294901760, %v667_v57  ;;  %v11649_v45 = vsub.f32 %v664_v3, %v11630_v28 }
  0xf7   : > { %13488 = vst [vmem:[#allocation218_spill] sm:$0xff] %v11641_v63  ;;  %v1898_v40 = vsub.f32 %v11618_v15, %v1897_v20  ;;  %v1917_v55 = vand.u32 4294901760, %v11641_v63  ;;  %v11664_v9 = vand.u32 4294901760, %v676_v6  ;;  %v13494_v58 = vand.u32 4294901760, %v11578_v36  ;;  %v297_v36 = vld [vmem:[%s10207_s14 + $0x3d8] sm:$0xff] }
  0xf8   : > { %8084 = vmatmul.mubr.f32.gmra.mrb[104].mxu1 %v1839_v53  ;;  %13489 = vst [vmem:[#allocation219_spill] sm:$0xff] %v11644_v7  ;;  %13490 = vst [vmem:[#allocation220_spill] sm:$0xff] %v11649_v45  ;;  %v294_v53 = vld [vmem:[%s10207_s14 + $0x3c0] sm:$0xff]  ;;  %v1879_v13 = vand.u32 4294901760, %v1878_v37  ;;  %v11662_v3 = vsub.f32 %v667_v57, %v11644_v7  ;;  %v1889_v37 = vand.u32 4294901760, %v1888_v39  ;;  %v1927_v15 = vand.u32 4294901760, %v11649_v45 }
  0xf9   : > { %8726 = vmatmul.mubr.f32.gmra.mrb[104].mxu0 %v1837_v38  ;;  %8086 = vmatprep.mubr.f32.mxu1 %v1849_v44  ;;  %v11658_v38 = vand.u32 4294901760, %v673_v31  ;;  %v1908_v44 = vsub.f32 %v11627_v56, %v1907_v16  ;;  %13493 = vst [vmem:[#allocation223_spill] sm:$0xff] %v11664_v9  ;;  %v11671_v28 = vsub.f32 %v670_v48, %v11651_v46  ;;  %v295_v56 = vld [vmem:[%s10207_s14 + $0x3c8] sm:$0xff]  ;;  %v13496_v57 = vand.u32 4294901760, %v11584_v33  ;;  %v296_v39 = vld [vmem:[%s10207_s14 + $0x3d0] sm:$0xff] }
  0xfa   : > { %8728 = vmatprep.mubr.f32.mxu0 %v1847_v18  ;;  %13492 = vst [vmem:[#allocation222_spill] sm:$0xff] %v11662_v3  ;;  %v679_v18 = vsel %vm320_vm1, %v293_v2, 0  ;;  %v1899_v7 = vand.u32 4294901760, %v1898_v40  ;;  %v1918_v10 = vsub.f32 %v11641_v63, %v1917_v55  ;;  %v1937_v48 = vand.u32 4294901760, %v11662_v3 }
  0xfb   : > { %13491 = vst [vmem:[#allocation221_spill] sm:$0xff] %v11658_v38  ;;  %13495 = vst [vmem:[#allocation224_spill] sm:$0xff] %v11671_v28  ;;  %v11679_v2 = vsub.f32 %v673_v31, %v11658_v38  ;;  %v685_v40 = vsel %vm320_vm1, %v295_v56, 0  ;;  %v1909_v31 = vand.u32 4294901760, %v1908_v44  ;;  %v1928_v63 = vsub.f32 %v11649_v45, %v1927_v15 }
  0xfc   : > { %8087 = vmatmul.mubr.f32.gmra.mrb[106].mxu1 %v1859_v14  ;;  %v682_v14 = vsel %vm320_vm1, %v294_v53, 0  ;;  %v11686_v53 = vsub.f32 %v676_v6, %v11664_v9  ;;  %v1947_v33 = vand.u32 4294901760, %v11671_v28  ;;  %v11701_v56 = vand.u32 4294901760, %v685_v40 }
  0xfd   : > { %8729 = vmatmul.mubr.f32.gmra.mrb[106].mxu0 %v13494_v58  ;;  %8089 = vmatprep.mubr.f32.mxu1 %v1869_v19  ;;  %13497 = vst [vmem:[#allocation225_spill] sm:$0xff] %v11679_v2  ;;  %v11681_v19 = vand.u32 4294901760, %v679_v18  ;;  %v11688_v58 = vand.u32 4294901760, %v682_v14  ;;  %v1957_v6 = vand.u32 4294901760, %v11679_v2  ;;  %v1938_v44 = vsub.f32 %v11662_v3, %v1937_v48 }
  0xfe   : > { %8731 = vmatprep.mubr.f32.mxu0 %v13496_v57  ;;  %13499 = vst [vmem:[#allocation227_spill] sm:$0xff] %v11686_v53  ;;  %v13501_v57 = vand.u32 4294901760, %v11597_v51  ;;  %13503 = vst [vmem:[#allocation230_spill] sm:$0xff] %v11701_v56  ;;  %v298_v51 = vld [vmem:[%s10207_s14 + $0x3e0] sm:$0xff] }
  0xff   : > { %13498 = vst [vmem:[#allocation226_spill] sm:$0xff] %v11681_v19  ;;  %13500 = vst [vmem:[#allocation228_spill] sm:$0xff] %v11688_v58  ;;  %v11699_v9 = vsub.f32 %v679_v18, %v11681_v19  ;;  %v1948_v18 = vsub.f32 %v11671_v28, %v1947_v33  ;;  %v691_v19 = vsel %vm320_vm1, %v297_v36, 0  ;;  %v1958_v3 = vsub.f32 %v11679_v2, %v1957_v6 }
 0x100   : > { %8090 = vmatmul.mubr.f32.gmra.mrb[108].mxu1 %v1879_v13  ;;  %v688_v13 = vsel %vm320_vm1, %v296_v39, 0  ;;  %v1929_v39 = vand.u32 4294901760, %v1928_v63  ;;  %v1939_v63 = vand.u32 4294901760, %v1938_v44  ;;  %v11723_v36 = vand.u32 4294901760, %v691_v19  ;;  %v301_v44 = vld [vmem:[%s10207_s14 + $0x3f8] sm:$0xff] }
 0x101   : > { %8732 = vmatmul.mubr.f32.gmra.mrb[108].mxu0 %v13501_v57  ;;  %8092 = vmatprep.mubr.f32.mxu1 %v1889_v37  ;;  %13502 = vst [vmem:[#allocation229_spill] sm:$0xff] %v11699_v9  ;;  %v1919_v37 = vand.u32 4294901760, %v1918_v10  ;;  %v1967_v57 = vand.u32 4294901760, %v11686_v53  ;;  %v11710_v45 = vand.u32 4294901760, %v688_v13  ;;  %v694_v10 = vsel %vm320_vm1, %v298_v51, 0 }
 0x102   : > { %8734 = vmatprep.mubr.f32.mxu0 %v1887_v34  ;;  %v11707_v34 = vsub.f32 %v682_v14, %v11688_v58  ;;  %v1977_v38 = vand.u32 4294901760, %v11699_v9  ;;  %v11718_v14 = vsub.f32 %v685_v40, %v11701_v56  ;;  %13507 = vst [vmem:[#allocation234_spill] sm:$0xff] %v11723_v36  ;;  %v1949_v51 = vand.u32 4294901760, %v1948_v18 }
 0x103   : > { %13505 = vst [vmem:[#allocation232_spill] sm:$0xff] %v11710_v45  ;;  %v11728_v2 = vand.u32 4294901760, %v694_v10  ;;  %v1959_v56 = vand.u32 4294901760, %v1958_v3 }
 0x104   : > { %8093 = vmatmul.mubr.f32.gmra.mrb[110].mxu1 %v1899_v7  ;;  %13504 = vst [vmem:[#allocation231_spill] sm:$0xff] %v11707_v34  ;;  %v299_v7 = vld [vmem:[%s10207_s14 + $0x3e8] sm:$0xff]  ;;  %13506 = vst [vmem:[#allocation233_spill] sm:$0xff] %v11718_v14  ;;  %v1987_v28 = vand.u32 4294901760, %v11707_v34  ;;  %v1997_v58 = vand.u32 4294901760, %v11718_v14 }
 0x105   : > { %8735 = vmatmul.mubr.f32.gmra.mrb[110].mxu0 %v1897_v20  ;;  %8095 = vmatprep.mubr.f32.mxu1 %v1909_v31  ;;  %v300_v20 = vld [vmem:[%s10207_s14 + $0x3f0] sm:$0xff]  ;;  %v1968_v31 = vsub.f32 %v11686_v53, %v1967_v57  ;;  %13509 = vst [vmem:[#allocation236_spill] sm:$0xff] %v11728_v2  ;;  %v697_v40 = vsel %vm320_vm1, %v299_v7, 0  ;;  %v1978_v53 = vsub.f32 %v11699_v9, %v1977_v38 }
 0x106   : > { %8737 = vmatprep.mubr.f32.mxu0 %v1907_v16  ;;  %v11726_v16 = vsub.f32 %v688_v13, %v11710_v45  ;;  %v11737_v13 = vsub.f32 %v691_v19, %v11723_v36  ;;  %v11739_v18 = vand.u32 4294901760, %v697_v40  ;;  %v11743_v7 = vsub.f32 %v694_v10, %v11728_v2 }
 0x108   : > { %8096 = vmatmul.mubr.f32.gmra.mrb[112].mxu1 %v1919_v37  ;;  %13508 = vst [vmem:[#allocation235_spill] sm:$0xff] %v11726_v16  ;;  %v700_v37 = vsel %vm320_vm1, %v300_v20, 0  ;;  %13510 = vst [vmem:[#allocation237_spill] sm:$0xff] %v11737_v13  ;;  %v703_v20 = vsel %vm320_vm1, %v301_v44, 0  ;;  %v2017_v19 = vand.u32 4294901760, %v11737_v13  ;;  %v2027_v9 = vand.u32 4294901760, %v11743_v7 }
 0x109   : > { %8738 = vmatmul.mubr.f32.gmra.mrb[112].mxu0 %v1917_v55  ;;  %8098 = vmatprep.mubr.f32.mxu1 %v1929_v39  ;;  %v1969_v55 = vand.u32 4294901760, %v1968_v31  ;;  %v1988_v39 = vsub.f32 %v11707_v34, %v1987_v28  ;;  %13511 = vst [vmem:[#allocation238_spill] sm:$0xff] %v11739_v18  ;;  %13512 = vst [vmem:[#allocation239_spill] sm:$0xff] %v11743_v7  ;;  %v11745_v3 = vand.u32 4294901760, %v700_v37 }
 0x10a   : > { %8740 = vmatprep.mubr.f32.mxu0 %v1927_v15  ;;  %v2007_v15 = vand.u32 4294901760, %v11726_v16  ;;  %v1998_v31 = vsub.f32 %v11718_v14, %v1997_v58  ;;  %v11751_v34 = vsub.f32 %v697_v40, %v11739_v18  ;;  %v13559_v14 = vld [vmem:[#allocation96_spill] sm:$0xff] }
 0x10b   : > { %13513 = vst [vmem:[#allocation240_spill] sm:$0xff] %v11745_v3  ;;  %v1989_v10 = vand.u32 4294901760, %v1988_v39 }
 0x10c   : > { %8099 = vmatmul.mubr.f32.gmra.mrb[114].mxu1 %v1939_v63  ;;  %v1979_v63 = vand.u32 4294901760, %v1978_v53  ;;  %13514 = vst [vmem:[#allocation241_spill] sm:$0xff] %v11751_v34  ;;  %v1999_v53 = vand.u32 4294901760, %v1998_v31  ;;  %v2037_v40 = vand.u32 4294901760, %v11751_v34 }
 0x10d   : > { %8741 = vmatmul.mubr.f32.gmra.mrb[114].mxu0 %v1937_v48  ;;  %8101 = vmatprep.mubr.f32.mxu1 %v1949_v51  ;;  %v11753_v48 = vand.u32 4294901760, %v703_v20  ;;  %v2008_v51 = vsub.f32 %v11726_v16, %v2007_v15  ;;  %v13558_v16 = vld [vmem:[#allocation92_spill] sm:$0xff] }
 0x10e   : > { %8743 = vmatprep.mubr.f32.mxu0 %v1947_v33  ;;  %v11758_v33 = vsub.f32 %v700_v37, %v11745_v3 }
 0x10f   : > { %13515 = vst [vmem:[#allocation242_spill] sm:$0xff] %v11753_v48  ;;  %v11763_v44 = vsub.f32 %v703_v20, %v11753_v48 }
 0x110   : > { %8102 = vmatmul.mubr.f32.gmra.mrb[116].mxu1 %v1959_v56  ;;  %13516 = vst [vmem:[#allocation243_spill] sm:$0xff] %v11758_v33  ;;  %v2018_v56 = vsub.f32 %v11737_v13, %v2017_v19  ;;  %v2047_v39 = vand.u32 4294901760, %v11758_v33  ;;  %v13557_v13 = vld [vmem:[#allocation91_spill] sm:$0xff] }
 0x111   : > { %8744 = vmatmul.mubr.f32.gmra.mrb[116].mxu0 %v1957_v6  ;;  %8104 = vmatprep.mubr.f32.mxu1 %v1969_v55  ;;  %13517 = vst [vmem:[#allocation244_spill] sm:$0xff] %v11763_v44  ;;  %v2009_v6 = vand.u32 4294901760, %v2008_v51  ;;  %v2028_v55 = vsub.f32 %v11743_v7, %v2027_v9  ;;  %v13556_v7 = vld [vmem:[#allocation89_spill] sm:$0xff] }
 0x112   : > { %8746 = vmatprep.mubr.f32.mxu0 %v1967_v57  ;;  %v2019_v37 = vand.u32 4294901760, %v2018_v56  ;;  %v2038_v57 = vsub.f32 %v11751_v34, %v2037_v40  ;;  %v2048_v20 = vsub.f32 %v11758_v33, %v2047_v39  ;;  %v13532_v56 = vld [vmem:[#allocation41_spill] sm:$0xff]  ;;  %v13554_v33 = vld [vmem:[#allocation84_spill] sm:$0xff]  ;;  %v13555_v34 = vld [vmem:[#allocation86_spill] sm:$0xff] }
 0x113   : > { %v2029_v31 = vand.u32 4294901760, %v2028_v55  ;;  %v13537_v55 = vld [vmem:[#allocation49_spill] sm:$0xff] }
 0x114   : > { %8105 = vmatmul.mubr.f32.gmra.mrb[118].mxu1 %v1979_v63  ;;  %v2057_v63 = vand.u32 4294901760, %v11763_v44  ;;  %v2049_v51 = vand.u32 4294901760, %v2048_v20  ;;  %v13544_v20 = vld [vmem:[#allocation64_spill] sm:$0xff] }
 0x115   : > { %8747 = vmatmul.mubr.f32.gmra.mrb[118].mxu0 %v1977_v38  ;;  %8107 = vmatprep.mubr.f32.mxu1 %v1989_v10  ;;  %v2039_v38 = vand.u32 4294901760, %v2038_v57  ;;  %v13541_v57 = vld [vmem:[#allocation58_spill] sm:$0xff] }
 0x116   : > { %8749 = vmatprep.mubr.f32.mxu0 %v1987_v28  ;;  %v2058_v10 = vsub.f32 %v11763_v44, %v2057_v63  ;;  %v13553_v44 = vld [vmem:[#allocation83_spill] sm:$0xff] }
 0x118   : > { %8108 = vmatmul.mubr.f32.gmra.mrb[120].mxu1 %v1999_v53  ;;  %v2059_v28 = vand.u32 4294901760, %v2058_v10  ;;  %v13531_v53 = vld [vmem:[#allocation38_spill] sm:$0xff]  ;;  %v13546_v10 = vld [vmem:[#allocation69_spill] sm:$0xff] }
 0x119   : > { %8750 = vmatmul.mubr.f32.gmra.mrb[120].mxu0 %v1997_v58  ;;  %8110 = vmatprep.mubr.f32.mxu1 %v2009_v6  ;;  %v9233_v58 = vpack.c.bf16 %v10244_v41, %v10233_v35  ;;  %v13521_v35 = vld [vmem:[#allocation17_spill] sm:$0xff]  ;;  %v13523_v41 = vld [vmem:[#allocation22_spill] sm:$0xff]  ;;  %v13536_v6 = vld [vmem:[#allocation48_spill] sm:$0xff] }
 0x11a   : > { %8752 = vmatprep.mubr.f32.mxu0 %v2007_v15  ;;  %v9245_v15 = vpack.c.bf16 %v11110_v22, %v11103_v27  ;;  %v13534_v27 = vld [vmem:[#allocation43_spill] sm:$0xff] }
 0x11b   : > { %v13535_v22 = vld [vmem:[#allocation47_spill] sm:$0xff] }
 0x11c   : > { %8111 = vmatmul.mubr.f32.gmra.mrb[122].mxu1 %v2019_v37  ;;  %v13540_v37 = vld [vmem:[#allocation56_spill] sm:$0xff] }
 0x11d   : > { %8753 = vmatmul.mubr.f32.gmra.mrb[122].mxu0 %v2017_v19  ;;  %8113 = vmatprep.mubr.f32.mxu1 %v2029_v31  ;;  %v13530_v19 = vld [vmem:[#allocation37_spill] sm:$0xff]  ;;  %v13543_v31 = vld [vmem:[#allocation63_spill] sm:$0xff] }
 0x11e   : > { %8755 = vmatprep.mubr.f32.mxu0 %v2027_v9  ;;  %v9237_v9 = vpack.c.bf16 %v10629_v60, %v10621_v52  ;;  %v13524_v52 = vld [vmem:[#allocation24_spill] sm:$0xff] }
 0x11f   : > { %v13526_v60 = vld [vmem:[#allocation28_spill] sm:$0xff] }
 0x120   : > { %8114 = vmatmul.mubr.f32.gmra.mrb[124].mxu1 %v2039_v38  ;;  %v13545_v38 = vld [vmem:[#allocation68_spill] sm:$0xff] }
 0x121   : > { %8756 = vmatmul.mubr.f32.gmra.mrb[124].mxu0 %v2037_v40  ;;  %8116 = vmatprep.mubr.f32.mxu1 %v2049_v51  ;;  %v13533_v40 = vld [vmem:[#allocation42_spill] sm:$0xff]  ;;  %v13547_v51 = vld [vmem:[#allocation72_spill] sm:$0xff] }
 0x122   : > { %8758 = vmatprep.mubr.f32.mxu0 %v2047_v39  ;;  %v13538_v39 = vld [vmem:[#allocation53_spill] sm:$0xff] }
 0x124   : > { %8117 = vmatmul.mubr.f32.gmra.mrb[126].mxu1 %v2059_v28  ;;  %v13548_v28 = vld [vmem:[#allocation73_spill] sm:$0xff] }
 0x125   : > { %8759 = vmatmul.mubr.f32.gmra.mrb[126].mxu0 %v2057_v63  ;;  %8141 = vmatprep.mubr.f32.mxu1 %v10246_v42  ;;  %v13542_v63 = vld [vmem:[#allocation60_spill] sm:$0xff] }
 0x126   : > { %8783 = vmatprep.mubr.f32.mxu0 %v10246_v42 }
 0x128   : > { %8142 = vmatmul.mubr.f32.vlgmr.msra.gmra.mrb[0].mxu1 %v10248_v43 }
 0x129   : > { %8784 = vmatmul.mubr.f32.vlgmr.msra.gmra.mrb[0].mxu0 %v10248_v43  ;;  %9232 = vmatpush3.bf16.msra.mxu1 %v11502_v26  ;;  %v13529_v26 = vld [vmem:[#allocation32_spill] sm:$0xff] }
 0x12a   : > { %8144 = vmatprep.mubr.f32.mxu1 %v10255_v49  ;;  %8786 = vmatprep.mubr.f32.mxu0 %v10255_v49 }
 0x12b   : > { %9292 = vmatpush3.bf16.msra.mxu0 %v10153_v11  ;;  %9234 = vmatprep.subr.bf16.mxu1 %v9233_v58  ;;  %v9241_v11 = vpack.c.bf16 %v10905_v21, %v10885_v47  ;;  %v13527_v47 = vld [vmem:[#allocation30_spill] sm:$0xff]  ;;  %v13528_v21 = vld [vmem:[#allocation31_spill] sm:$0xff] }
 0x12c   : > { %8145 = vmatmul.mubr.f32.gmra.mrb[2].mxu1 %v10257_v50  ;;  %9294 = vmatprep.subr.bf16.mxu0 %v10172_v17 }
 0x12d   : > { %8787 = vmatmul.mubr.f32.gmra.mrb[2].mxu0 %v10257_v50  ;;  %8147 = vmatprep.mubr.f32.mxu1 %v10268_v54 }
 0x12e   : > { %8789 = vmatprep.mubr.f32.mxu0 %v10268_v54  ;;  %9236 = vmatpush3.bf16.msra.mxu1 %v9233_v58  ;;  %v13549_v58 = vld [vmem:[#allocation75_spill] sm:$0xff] }
 0x12f   : > { %9296 = vmatpush3.bf16.msra.mxu0 %v10172_v17  ;;  %9238 = vmatprep.subr.bf16.mxu1 %v9237_v9  ;;  %v13518_v17 = vld [vmem:[#allocation11_spill] sm:$0xff] }
 0x130   : > { %8148 = vmatmul.mubr.f32.gmra.mrb[4].mxu1 %v10280_v59  ;;  %9298 = vmatprep.subr.bf16.mxu0 %v10194_v24 }
 0x131   : > { %8790 = vmatmul.mubr.f32.gmra.mrb[4].mxu0 %v10280_v59  ;;  %8150 = vmatprep.mubr.f32.mxu1 %v10288_v0 }
 0x132   : > { %8792 = vmatprep.mubr.f32.mxu0 %v10288_v0  ;;  %9240 = vmatpush3.bf16.msra.mxu1 %v9237_v9  ;;  %v13550_v9 = vld [vmem:[#allocation77_spill] sm:$0xff] }
 0x133   : > { %9300 = vmatpush3.bf16.msra.mxu0 %v10194_v24  ;;  %9242 = vmatprep.subr.bf16.mxu1 %v9241_v11  ;;  %v13519_v24 = vld [vmem:[#allocation13_spill] sm:$0xff] }
 0x134   : > { %8151 = vmatmul.mubr.f32.gmra.mrb[6].mxu1 %v10308_v32  ;;  %9302 = vmatprep.subr.bf16.mxu0 %v10220_v29 }
 0x135   : > { %8793 = vmatmul.mubr.f32.gmra.mrb[6].mxu0 %v10308_v32  ;;  %8153 = vmatprep.mubr.f32.mxu1 %v10343_v1 }
 0x136   : > { %8795 = vmatprep.mubr.f32.mxu0 %v10343_v1  ;;  %9244 = vmatpush3.bf16.msra.mxu1 %v9241_v11  ;;  %v13551_v11 = vld [vmem:[#allocation78_spill] sm:$0xff] }
 0x137   : > { %9304 = vmatpush3.bf16.msra.mxu0 %v10220_v29  ;;  %v13520_v29 = vld [vmem:[#allocation16_spill] sm:$0xff]  ;;  %9246 = vmatprep.subr.bf16.mxu1 %v9245_v15 }
 0x138   : > { %8154 = vmatmul.mubr.f32.gmra.mrb[8].mxu1 %v10345_v5  ;;  %9306 = vmatprep.subr.bf16.mxu0 %v10226_v30 }
 0x139   : > { %8796 = vmatmul.mubr.f32.gmra.mrb[8].mxu0 %v10345_v5  ;;  %8156 = vmatprep.mubr.f32.mxu1 %v10356_v4 }
 0x13a   : > { %8798 = vmatprep.mubr.f32.mxu0 %v10356_v4  ;;  %9248 = vmatpush3.bf16.msra.mxu1 %v9245_v15  ;;  %v13552_v15 = vld [vmem:[#allocation81_spill] sm:$0xff] }
 0x13b   : > { %9308 = vmatpush3.bf16.msra.mxu0 %v10226_v30  ;;  %v13522_v30 = vld [vmem:[#allocation21_spill] sm:$0xff]  ;;  %8353 = vmatprep.subr.mxu1 %v11317_v8 }
 0x13c   : > { %8157 = vmatmul.mubr.f32.gmra.mrb[10].mxu1 %v13518_v17  ;;  %8995 = vmatprep.subr.mxu0 %v10305_v25 }
 0x13d   : > { %8799 = vmatmul.mubr.f32.gmra.mrb[10].mxu0 %v13518_v17  ;;  %8159 = vmatprep.mubr.f32.mxu1 %v13519_v24 }
 0x13e   : > { %8801 = vmatprep.mubr.f32.mxu0 %v13519_v24  ;;  %8354 = vmatpush3.msra.mxu1 %v11317_v8  ;;  %v13539_v8 = vld [vmem:[#allocation54_spill] sm:$0xff] }
 0x13f   : > { %8996 = vmatpush3.msra.mxu0 %v10305_v25  ;;  %v13525_v25 = vld [vmem:[#allocation25_spill] sm:$0xff] }
 0x140   : > { %8160 = vmatmul.mubr.f32.gmra.mrb[12].mxu1 %v13520_v29 }
 0x141   : > { %8802 = vmatmul.mubr.f32.gmra.mrb[12].mxu0 %v13520_v29  ;;  %8162 = vmatprep.mubr.f32.mxu1 %v13521_v35 }
 0x142   : > { %8804 = vmatprep.mubr.f32.mxu0 %v13521_v35 }
 0x144   : > { %8163 = vmatmul.mubr.f32.gmra.mrb[14].mxu1 %v13522_v30 }
 0x145   : > { %8805 = vmatmul.mubr.f32.gmra.mrb[14].mxu0 %v13522_v30  ;;  %8165 = vmatprep.mubr.f32.mxu1 %v13523_v41 }
 0x146   : > { %8807 = vmatprep.mubr.f32.mxu0 %v13523_v41 }
 0x148   : > { %8166 = vmatmul.mubr.f32.gmra.mrb[16].mxu1 %v13524_v52 }
 0x149   : > { %8808 = vmatmul.mubr.f32.gmra.mrb[16].mxu0 %v13524_v52  ;;  %8168 = vmatprep.mubr.f32.mxu1 %v13525_v25 }
 0x14a   : > { %8810 = vmatprep.mubr.f32.mxu0 %v13525_v25 }
 0x14c   : > { %8169 = vmatmul.mubr.f32.gmra.mrb[18].mxu1 %v13526_v60 }
 0x14d   : > { %8811 = vmatmul.mubr.f32.gmra.mrb[18].mxu0 %v13526_v60  ;;  %8171 = vmatprep.mubr.f32.mxu1 %v13527_v47 }
 0x14e   : > { %8813 = vmatprep.mubr.f32.mxu0 %v13527_v47 }
 0x150   : > { %8172 = vmatmul.mubr.f32.gmra.mrb[20].mxu1 %v13528_v21 }
 0x151   : > { %8814 = vmatmul.mubr.f32.gmra.mrb[20].mxu0 %v13528_v21  ;;  %8174 = vmatprep.mubr.f32.mxu1 %v13529_v26 }
 0x152   : > { %8816 = vmatprep.mubr.f32.mxu0 %v13529_v26 }
 0x154   : > { %8175 = vmatmul.mubr.f32.gmra.mrb[22].mxu1 %v13530_v19 }
 0x155   : > { %8817 = vmatmul.mubr.f32.gmra.mrb[22].mxu0 %v13530_v19  ;;  %8177 = vmatprep.mubr.f32.mxu1 %v13531_v53 }
 0x156   : > { %8819 = vmatprep.mubr.f32.mxu0 %v13531_v53 }
 0x158   : > { %8178 = vmatmul.mubr.f32.gmra.mrb[24].mxu1 %v13532_v56 }
 0x159   : > { %8820 = vmatmul.mubr.f32.gmra.mrb[24].mxu0 %v13532_v56  ;;  %8180 = vmatprep.mubr.f32.mxu1 %v13533_v40 }
 0x15a   : > { %8822 = vmatprep.mubr.f32.mxu0 %v13533_v40 }
 0x15c   : > { %8181 = vmatmul.mubr.f32.gmra.mrb[26].mxu1 %v13534_v27 }
 0x15d   : > { %8823 = vmatmul.mubr.f32.gmra.mrb[26].mxu0 %v13534_v27  ;;  %8183 = vmatprep.mubr.f32.mxu1 %v13535_v22 }
 0x15e   : > { %8825 = vmatprep.mubr.f32.mxu0 %v13535_v22 }
 0x160   : > { %8184 = vmatmul.mubr.f32.gmra.mrb[28].mxu1 %v13536_v6 }
 0x161   : > { %8826 = vmatmul.mubr.f32.gmra.mrb[28].mxu0 %v13536_v6  ;;  %8186 = vmatprep.mubr.f32.mxu1 %v13537_v55 }
 0x162   : > { %8828 = vmatprep.mubr.f32.mxu0 %v13537_v55 }
 0x164   : > { %8187 = vmatmul.mubr.f32.gmra.mrb[30].mxu1 %v13538_v39 }
 0x165   : > { %8829 = vmatmul.mubr.f32.gmra.mrb[30].mxu0 %v13538_v39  ;;  %8189 = vmatprep.mubr.f32.mxu1 %v13539_v8 }
 0x166   : > { %8831 = vmatprep.mubr.f32.mxu0 %v13539_v8 }
 0x168   : > { %8190 = vmatmul.mubr.f32.gmra.mrb[32].mxu1 %v13540_v37 }
 0x169   : > { %8832 = vmatmul.mubr.f32.gmra.mrb[32].mxu0 %v13540_v37  ;;  %8192 = vmatprep.mubr.f32.mxu1 %v13541_v57 }
 0x16a   : > { %8834 = vmatprep.mubr.f32.mxu0 %v13541_v57 }
 0x16c   : > { %8193 = vmatmul.mubr.f32.gmra.mrb[34].mxu1 %v13542_v63 }
 0x16d   : > { %8835 = vmatmul.mubr.f32.gmra.mrb[34].mxu0 %v13542_v63  ;;  %8195 = vmatprep.mubr.f32.mxu1 %v10696_v23 }
 0x16e   : > { %8837 = vmatprep.mubr.f32.mxu0 %v10696_v23 }
 0x170   : > { %8196 = vmatmul.mubr.f32.gmra.mrb[36].mxu1 %v13543_v31 }
 0x171   : > { %8838 = vmatmul.mubr.f32.gmra.mrb[36].mxu0 %v13543_v31  ;;  %8198 = vmatprep.mubr.f32.mxu1 %v13544_v20 }
 0x172   : > { %8840 = vmatprep.mubr.f32.mxu0 %v13544_v20 }
 0x174   : > { %8199 = vmatmul.mubr.f32.gmra.mrb[38].mxu1 %v13545_v38 }
 0x175   : > { %8841 = vmatmul.mubr.f32.gmra.mrb[38].mxu0 %v13545_v38  ;;  %8201 = vmatprep.mubr.f32.mxu1 %v13546_v10 }
 0x176   : > { %8843 = vmatprep.mubr.f32.mxu0 %v13546_v10 }
 0x178   : > { %8202 = vmatmul.mubr.f32.gmra.mrb[40].mxu1 %v13547_v51 }
 0x179   : > { %8844 = vmatmul.mubr.f32.gmra.mrb[40].mxu0 %v13547_v51  ;;  %8204 = vmatprep.mubr.f32.mxu1 %v13548_v28 }
 0x17a   : > { %8846 = vmatprep.mubr.f32.mxu0 %v13548_v28 }
 0x17c   : > { %8205 = vmatmul.mubr.f32.gmra.mrb[42].mxu1 %v13549_v58 }
 0x17d   : > { %8847 = vmatmul.mubr.f32.gmra.mrb[42].mxu0 %v13549_v58  ;;  %8207 = vmatprep.mubr.f32.mxu1 %v13550_v9 }
 0x17e   : > { %8849 = vmatprep.mubr.f32.mxu0 %v13550_v9 }
 0x180   : > { %8208 = vmatmul.mubr.f32.gmra.mrb[44].mxu1 %v13551_v11 }
 0x181   : > { %8850 = vmatmul.mubr.f32.gmra.mrb[44].mxu0 %v13551_v11  ;;  %8210 = vmatprep.mubr.f32.mxu1 %v13552_v15 }
 0x182   : > { %8852 = vmatprep.mubr.f32.mxu0 %v13552_v15 }
 0x184   : > { %8211 = vmatmul.mubr.f32.gmra.mrb[46].mxu1 %v13553_v44 }
 0x185   : > { %8853 = vmatmul.mubr.f32.gmra.mrb[46].mxu0 %v13553_v44  ;;  %8213 = vmatprep.mubr.f32.mxu1 %v13554_v33 }
 0x186   : > { %8855 = vmatprep.mubr.f32.mxu0 %v13554_v33  ;;  %v13560_v33 = vld [vmem:[#allocation97_spill] sm:$0xff] }
 0x188   : > { %8214 = vmatmul.mubr.f32.gmra.mrb[48].mxu1 %v13555_v34 }
 0x189   : > { %8856 = vmatmul.mubr.f32.gmra.mrb[48].mxu0 %v13555_v34  ;;  %8216 = vmatprep.mubr.f32.mxu1 %v13556_v7  ;;  %v13561_v34 = vld [vmem:[#allocation98_spill] sm:$0xff] }
 0x18a   : > { %8858 = vmatprep.mubr.f32.mxu0 %v13556_v7  ;;  %v13562_v7 = vld [vmem:[#allocation101_spill] sm:$0xff] }
 0x18c   : > { %8217 = vmatmul.mubr.f32.gmra.mrb[50].mxu1 %v13557_v13 }
 0x18d   : > { %8859 = vmatmul.mubr.f32.gmra.mrb[50].mxu0 %v13557_v13  ;;  %8219 = vmatprep.mubr.f32.mxu1 %v13558_v16  ;;  %v13563_v13 = vld [vmem:[#allocation103_spill] sm:$0xff] }
 0x18e   : > { %8861 = vmatprep.mubr.f32.mxu0 %v13558_v16  ;;  %v13564_v16 = vld [vmem:[#allocation105_spill] sm:$0xff] }
 0x190   : > { %8220 = vmatmul.mubr.f32.gmra.mrb[52].mxu1 %v13559_v14 }
 0x191   : > { %8862 = vmatmul.mubr.f32.gmra.mrb[52].mxu0 %v13559_v14  ;;  %8222 = vmatprep.mubr.f32.mxu1 %v13560_v33  ;;  %v13565_v14 = vld [vmem:[#allocation106_spill] sm:$0xff] }
 0x192   : > { %8864 = vmatprep.mubr.f32.mxu0 %v13560_v33  ;;  %v13566_v33 = vld [vmem:[#allocation108_spill] sm:$0xff] }
 0x194   : > { %8223 = vmatmul.mubr.f32.gmra.mrb[54].mxu1 %v13561_v34 }
 0x195   : > { %8865 = vmatmul.mubr.f32.gmra.mrb[54].mxu0 %v13561_v34  ;;  %8225 = vmatprep.mubr.f32.mxu1 %v13562_v7  ;;  %v13567_v34 = vld [vmem:[#allocation111_spill] sm:$0xff] }
 0x196   : > { %8867 = vmatprep.mubr.f32.mxu0 %v13562_v7  ;;  %v13568_v7 = vld [vmem:[#allocation113_spill] sm:$0xff] }
 0x198   : > { %8226 = vmatmul.mubr.f32.gmra.mrb[56].mxu1 %v13563_v13 }
 0x199   : > { %8868 = vmatmul.mubr.f32.gmra.mrb[56].mxu0 %v13563_v13  ;;  %8228 = vmatprep.mubr.f32.mxu1 %v13564_v16  ;;  %v13569_v13 = vld [vmem:[#allocation114_spill] sm:$0xff] }
 0x19a   : > { %8870 = vmatprep.mubr.f32.mxu0 %v13564_v16  ;;  %v13570_v16 = vld [vmem:[#allocation118_spill] sm:$0xff] }
 0x19c   : > { %8229 = vmatmul.mubr.f32.gmra.mrb[58].mxu1 %v13565_v14 }
 0x19d   : > { %8871 = vmatmul.mubr.f32.gmra.mrb[58].mxu0 %v13565_v14  ;;  %8231 = vmatprep.mubr.f32.mxu1 %v13566_v33  ;;  %v13571_v14 = vld [vmem:[#allocation119_spill] sm:$0xff] }
 0x19e   : > { %8873 = vmatprep.mubr.f32.mxu0 %v13566_v33  ;;  %v13572_v33 = vld [vmem:[#allocation120_spill] sm:$0xff] }
 0x1a0   : > { %8232 = vmatmul.mubr.f32.gmra.mrb[60].mxu1 %v13567_v34 }
 0x1a1   : > { %8874 = vmatmul.mubr.f32.gmra.mrb[60].mxu0 %v13567_v34  ;;  %8234 = vmatprep.mubr.f32.mxu1 %v13568_v7  ;;  %v13573_v34 = vld [vmem:[#allocation124_spill] sm:$0xff] }
 0x1a2   : > { %8876 = vmatprep.mubr.f32.mxu0 %v13568_v7  ;;  %v13574_v7 = vld [vmem:[#allocation125_spill] sm:$0xff] }
 0x1a4   : > { %8235 = vmatmul.mubr.f32.gmra.mrb[62].mxu1 %v13569_v13 }
 0x1a5   : > { %8877 = vmatmul.mubr.f32.gmra.mrb[62].mxu0 %v13569_v13  ;;  %8237 = vmatprep.mubr.f32.mxu1 %v13570_v16  ;;  %v13575_v13 = vld [vmem:[#allocation127_spill] sm:$0xff] }
 0x1a6   : > { %8879 = vmatprep.mubr.f32.mxu0 %v13570_v16  ;;  %v13576_v16 = vld [vmem:[#allocation128_spill] sm:$0xff] }
 0x1a8   : > { %8238 = vmatmul.mubr.f32.gmra.mrb[64].mxu1 %v13571_v14 }
 0x1a9   : > { %8880 = vmatmul.mubr.f32.gmra.mrb[64].mxu0 %v13571_v14  ;;  %8240 = vmatprep.mubr.f32.mxu1 %v13572_v33 }
 0x1aa   : > { %8882 = vmatprep.mubr.f32.mxu0 %v13572_v33 }
 0x1ac   : > { %8241 = vmatmul.mubr.f32.gmra.mrb[66].mxu1 %v13573_v34 }
 0x1ad   : > { %8883 = vmatmul.mubr.f32.gmra.mrb[66].mxu0 %v13573_v34  ;;  %8243 = vmatprep.mubr.f32.mxu1 %v13574_v7  ;;  %v13577_v34 = vld [vmem:[#allocation134_spill] sm:$0xff] }
 0x1ae   : > { %8885 = vmatprep.mubr.f32.mxu0 %v13574_v7  ;;  %v13578_v7 = vld [vmem:[#allocation137_spill] sm:$0xff] }
 0x1b0   : > { %8244 = vmatmul.mubr.f32.gmra.mrb[68].mxu1 %v13575_v13 }
 0x1b1   : > { %8886 = vmatmul.mubr.f32.gmra.mrb[68].mxu0 %v13575_v13  ;;  %8246 = vmatprep.mubr.f32.mxu1 %v13576_v16  ;;  %v13579_v13 = vld [vmem:[#allocation139_spill] sm:$0xff] }
 0x1b2   : > { %8888 = vmatprep.mubr.f32.mxu0 %v13576_v16  ;;  %v13580_v16 = vld [vmem:[#allocation141_spill] sm:$0xff] }
 0x1b4   : > { %8247 = vmatmul.mubr.f32.gmra.mrb[70].mxu1 %v11132_v61 }
 0x1b5   : > { %8889 = vmatmul.mubr.f32.gmra.mrb[70].mxu0 %v11132_v61  ;;  %8249 = vmatprep.mubr.f32.mxu1 %v11147_v62  ;;  %v13581_v61 = vld [vmem:[#allocation142_spill] sm:$0xff] }
 0x1b6   : > { %8891 = vmatprep.mubr.f32.mxu0 %v11147_v62  ;;  %v13582_v62 = vld [vmem:[#allocation143_spill] sm:$0xff] }
 0x1b8   : > { %8250 = vmatmul.mubr.f32.gmra.mrb[72].mxu1 %v13577_v34 }
 0x1b9   : > { %8892 = vmatmul.mubr.f32.gmra.mrb[72].mxu0 %v13577_v34  ;;  %8252 = vmatprep.mubr.f32.mxu1 %v13578_v7  ;;  %v13583_v34 = vld [vmem:[#allocation148_spill] sm:$0xff] }
 0x1ba   : > { %8894 = vmatprep.mubr.f32.mxu0 %v13578_v7  ;;  %v13584_v7 = vld [vmem:[#allocation149_spill] sm:$0xff] }
 0x1bc   : > { %8253 = vmatmul.mubr.f32.gmra.mrb[74].mxu1 %v13579_v13 }
 0x1bd   : > { %8895 = vmatmul.mubr.f32.gmra.mrb[74].mxu0 %v13579_v13  ;;  %8255 = vmatprep.mubr.f32.mxu1 %v13580_v16  ;;  %v13585_v13 = vld [vmem:[#allocation150_spill] sm:$0xff] }
 0x1be   : > { %8897 = vmatprep.mubr.f32.mxu0 %v13580_v16  ;;  %v13586_v16 = vld [vmem:[#allocation153_spill] sm:$0xff] }
 0x1c0   : > { %8256 = vmatmul.mubr.f32.gmra.mrb[76].mxu1 %v13581_v61 }
 0x1c1   : > { %8898 = vmatmul.mubr.f32.gmra.mrb[76].mxu0 %v13581_v61  ;;  %8258 = vmatprep.mubr.f32.mxu1 %v13582_v62  ;;  %v13587_v61 = vld [vmem:[#allocation155_spill] sm:$0xff] }
 0x1c2   : > { %8900 = vmatprep.mubr.f32.mxu0 %v13582_v62  ;;  %v13588_v62 = vld [vmem:[#allocation157_spill] sm:$0xff] }
 0x1c4   : > { %8259 = vmatmul.mubr.f32.gmra.mrb[78].mxu1 %v13583_v34 }
 0x1c5   : > { %8901 = vmatmul.mubr.f32.gmra.mrb[78].mxu0 %v13583_v34  ;;  %8261 = vmatprep.mubr.f32.mxu1 %v13584_v7  ;;  %v13589_v34 = vld [vmem:[#allocation159_spill] sm:$0xff] }
 0x1c6   : > { %8903 = vmatprep.mubr.f32.mxu0 %v13584_v7 }
 0x1c8   : > { %8262 = vmatmul.mubr.f32.gmra.mrb[80].mxu1 %v13585_v13 }
 0x1c9   : > { %8904 = vmatmul.mubr.f32.gmra.mrb[80].mxu0 %v13585_v13  ;;  %8264 = vmatprep.mubr.f32.mxu1 %v13586_v16  ;;  %v13590_v13 = vld [vmem:[#allocation162_spill] sm:$0xff] }
 0x1ca   : > { %8906 = vmatprep.mubr.f32.mxu0 %v13586_v16  ;;  %v13591_v16 = vld [vmem:[#allocation164_spill] sm:$0xff] }
 0x1cc   : > { %8265 = vmatmul.mubr.f32.gmra.mrb[82].mxu1 %v13587_v61 }
 0x1cd   : > { %8907 = vmatmul.mubr.f32.gmra.mrb[82].mxu0 %v13587_v61  ;;  %8267 = vmatprep.mubr.f32.mxu1 %v13588_v62  ;;  %v13592_v61 = vld [vmem:[#allocation167_spill] sm:$0xff] }
 0x1ce   : > { %8909 = vmatprep.mubr.f32.mxu0 %v13588_v62  ;;  %v13593_v62 = vld [vmem:[#allocation169_spill] sm:$0xff] }
 0x1d0   : > { %8268 = vmatmul.mubr.f32.gmra.mrb[84].mxu1 %v13589_v34 }
 0x1d1   : > { %8910 = vmatmul.mubr.f32.gmra.mrb[84].mxu0 %v13589_v34  ;;  %8270 = vmatprep.mubr.f32.mxu1 %v11311_v12  ;;  %v13594_v34 = vld [vmem:[#allocation171_spill] sm:$0xff] }
 0x1d2   : > { %8912 = vmatprep.mubr.f32.mxu0 %v11311_v12  ;;  %v13595_v12 = vld [vmem:[#allocation172_spill] sm:$0xff] }
 0x1d4   : > { %8271 = vmatmul.mubr.f32.gmra.mrb[86].mxu1 %v13590_v13 }
 0x1d5   : > { %8913 = vmatmul.mubr.f32.gmra.mrb[86].mxu0 %v13590_v13  ;;  %8273 = vmatprep.mubr.f32.mxu1 %v13591_v16  ;;  %v13596_v13 = vld [vmem:[#allocation175_spill] sm:$0xff] }
 0x1d6   : > { %8915 = vmatprep.mubr.f32.mxu0 %v13591_v16  ;;  %v13597_v16 = vld [vmem:[#allocation177_spill] sm:$0xff] }
 0x1d8   : > { %8274 = vmatmul.mubr.f32.gmra.mrb[88].mxu1 %v13592_v61 }
 0x1d9   : > { %8916 = vmatmul.mubr.f32.gmra.mrb[88].mxu0 %v13592_v61  ;;  %8276 = vmatprep.mubr.f32.mxu1 %v13593_v62  ;;  %v13598_v61 = vld [vmem:[#allocation179_spill] sm:$0xff] }
 0x1da   : > { %8918 = vmatprep.mubr.f32.mxu0 %v13593_v62  ;;  %v13599_v62 = vld [vmem:[#allocation181_spill] sm:$0xff] }
 0x1dc   : > { %8277 = vmatmul.mubr.f32.gmra.mrb[90].mxu1 %v13594_v34 }
 0x1dd   : > { %8919 = vmatmul.mubr.f32.gmra.mrb[90].mxu0 %v13594_v34  ;;  %8279 = vmatprep.mubr.f32.mxu1 %v13595_v12  ;;  %v13600_v34 = vld [vmem:[#allocation182_spill] sm:$0xff] }
 0x1de   : > { %8921 = vmatprep.mubr.f32.mxu0 %v13595_v12  ;;  %v13601_v12 = vld [vmem:[#allocation184_spill] sm:$0xff] }
 0x1e0   : > { %8280 = vmatmul.mubr.f32.gmra.mrb[92].mxu1 %v13596_v13 }
 0x1e1   : > { %8922 = vmatmul.mubr.f32.gmra.mrb[92].mxu0 %v13596_v13  ;;  %8282 = vmatprep.mubr.f32.mxu1 %v13597_v16  ;;  %v13602_v13 = vld [vmem:[#allocation187_spill] sm:$0xff] }
 0x1e2   : > { %8924 = vmatprep.mubr.f32.mxu0 %v13597_v16  ;;  %v13603_v16 = vld [vmem:[#allocation189_spill] sm:$0xff] }
 0x1e4   : > { %8283 = vmatmul.mubr.f32.gmra.mrb[94].mxu1 %v13598_v61 }
 0x1e5   : > { %8925 = vmatmul.mubr.f32.gmra.mrb[94].mxu0 %v13598_v61  ;;  %8285 = vmatprep.mubr.f32.mxu1 %v13599_v62  ;;  %v13604_v61 = vld [vmem:[#allocation191_spill] sm:$0xff] }
 0x1e6   : > { %8927 = vmatprep.mubr.f32.mxu0 %v13599_v62  ;;  %v13605_v62 = vld [vmem:[#allocation192_spill] sm:$0xff] }
 0x1e8   : > { %8286 = vmatmul.mubr.f32.gmra.mrb[96].mxu1 %v13600_v34 }
 0x1e9   : > { %8928 = vmatmul.mubr.f32.gmra.mrb[96].mxu0 %v13600_v34  ;;  %8288 = vmatprep.mubr.f32.mxu1 %v13601_v12  ;;  %v13606_v34 = vld [vmem:[#allocation195_spill] sm:$0xff] }
 0x1ea   : > { %8930 = vmatprep.mubr.f32.mxu0 %v13601_v12  ;;  %v13607_v12 = vld [vmem:[#allocation197_spill] sm:$0xff] }
 0x1ec   : > { %8289 = vmatmul.mubr.f32.gmra.mrb[98].mxu1 %v13602_v13 }
 0x1ed   : > { %8931 = vmatmul.mubr.f32.gmra.mrb[98].mxu0 %v13602_v13  ;;  %8291 = vmatprep.mubr.f32.mxu1 %v13603_v16  ;;  %v13608_v13 = vld [vmem:[#allocation199_spill] sm:$0xff] }
 0x1ee   : > { %8933 = vmatprep.mubr.f32.mxu0 %v13603_v16  ;;  %v13609_v16 = vld [vmem:[#allocation201_spill] sm:$0xff] }
 0x1f0   : > { %8292 = vmatmul.mubr.f32.gmra.mrb[100].mxu1 %v13604_v61 }
 0x1f1   : > { %8934 = vmatmul.mubr.f32.gmra.mrb[100].mxu0 %v13604_v61  ;;  %8294 = vmatprep.mubr.f32.mxu1 %v13605_v62  ;;  %v13610_v61 = vld [vmem:[#allocation202_spill] sm:$0xff] }
 0x1f2   : > { %8936 = vmatprep.mubr.f32.mxu0 %v13605_v62  ;;  %v13611_v62 = vld [vmem:[#allocation204_spill] sm:$0xff] }
 0x1f4   : > { %8295 = vmatmul.mubr.f32.gmra.mrb[102].mxu1 %v13606_v34 }
 0x1f5   : > { %8937 = vmatmul.mubr.f32.gmra.mrb[102].mxu0 %v13606_v34  ;;  %8297 = vmatprep.mubr.f32.mxu1 %v13607_v12  ;;  %v13612_v34 = vld [vmem:[#allocation207_spill] sm:$0xff] }
 0x1f6   : > { %8939 = vmatprep.mubr.f32.mxu0 %v13607_v12  ;;  %v13613_v12 = vld [vmem:[#allocation209_spill] sm:$0xff] }
 0x1f8   : > { %8298 = vmatmul.mubr.f32.gmra.mrb[104].mxu1 %v13608_v13 }
 0x1f9   : > { %8940 = vmatmul.mubr.f32.gmra.mrb[104].mxu0 %v13608_v13  ;;  %8300 = vmatprep.mubr.f32.mxu1 %v13609_v16  ;;  %v13614_v13 = vld [vmem:[#allocation211_spill] sm:$0xff] }
 0x1fa   : > { %8942 = vmatprep.mubr.f32.mxu0 %v13609_v16  ;;  %v13615_v16 = vld [vmem:[#allocation212_spill] sm:$0xff] }
 0x1fc   : > { %8301 = vmatmul.mubr.f32.gmra.mrb[106].mxu1 %v13610_v61 }
 0x1fd   : > { %8943 = vmatmul.mubr.f32.gmra.mrb[106].mxu0 %v13610_v61  ;;  %8303 = vmatprep.mubr.f32.mxu1 %v13611_v62  ;;  %v13616_v61 = vld [vmem:[#allocation215_spill] sm:$0xff] }
 0x1fe   : > { %8945 = vmatprep.mubr.f32.mxu0 %v13611_v62  ;;  %v13617_v62 = vld [vmem:[#allocation217_spill] sm:$0xff] }
 0x200   : > { %8304 = vmatmul.mubr.f32.gmra.mrb[108].mxu1 %v13612_v34 }
 0x201   : > { %8946 = vmatmul.mubr.f32.gmra.mrb[108].mxu0 %v13612_v34  ;;  %8306 = vmatprep.mubr.f32.mxu1 %v13613_v12  ;;  %v13618_v34 = vld [vmem:[#allocation219_spill] sm:$0xff] }
 0x202   : > { %8948 = vmatprep.mubr.f32.mxu0 %v13613_v12 }
 0x204   : > { %8307 = vmatmul.mubr.f32.gmra.mrb[110].mxu1 %v13614_v13 }
 0x205   : > { %8949 = vmatmul.mubr.f32.gmra.mrb[110].mxu0 %v13614_v13  ;;  %8309 = vmatprep.mubr.f32.mxu1 %v13615_v16  ;;  %v13619_v13 = vld [vmem:[#allocation221_spill] sm:$0xff] }
 0x206   : > { %8951 = vmatprep.mubr.f32.mxu0 %v13615_v16  ;;  %v13620_v16 = vld [vmem:[#allocation223_spill] sm:$0xff] }
 0x208   : > { %8310 = vmatmul.mubr.f32.gmra.mrb[112].mxu1 %v13616_v61 }
 0x209   : > { %8952 = vmatmul.mubr.f32.gmra.mrb[112].mxu0 %v13616_v61  ;;  %8312 = vmatprep.mubr.f32.mxu1 %v13617_v62  ;;  %v13621_v61 = vld [vmem:[#allocation226_spill] sm:$0xff] }
 0x20a   : > { %8954 = vmatprep.mubr.f32.mxu0 %v13617_v62  ;;  %v13622_v62 = vld [vmem:[#allocation228_spill] sm:$0xff] }
 0x20c   : > { %8313 = vmatmul.mubr.f32.gmra.mrb[114].mxu1 %v13618_v34 }
 0x20d   : > { %8955 = vmatmul.mubr.f32.gmra.mrb[114].mxu0 %v13618_v34  ;;  %8315 = vmatprep.mubr.f32.mxu1 %v11651_v46  ;;  %v13623_v34 = vld [vmem:[#allocation230_spill] sm:$0xff] }
 0x20e   : > { %8957 = vmatprep.mubr.f32.mxu0 %v11651_v46 }
 0x210   : > { %8316 = vmatmul.mubr.f32.gmra.mrb[116].mxu1 %v13619_v13 }
 0x211   : > { %8958 = vmatmul.mubr.f32.gmra.mrb[116].mxu0 %v13619_v13  ;;  %8318 = vmatprep.mubr.f32.mxu1 %v13620_v16 }
 0x212   : > { %8960 = vmatprep.mubr.f32.mxu0 %v13620_v16 }
 0x214   : > { %8319 = vmatmul.mubr.f32.gmra.mrb[118].mxu1 %v13621_v61 }
 0x215   : > { %8961 = vmatmul.mubr.f32.gmra.mrb[118].mxu0 %v13621_v61  ;;  %8321 = vmatprep.mubr.f32.mxu1 %v13622_v62 }
 0x216   : > { %8963 = vmatprep.mubr.f32.mxu0 %v13622_v62 }
 0x218   : > { %8322 = vmatmul.mubr.f32.gmra.mrb[120].mxu1 %v13623_v34 }
 0x219   : > { %8964 = vmatmul.mubr.f32.gmra.mrb[120].mxu0 %v13623_v34  ;;  %8324 = vmatprep.mubr.f32.mxu1 %v11710_v45 }
 0x21a   : > { %8966 = vmatprep.mubr.f32.mxu0 %v11710_v45  ;;  %v13624_v45 = vld [vmem:[#allocation2_spill] sm:$0xff] }
 0x21c   : > { %8325 = vmatmul.mubr.f32.gmra.mrb[122].mxu1 %v11723_v36 }
 0x21d   : > { %8967 = vmatmul.mubr.f32.gmra.mrb[122].mxu0 %v11723_v36  ;;  %8327 = vmatprep.mubr.f32.mxu1 %v11728_v2  ;;  %v13625_v36 = vld [vmem:[#allocation3_spill] sm:$0xff] }
 0x21e   : > { %8969 = vmatprep.mubr.f32.mxu0 %v11728_v2  ;;  %v13626_v2 = vld [vmem:[#allocation4_spill] sm:$0xff] }
 0x220   : > { %8328 = vmatmul.mubr.f32.gmra.mrb[124].mxu1 %v11739_v18 }
 0x221   : > { %8970 = vmatmul.mubr.f32.gmra.mrb[124].mxu0 %v11739_v18  ;;  %8330 = vmatprep.mubr.f32.mxu1 %v11745_v3  ;;  %v13627_v18 = vld [vmem:[#allocation5_spill] sm:$0xff] }
 0x222   : > { %8972 = vmatprep.mubr.f32.mxu0 %v11745_v3  ;;  %v13628_v3 = vld [vmem:[#allocation6_spill] sm:$0xff] }
 0x224   : > { %8331 = vmatmul.mubr.f32.gmra.mrb[126].mxu1 %v11753_v48 }
 0x225   : > { %8973 = vmatmul.mubr.f32.gmra.mrb[126].mxu0 %v11753_v48  ;;  %8355 = vmatprep.mubr.f32.mxu1 %v13624_v45  ;;  %v13629_v48 = vld [vmem:[#allocation7_spill] sm:$0xff] }
 0x226   : > { %8997 = vmatprep.mubr.f32.mxu0 %v10246_v42  ;;  %v13630_v42 = vld [vmem:[#allocation8_spill] sm:$0xff]  ;;  %v13641_v45 = vld [vmem:[#allocation27_spill] sm:$0xff] }
 0x228   : > { %8356 = vmatmul.mubr.f32.vlgmr.msra.gmra.mrb[0].mxu1 %v13625_v36  ;;  %v13643_v36 = vld [vmem:[#allocation33_spill] sm:$0xff] }
 0x229   : > { %8998 = vmatmul.mubr.f32.vlgmr.msra.gmra.mrb[0].mxu0 %v10248_v43  ;;  %8358 = vmatprep.mubr.f32.mxu1 %v13626_v2  ;;  %v13631_v43 = vld [vmem:[#allocation9_spill] sm:$0xff] }
 0x22a   : > { %9000 = vmatprep.mubr.f32.mxu0 %v10255_v49  ;;  %v13632_v49 = vld [vmem:[#allocation10_spill] sm:$0xff]  ;;  %v13642_v2 = vld [vmem:[#allocation29_spill] sm:$0xff] }
 0x22c   : > { %8359 = vmatmul.mubr.f32.gmra.mrb[2].mxu1 %v13627_v18  ;;  %v13644_v18 = vld [vmem:[#allocation34_spill] sm:$0xff] }
 0x22d   : > { %9001 = vmatmul.mubr.f32.gmra.mrb[2].mxu0 %v10257_v50  ;;  %8361 = vmatprep.mubr.f32.mxu1 %v13628_v3  ;;  %v13633_v50 = vld [vmem:[#allocation12_spill] sm:$0xff]  ;;  %v13645_v3 = vld [vmem:[#allocation35_spill] sm:$0xff] }
 0x22e   : > { %9003 = vmatprep.mubr.f32.mxu0 %v10268_v54  ;;  %v13634_v54 = vld [vmem:[#allocation14_spill] sm:$0xff] }
 0x230   : > { %8362 = vmatmul.mubr.f32.gmra.mrb[4].mxu1 %v13629_v48  ;;  %v13646_v48 = vld [vmem:[#allocation36_spill] sm:$0xff] }
 0x231   : > { %9004 = vmatmul.mubr.f32.gmra.mrb[4].mxu0 %v10280_v59  ;;  %8364 = vmatprep.mubr.f32.mxu1 %v13630_v42  ;;  %v13635_v59 = vld [vmem:[#allocation15_spill] sm:$0xff]  ;;  %v13684_v42 = vld [vmem:[#allocation100_spill] sm:$0xff] }
 0x232   : > { %9006 = vmatprep.mubr.f32.mxu0 %v10288_v0  ;;  %v13636_v0 = vld [vmem:[#allocation18_spill] sm:$0xff] }
 0x234   : > { %8365 = vmatmul.mubr.f32.gmra.mrb[6].mxu1 %v13631_v43  ;;  %v13685_v43 = vld [vmem:[#allocation97_spill] sm:$0xff] }
 0x235   : > { %9007 = vmatmul.mubr.f32.gmra.mrb[6].mxu0 %v10308_v32  ;;  %8367 = vmatprep.mubr.f32.mxu1 %v13632_v49  ;;  %v13637_v32 = vld [vmem:[#allocation19_spill] sm:$0xff]  ;;  %v13686_v49 = vld [vmem:[#allocation102_spill] sm:$0xff] }
 0x236   : > { %9009 = vmatprep.mubr.f32.mxu0 %v10343_v1  ;;  %v13638_v1 = vld [vmem:[#allocation20_spill] sm:$0xff] }
 0x238   : > { %8368 = vmatmul.mubr.f32.gmra.mrb[8].mxu1 %v13633_v50  ;;  %v13687_v50 = vld [vmem:[#allocation98_spill] sm:$0xff] }
 0x239   : > { %9010 = vmatmul.mubr.f32.gmra.mrb[8].mxu0 %v10345_v5  ;;  %8370 = vmatprep.mubr.f32.mxu1 %v13634_v54  ;;  %v13639_v5 = vld [vmem:[#allocation23_spill] sm:$0xff]  ;;  %v13688_v54 = vld [vmem:[#allocation104_spill] sm:$0xff] }
 0x23a   : > { %9012 = vmatprep.mubr.f32.mxu0 %v10356_v4  ;;  %v13640_v4 = vld [vmem:[#allocation26_spill] sm:$0xff] }
 0x23c   : > { %8371 = vmatmul.mubr.f32.gmra.mrb[10].mxu1 %v13635_v59  ;;  %v13689_v59 = vld [vmem:[#allocation101_spill] sm:$0xff] }
 0x23d   : > { %9013 = vmatmul.mubr.f32.gmra.mrb[10].mxu0 %v13518_v17  ;;  %8373 = vmatprep.mubr.f32.mxu1 %v13636_v0  ;;  %v13647_v17 = vld [vmem:[#allocation39_spill] sm:$0xff] }
 0x23e   : > { %9015 = vmatprep.mubr.f32.mxu0 %v13519_v24  ;;  %v13648_v24 = vld [vmem:[#allocation40_spill] sm:$0xff]  ;;  %v13690_v0 = vld [vmem:[#allocation107_spill] sm:$0xff] }
 0x240   : > { %8374 = vmatmul.mubr.f32.gmra.mrb[12].mxu1 %v13637_v32  ;;  %v13691_v32 = vld [vmem:[#allocation103_spill] sm:$0xff] }
 0x241   : > { %9016 = vmatmul.mubr.f32.gmra.mrb[12].mxu0 %v13520_v29  ;;  %8376 = vmatprep.mubr.f32.mxu1 %v13638_v1  ;;  %v13649_v29 = vld [vmem:[#allocation44_spill] sm:$0xff]  ;;  %v13692_v1 = vld [vmem:[#allocation109_spill] sm:$0xff] }
 0x242   : > { %9018 = vmatprep.mubr.f32.mxu0 %v13521_v35  ;;  %v13650_v35 = vld [vmem:[#allocation45_spill] sm:$0xff] }
 0x244   : > { %8377 = vmatmul.mubr.f32.gmra.mrb[14].mxu1 %v13639_v5  ;;  %v13693_v5 = vld [vmem:[#allocation105_spill] sm:$0xff] }
 0x245   : > { %9019 = vmatmul.mubr.f32.gmra.mrb[14].mxu0 %v13522_v30  ;;  %8379 = vmatprep.mubr.f32.mxu1 %v13640_v4  ;;  %v13651_v30 = vld [vmem:[#allocation46_spill] sm:$0xff] }
 0x246   : > { %9021 = vmatprep.mubr.f32.mxu0 %v13523_v41  ;;  %v13652_v41 = vld [vmem:[#allocation50_spill] sm:$0xff] }
 0x247   : > { %v13694_v4 = vld [vmem:[#allocation110_spill] sm:$0xff] }
 0x248   : > { %8380 = vmatmul.mubr.f32.gmra.mrb[16].mxu1 %v13641_v45  ;;  %v13695_v45 = vld [vmem:[#allocation106_spill] sm:$0xff] }
 0x249   : > { %9022 = vmatmul.mubr.f32.gmra.mrb[16].mxu0 %v13524_v52  ;;  %8382 = vmatprep.mubr.f32.mxu1 %v13642_v2  ;;  %v13653_v52 = vld [vmem:[#allocation51_spill] sm:$0xff]  ;;  %v13696_v2 = vld [vmem:[#allocation112_spill] sm:$0xff] }
 0x24a   : > { %9024 = vmatprep.mubr.f32.mxu0 %v13525_v25  ;;  %v13654_v25 = vld [vmem:[#allocation52_spill] sm:$0xff] }
 0x24c   : > { %8383 = vmatmul.mubr.f32.gmra.mrb[18].mxu1 %v13643_v36  ;;  %v13697_v36 = vld [vmem:[#allocation108_spill] sm:$0xff] }
 0x24d   : > { %9025 = vmatmul.mubr.f32.gmra.mrb[18].mxu0 %v13526_v60  ;;  %8385 = vmatprep.mubr.f32.mxu1 %v13644_v18  ;;  %v13655_v60 = vld [vmem:[#allocation55_spill] sm:$0xff] }
 0x24e   : > { %9027 = vmatprep.mubr.f32.mxu0 %v13527_v47  ;;  %v13656_v47 = vld [vmem:[#allocation57_spill] sm:$0xff]  ;;  %v13698_v18 = vld [vmem:[#allocation115_spill] sm:$0xff] }
 0x250   : > { %8386 = vmatmul.mubr.f32.gmra.mrb[20].mxu1 %v13645_v3  ;;  %v13699_v3 = vld [vmem:[#allocation111_spill] sm:$0xff] }
 0x251   : > { %9028 = vmatmul.mubr.f32.gmra.mrb[20].mxu0 %v13528_v21  ;;  %8388 = vmatprep.mubr.f32.mxu1 %v13646_v48  ;;  %v13657_v21 = vld [vmem:[#allocation59_spill] sm:$0xff]  ;;  %v13700_v48 = vld [vmem:[#allocation116_spill] sm:$0xff] }
 0x252   : > { %9030 = vmatprep.mubr.f32.mxu0 %v13529_v26  ;;  %v13658_v26 = vld [vmem:[#allocation61_spill] sm:$0xff] }
 0x254   : > { %8389 = vmatmul.mubr.f32.gmra.mrb[22].mxu1 %v13647_v17  ;;  %v13701_v17 = vld [vmem:[#allocation113_spill] sm:$0xff] }
 0x255   : > { %9031 = vmatmul.mubr.f32.gmra.mrb[22].mxu0 %v13530_v19  ;;  %8391 = vmatprep.mubr.f32.mxu1 %v13648_v24  ;;  %v13659_v19 = vld [vmem:[#allocation62_spill] sm:$0xff]  ;;  %v13702_v24 = vld [vmem:[#allocation117_spill] sm:$0xff] }
 0x256   : > { %9033 = vmatprep.mubr.f32.mxu0 %v13531_v53  ;;  %v13660_v53 = vld [vmem:[#allocation65_spill] sm:$0xff] }
 0x258   : > { %8392 = vmatmul.mubr.f32.gmra.mrb[24].mxu1 %v13649_v29  ;;  %v13703_v29 = vld [vmem:[#allocation114_spill] sm:$0xff] }
 0x259   : > { %9034 = vmatmul.mubr.f32.gmra.mrb[24].mxu0 %v13532_v56  ;;  %8394 = vmatprep.mubr.f32.mxu1 %v13650_v35  ;;  %v13661_v56 = vld [vmem:[#allocation66_spill] sm:$0xff]  ;;  %v13704_v35 = vld [vmem:[#allocation121_spill] sm:$0xff] }
 0x25a   : > { %9036 = vmatprep.mubr.f32.mxu0 %v13533_v40  ;;  %v13662_v40 = vld [vmem:[#allocation67_spill] sm:$0xff] }
 0x25c   : > { %8395 = vmatmul.mubr.f32.gmra.mrb[26].mxu1 %v13651_v30  ;;  %v13705_v30 = vld [vmem:[#allocation118_spill] sm:$0xff] }
 0x25d   : > { %9037 = vmatmul.mubr.f32.gmra.mrb[26].mxu0 %v13534_v27  ;;  %8397 = vmatprep.mubr.f32.mxu1 %v13652_v41  ;;  %v13663_v27 = vld [vmem:[#allocation70_spill] sm:$0xff] }
 0x25e   : > { %9039 = vmatprep.mubr.f32.mxu0 %v13535_v22  ;;  %v13664_v22 = vld [vmem:[#allocation71_spill] sm:$0xff]  ;;  %v13706_v41 = vld [vmem:[#allocation122_spill] sm:$0xff] }
 0x260   : > { %8398 = vmatmul.mubr.f32.gmra.mrb[28].mxu1 %v13653_v52  ;;  %v13707_v52 = vld [vmem:[#allocation123_spill] sm:$0xff] }
 0x261   : > { %9040 = vmatmul.mubr.f32.gmra.mrb[28].mxu0 %v13536_v6  ;;  %8400 = vmatprep.mubr.f32.mxu1 %v13654_v25  ;;  %v13665_v6 = vld [vmem:[#allocation74_spill] sm:$0xff] }
 0x262   : > { %9042 = vmatprep.mubr.f32.mxu0 %v13537_v55  ;;  %v13667_v55 = vld [vmem:[#allocation79_spill] sm:$0xff]  ;;  %v13708_v25 = vld [vmem:[#allocation126_spill] sm:$0xff] }
 0x264   : > { %8401 = vmatmul.mubr.f32.gmra.mrb[30].mxu1 %v13655_v60  ;;  %v13709_v60 = vld [vmem:[#allocation124_spill] sm:$0xff] }
 0x265   : > { %9043 = vmatmul.mubr.f32.gmra.mrb[30].mxu0 %v13538_v39  ;;  %8403 = vmatprep.mubr.f32.mxu1 %v13656_v47  ;;  %v13668_v39 = vld [vmem:[#allocation80_spill] sm:$0xff]  ;;  %v13710_v47 = vld [vmem:[#allocation129_spill] sm:$0xff] }
 0x266   : > { %9045 = vmatprep.mubr.f32.mxu0 %v13539_v8  ;;  %v13669_v8 = vld [vmem:[#allocation82_spill] sm:$0xff] }
 0x268   : > { %8404 = vmatmul.mubr.f32.gmra.mrb[32].mxu1 %v13657_v21  ;;  %v13711_v21 = vld [vmem:[#allocation125_spill] sm:$0xff] }
 0x269   : > { %9046 = vmatmul.mubr.f32.gmra.mrb[32].mxu0 %v13540_v37  ;;  %8406 = vmatprep.mubr.f32.mxu1 %v13658_v26  ;;  %v13670_v37 = vld [vmem:[#allocation85_spill] sm:$0xff]  ;;  %v13712_v26 = vld [vmem:[#allocation130_spill] sm:$0xff] }
 0x26a   : > { %9048 = vmatprep.mubr.f32.mxu0 %v13541_v57  ;;  %v13671_v57 = vld [vmem:[#allocation87_spill] sm:$0xff] }
 0x26c   : > { %8407 = vmatmul.mubr.f32.gmra.mrb[34].mxu1 %v13659_v19  ;;  %v13713_v19 = vld [vmem:[#allocation127_spill] sm:$0xff] }
 0x26d   : > { %9049 = vmatmul.mubr.f32.gmra.mrb[34].mxu0 %v13542_v63  ;;  %8409 = vmatprep.mubr.f32.mxu1 %v13660_v53  ;;  %v13672_v63 = vld [vmem:[#allocation88_spill] sm:$0xff] }
 0x26e   : > { %9051 = vmatprep.mubr.f32.mxu0 %v10696_v23  ;;  %v13666_v23 = vld [vmem:[#allocation76_spill] sm:$0xff] }
 0x26f   : > { %v13714_v53 = vld [vmem:[#allocation132_spill] sm:$0xff] }
 0x270   : > { %8410 = vmatmul.mubr.f32.gmra.mrb[36].mxu1 %v13661_v56  ;;  %v13715_v56 = vld [vmem:[#allocation128_spill] sm:$0xff] }
 0x271   : > { %9052 = vmatmul.mubr.f32.gmra.mrb[36].mxu0 %v13543_v31  ;;  %8412 = vmatprep.mubr.f32.mxu1 %v13662_v40  ;;  %v13673_v31 = vld [vmem:[#allocation84_spill] sm:$0xff]  ;;  %v13717_v40 = vld [vmem:[#allocation131_spill] sm:$0xff] }
 0x272   : > { %9054 = vmatprep.mubr.f32.mxu0 %v13544_v20  ;;  %v13674_v20 = vld [vmem:[#allocation90_spill] sm:$0xff] }
 0x274   : > { %8413 = vmatmul.mubr.f32.gmra.mrb[38].mxu1 %v13663_v27  ;;  %v13719_v27 = vld [vmem:[#allocation133_spill] sm:$0xff] }
 0x275   : > { %9055 = vmatmul.mubr.f32.gmra.mrb[38].mxu0 %v13545_v38  ;;  %8415 = vmatprep.mubr.f32.mxu1 %v13664_v22  ;;  %v13675_v38 = vld [vmem:[#allocation86_spill] sm:$0xff] }
 0x276   : > { %9057 = vmatprep.mubr.f32.mxu0 %v13546_v10  ;;  %v13676_v10 = vld [vmem:[#allocation93_spill] sm:$0xff]  ;;  %v13720_v22 = vld [vmem:[#allocation138_spill] sm:$0xff] }
 0x278   : > { %8416 = vmatmul.mubr.f32.gmra.mrb[40].mxu1 %v13665_v6  ;;  %v13721_v6 = vld [vmem:[#allocation134_spill] sm:$0xff] }
 0x279   : > { %9058 = vmatmul.mubr.f32.gmra.mrb[40].mxu0 %v13547_v51  ;;  %8418 = vmatprep.mubr.f32.mxu1 %v13666_v23  ;;  %v13677_v51 = vld [vmem:[#allocation89_spill] sm:$0xff]  ;;  %v13722_v23 = vld [vmem:[#allocation140_spill] sm:$0xff] }
 0x27a   : > { %9060 = vmatprep.mubr.f32.mxu0 %v13548_v28  ;;  %v13678_v28 = vld [vmem:[#allocation94_spill] sm:$0xff] }
 0x27c   : > { %8419 = vmatmul.mubr.f32.gmra.mrb[42].mxu1 %v13667_v55  ;;  %v13723_v55 = vld [vmem:[#allocation137_spill] sm:$0xff] }
 0x27d   : > { %9061 = vmatmul.mubr.f32.gmra.mrb[42].mxu0 %v13549_v58  ;;  %8421 = vmatprep.mubr.f32.mxu1 %v13668_v39  ;;  %v13679_v58 = vld [vmem:[#allocation91_spill] sm:$0xff]  ;;  %v13724_v39 = vld [vmem:[#allocation144_spill] sm:$0xff] }
 0x27e   : > { %9063 = vmatprep.mubr.f32.mxu0 %v13550_v9  ;;  %v13680_v9 = vld [vmem:[#allocation95_spill] sm:$0xff] }
 0x280   : > { %8422 = vmatmul.mubr.f32.gmra.mrb[44].mxu1 %v13669_v8  ;;  %v13725_v8 = vld [vmem:[#allocation139_spill] sm:$0xff] }
 0x281   : > { %9064 = vmatmul.mubr.f32.gmra.mrb[44].mxu0 %v13551_v11  ;;  %8424 = vmatprep.mubr.f32.mxu1 %v13670_v37  ;;  %v13681_v11 = vld [vmem:[#allocation92_spill] sm:$0xff]  ;;  %v13726_v37 = vld [vmem:[#allocation145_spill] sm:$0xff] }
 0x282   : > { %9066 = vmatprep.mubr.f32.mxu0 %v13552_v15  ;;  %v13683_v15 = vld [vmem:[#allocation96_spill] sm:$0xff] }
 0x284   : > { %8425 = vmatmul.mubr.f32.gmra.mrb[46].mxu1 %v13671_v57  ;;  %v13727_v57 = vld [vmem:[#allocation141_spill] sm:$0xff] }
 0x285   : > { %9067 = vmatmul.mubr.f32.gmra.mrb[46].mxu0 %v13553_v44  ;;  %8427 = vmatprep.mubr.f32.mxu1 %v13672_v63  ;;  %v13682_v44 = vld [vmem:[#allocation99_spill] sm:$0xff]  ;;  %v13728_v63 = vld [vmem:[#allocation146_spill] sm:$0xff] }
 0x286   : > { %9069 = vmatprep.mubr.f32.mxu0 %v13673_v31  ;;  %v13729_v31 = vld [vmem:[#allocation142_spill] sm:$0xff] }
 0x288   : > { %8428 = vmatmul.mubr.f32.gmra.mrb[48].mxu1 %v13674_v20  ;;  %v13730_v20 = vld [vmem:[#allocation147_spill] sm:$0xff] }
 0x289   : > { %9070 = vmatmul.mubr.f32.gmra.mrb[48].mxu0 %v13675_v38  ;;  %8430 = vmatprep.mubr.f32.mxu1 %v13676_v10  ;;  %v13731_v38 = vld [vmem:[#allocation143_spill] sm:$0xff] }
 0x28a   : > { %9072 = vmatprep.mubr.f32.mxu0 %v13677_v51  ;;  %v13732_v10 = vld [vmem:[#allocation151_spill] sm:$0xff]  ;;  %v13733_v51 = vld [vmem:[#allocation148_spill] sm:$0xff] }
 0x28c   : > { %8431 = vmatmul.mubr.f32.gmra.mrb[50].mxu1 %v13678_v28  ;;  %v13734_v28 = vld [vmem:[#allocation152_spill] sm:$0xff] }
 0x28d   : > { %9073 = vmatmul.mubr.f32.gmra.mrb[50].mxu0 %v13679_v58  ;;  %8433 = vmatprep.mubr.f32.mxu1 %v13680_v9  ;;  %v13735_v58 = vld [vmem:[#allocation154_spill] sm:$0xff] }
 0x28e   : > { %9075 = vmatprep.mubr.f32.mxu0 %v13681_v11  ;;  %v13736_v9 = vld [vmem:[#allocation150_spill] sm:$0xff]  ;;  %v13737_v11 = vld [vmem:[#allocation156_spill] sm:$0xff] }
 0x290   : > { %8434 = vmatmul.mubr.f32.gmra.mrb[52].mxu1 %v13682_v44  ;;  %v13738_v44 = vld [vmem:[#allocation153_spill] sm:$0xff] }
 0x291   : > { %9076 = vmatmul.mubr.f32.gmra.mrb[52].mxu0 %v13683_v15  ;;  %8436 = vmatprep.mubr.f32.mxu1 %v13684_v42  ;;  %v13739_v15 = vld [vmem:[#allocation158_spill] sm:$0xff]  ;;  %v13740_v42 = vld [vmem:[#allocation155_spill] sm:$0xff] }
 0x292   : > { %9078 = vmatprep.mubr.f32.mxu0 %v13685_v43  ;;  %v13741_v43 = vld [vmem:[#allocation160_spill] sm:$0xff] }
 0x294   : > { %8437 = vmatmul.mubr.f32.gmra.mrb[54].mxu1 %v13686_v49  ;;  %v13742_v49 = vld [vmem:[#allocation157_spill] sm:$0xff] }
 0x295   : > { %9079 = vmatmul.mubr.f32.gmra.mrb[54].mxu0 %v13687_v50  ;;  %8439 = vmatprep.mubr.f32.mxu1 %v13688_v54  ;;  %v13743_v50 = vld [vmem:[#allocation163_spill] sm:$0xff] }
 0x296   : > { %9081 = vmatprep.mubr.f32.mxu0 %v13689_v59  ;;  %v13744_v54 = vld [vmem:[#allocation159_spill] sm:$0xff]  ;;  %v13746_v59 = vld [vmem:[#allocation161_spill] sm:$0xff] }
 0x298   : > { %8440 = vmatmul.mubr.f32.gmra.mrb[56].mxu1 %v13690_v0  ;;  %v13747_v0 = vld [vmem:[#allocation166_spill] sm:$0xff] }
 0x299   : > { %9082 = vmatmul.mubr.f32.gmra.mrb[56].mxu0 %v13691_v32  ;;  %8442 = vmatprep.mubr.f32.mxu1 %v13692_v1  ;;  %v13748_v32 = vld [vmem:[#allocation162_spill] sm:$0xff]  ;;  %v13749_v1 = vld [vmem:[#allocation168_spill] sm:$0xff] }
 0x29a   : > { %9084 = vmatprep.mubr.f32.mxu0 %v13693_v5  ;;  %v13750_v5 = vld [vmem:[#allocation164_spill] sm:$0xff] }
 0x29c   : > { %8443 = vmatmul.mubr.f32.gmra.mrb[58].mxu1 %v13694_v4  ;;  %v13751_v4 = vld [vmem:[#allocation170_spill] sm:$0xff] }
 0x29d   : > { %9085 = vmatmul.mubr.f32.gmra.mrb[58].mxu0 %v13695_v45  ;;  %8445 = vmatprep.mubr.f32.mxu1 %v13696_v2  ;;  %v13752_v45 = vld [vmem:[#allocation167_spill] sm:$0xff]  ;;  %v13753_v2 = vld [vmem:[#allocation173_spill] sm:$0xff] }
 0x29e   : > { %9087 = vmatprep.mubr.f32.mxu0 %v13697_v36  ;;  %v13754_v36 = vld [vmem:[#allocation169_spill] sm:$0xff] }
 0x2a0   : > { %8446 = vmatmul.mubr.f32.gmra.mrb[60].mxu1 %v13698_v18  ;;  %v13755_v18 = vld [vmem:[#allocation174_spill] sm:$0xff] }
 0x2a1   : > { %9088 = vmatmul.mubr.f32.gmra.mrb[60].mxu0 %v13699_v3  ;;  %8448 = vmatprep.mubr.f32.mxu1 %v13700_v48  ;;  %v13756_v3 = vld [vmem:[#allocation171_spill] sm:$0xff]  ;;  %v13757_v48 = vld [vmem:[#allocation176_spill] sm:$0xff] }
 0x2a2   : > { %9090 = vmatprep.mubr.f32.mxu0 %v13701_v17  ;;  %v13758_v17 = vld [vmem:[#allocation172_spill] sm:$0xff] }
 0x2a4   : > { %8449 = vmatmul.mubr.f32.gmra.mrb[62].mxu1 %v13702_v24  ;;  %v13759_v24 = vld [vmem:[#allocation178_spill] sm:$0xff] }
 0x2a5   : > { %9091 = vmatmul.mubr.f32.gmra.mrb[62].mxu0 %v13703_v29  ;;  %8451 = vmatprep.mubr.f32.mxu1 %v13704_v35  ;;  %v13760_v29 = vld [vmem:[#allocation175_spill] sm:$0xff]  ;;  %v13761_v35 = vld [vmem:[#allocation180_spill] sm:$0xff] }
 0x2a6   : > { %9093 = vmatprep.mubr.f32.mxu0 %v13705_v30  ;;  %v13762_v30 = vld [vmem:[#allocation177_spill] sm:$0xff] }
 0x2a8   : > { %8452 = vmatmul.mubr.f32.gmra.mrb[64].mxu1 %v13706_v41  ;;  %v13763_v41 = vld [vmem:[#allocation183_spill] sm:$0xff] }
 0x2a9   : > { %9094 = vmatmul.mubr.f32.gmra.mrb[64].mxu0 %v13571_v14  ;;  %8454 = vmatprep.mubr.f32.mxu1 %v13707_v52  ;;  %v13716_v14 = vld [vmem:[#allocation135_spill] sm:$0xff] }
 0x2aa   : > { %9096 = vmatprep.mubr.f32.mxu0 %v13572_v33  ;;  %v13718_v33 = vld [vmem:[#allocation136_spill] sm:$0xff]  ;;  %v13764_v52 = vld [vmem:[#allocation179_spill] sm:$0xff] }
 0x2ac   : > { %8455 = vmatmul.mubr.f32.gmra.mrb[66].mxu1 %v13708_v25  ;;  %v13765_v25 = vld [vmem:[#allocation185_spill] sm:$0xff] }
 0x2ad   : > { %9097 = vmatmul.mubr.f32.gmra.mrb[66].mxu0 %v13709_v60  ;;  %8457 = vmatprep.mubr.f32.mxu1 %v13710_v47  ;;  %v13766_v60 = vld [vmem:[#allocation181_spill] sm:$0xff]  ;;  %v13767_v47 = vld [vmem:[#allocation186_spill] sm:$0xff] }
 0x2ae   : > { %9099 = vmatprep.mubr.f32.mxu0 %v13711_v21  ;;  %v13768_v21 = vld [vmem:[#allocation182_spill] sm:$0xff] }
 0x2b0   : > { %8458 = vmatmul.mubr.f32.gmra.mrb[68].mxu1 %v13712_v26  ;;  %v13769_v26 = vld [vmem:[#allocation188_spill] sm:$0xff] }
 0x2b1   : > { %9100 = vmatmul.mubr.f32.gmra.mrb[68].mxu0 %v13713_v19  ;;  %8460 = vmatprep.mubr.f32.mxu1 %v13714_v53  ;;  %v13770_v19 = vld [vmem:[#allocation184_spill] sm:$0xff]  ;;  %v13771_v53 = vld [vmem:[#allocation190_spill] sm:$0xff] }
 0x2b2   : > { %9102 = vmatprep.mubr.f32.mxu0 %v13715_v56  ;;  %v13772_v56 = vld [vmem:[#allocation187_spill] sm:$0xff] }
 0x2b4   : > { %8461 = vmatmul.mubr.f32.gmra.mrb[70].mxu1 %v13716_v14  ;;  %v13773_v14 = vld [vmem:[#allocation193_spill] sm:$0xff] }
 0x2b5   : > { %9103 = vmatmul.mubr.f32.gmra.mrb[70].mxu0 %v13717_v40  ;;  %8463 = vmatprep.mubr.f32.mxu1 %v13718_v33  ;;  %v13774_v40 = vld [vmem:[#allocation189_spill] sm:$0xff]  ;;  %v13775_v33 = vld [vmem:[#allocation194_spill] sm:$0xff] }
 0x2b6   : > { %9105 = vmatprep.mubr.f32.mxu0 %v13719_v27  ;;  %v13776_v27 = vld [vmem:[#allocation191_spill] sm:$0xff] }
 0x2b8   : > { %8464 = vmatmul.mubr.f32.gmra.mrb[72].mxu1 %v13720_v22  ;;  %v13777_v22 = vld [vmem:[#allocation196_spill] sm:$0xff] }
 0x2b9   : > { %9106 = vmatmul.mubr.f32.gmra.mrb[72].mxu0 %v13721_v6  ;;  %8466 = vmatprep.mubr.f32.mxu1 %v13722_v23  ;;  %v13778_v6 = vld [vmem:[#allocation192_spill] sm:$0xff]  ;;  %v13779_v23 = vld [vmem:[#allocation198_spill] sm:$0xff] }
 0x2ba   : > { %9108 = vmatprep.mubr.f32.mxu0 %v13723_v55  ;;  %v13780_v55 = vld [vmem:[#allocation195_spill] sm:$0xff] }
 0x2bc   : > { %8467 = vmatmul.mubr.f32.gmra.mrb[74].mxu1 %v13724_v39  ;;  %v13781_v39 = vld [vmem:[#allocation200_spill] sm:$0xff] }
 0x2bd   : > { %9109 = vmatmul.mubr.f32.gmra.mrb[74].mxu0 %v13725_v8  ;;  %8469 = vmatprep.mubr.f32.mxu1 %v13726_v37  ;;  %v13782_v8 = vld [vmem:[#allocation197_spill] sm:$0xff]  ;;  %v13783_v37 = vld [vmem:[#allocation203_spill] sm:$0xff] }
 0x2be   : > { %9111 = vmatprep.mubr.f32.mxu0 %v13727_v57  ;;  %v13784_v57 = vld [vmem:[#allocation199_spill] sm:$0xff] }
 0x2c0   : > { %8470 = vmatmul.mubr.f32.gmra.mrb[76].mxu1 %v13728_v63  ;;  %v12264_v63 = vld [vmem:[%s12711_s2] ss:$0 sm:$0xff] }
 0x2c1   : > { %9112 = vmatmul.mubr.f32.gmra.mrb[76].mxu0 %v13729_v31  ;;  %8472 = vmatprep.mubr.f32.mxu1 %v13730_v20  ;;  %v13785_v31 = vld [vmem:[#allocation205_spill] sm:$0xff] }
 0x2c2   : > { %9114 = vmatprep.mubr.f32.mxu0 %v13731_v38  ;;  %v13786_v20 = vld [vmem:[#allocation201_spill] sm:$0xff] }
 0x2c4   : > { %8473 = vmatmul.mubr.f32.gmra.mrb[78].mxu1 %v13732_v10 }
 0x2c5   : > { %9115 = vmatmul.mubr.f32.gmra.mrb[78].mxu0 %v13733_v51  ;;  %8475 = vmatprep.mubr.f32.mxu1 %v13734_v28 }
 0x2c6   : > { %9117 = vmatprep.mubr.f32.mxu0 %v13584_v7  ;;  %v13745_v7 = vld [vmem:[#allocation165_spill] sm:$0xff] }
 0x2c8   : > { %8476 = vmatmul.mubr.f32.gmra.mrb[80].mxu1 %v13735_v58  ;;  %v13787_v58 = vld [vmem:[#allocation206_spill] sm:$0xff] }
 0x2c9   : > { %9118 = vmatmul.mubr.f32.gmra.mrb[80].mxu0 %v13736_v9  ;;  %8478 = vmatprep.mubr.f32.mxu1 %v13737_v11 }
 0x2ca   : > { %9120 = vmatprep.mubr.f32.mxu0 %v13738_v44  ;;  %v13788_v44 = vld [vmem:[#allocation202_spill] sm:$0xff] }
 0x2cc   : > { %8479 = vmatmul.mubr.f32.gmra.mrb[82].mxu1 %v13739_v15  ;;  %v13789_v15 = vld [vmem:[#allocation208_spill] sm:$0xff] }
 0x2cd   : > { %9121 = vmatmul.mubr.f32.gmra.mrb[82].mxu0 %v13740_v42  ;;  %8481 = vmatprep.mubr.f32.mxu1 %v13741_v43  ;;  %v13790_v43 = vld [vmem:[#allocation204_spill] sm:$0xff] }
 0x2ce   : > { %9123 = vmatprep.mubr.f32.mxu0 %v13742_v49 }
 0x2d0   : > { %8482 = vmatmul.mubr.f32.gmra.mrb[84].mxu1 %v13743_v50 }
 0x2d1   : > { %9124 = vmatmul.mubr.f32.gmra.mrb[84].mxu0 %v13744_v54  ;;  %8484 = vmatprep.mubr.f32.mxu1 %v13745_v7 }
 0x2d2   : > { %9126 = vmatprep.mubr.f32.mxu0 %v13746_v59 }
 0x2d4   : > { %8485 = vmatmul.mubr.f32.gmra.mrb[86].mxu1 %v13747_v0 }
 0x2d5   : > { %9127 = vmatmul.mubr.f32.gmra.mrb[86].mxu0 %v13748_v32  ;;  %8487 = vmatprep.mubr.f32.mxu1 %v13749_v1  ;;  %v13791_v32 = vld [vmem:[#allocation210_spill] sm:$0xff] }
 0x2d6   : > { %9129 = vmatprep.mubr.f32.mxu0 %v13750_v5 }
 0x2d8   : > { %8488 = vmatmul.mubr.f32.gmra.mrb[88].mxu1 %v13751_v4 }
 0x2d9   : > { %9130 = vmatmul.mubr.f32.gmra.mrb[88].mxu0 %v13752_v45  ;;  %8490 = vmatprep.mubr.f32.mxu1 %v13753_v2  ;;  %v13792_v45 = vld [vmem:[#allocation207_spill] sm:$0xff]  ;;  %v13793_v2 = vld [vmem:[#allocation213_spill] sm:$0xff] }
 0x2da   : > { %9132 = vmatprep.mubr.f32.mxu0 %v13754_v36 }
 0x2dc   : > { %8491 = vmatmul.mubr.f32.gmra.mrb[90].mxu1 %v13755_v18 }
 0x2dd   : > { %9133 = vmatmul.mubr.f32.gmra.mrb[90].mxu0 %v13756_v3  ;;  %8493 = vmatprep.mubr.f32.mxu1 %v13757_v48 }
 0x2de   : > { %9135 = vmatprep.mubr.f32.mxu0 %v13758_v17 }
 0x2e0   : > { %8494 = vmatmul.mubr.f32.gmra.mrb[92].mxu1 %v13759_v24 }
 0x2e1   : > { %9136 = vmatmul.mubr.f32.gmra.mrb[92].mxu0 %v13760_v29  ;;  %8496 = vmatprep.mubr.f32.mxu1 %v13761_v35  ;;  %v13794_v35 = vld [vmem:[#allocation214_spill] sm:$0xff] }
 0x2e2   : > { %9138 = vmatprep.mubr.f32.mxu0 %v13762_v30 }
 0x2e4   : > { %8497 = vmatmul.mubr.f32.gmra.mrb[94].mxu1 %v13763_v41 }
 0x2e5   : > { %9139 = vmatmul.mubr.f32.gmra.mrb[94].mxu0 %v13764_v52  ;;  %8499 = vmatprep.mubr.f32.mxu1 %v13765_v25  ;;  %v13795_v25 = vld [vmem:[#allocation211_spill] sm:$0xff] }
 0x2e6   : > { %9141 = vmatprep.mubr.f32.mxu0 %v13766_v60  ;;  %v13796_v60 = vld [vmem:[#allocation216_spill] sm:$0xff] }
 0x2e8   : > { %8500 = vmatmul.mubr.f32.gmra.mrb[96].mxu1 %v13767_v47  ;;  %v13797_v47 = vld [vmem:[#allocation212_spill] sm:$0xff] }
 0x2e9   : > { %9142 = vmatmul.mubr.f32.gmra.mrb[96].mxu0 %v13768_v21  ;;  %8502 = vmatprep.mubr.f32.mxu1 %v13769_v26 }
 0x2ea   : > { %9144 = vmatprep.mubr.f32.mxu0 %v13770_v19 }
 0x2ec   : > { %8503 = vmatmul.mubr.f32.gmra.mrb[98].mxu1 %v13771_v53 }
 0x2ed   : > { %9145 = vmatmul.mubr.f32.gmra.mrb[98].mxu0 %v13772_v56  ;;  %8505 = vmatprep.mubr.f32.mxu1 %v13773_v14 }
 0x2ee   : > { %9147 = vmatprep.mubr.f32.mxu0 %v13774_v40  ;;  %v13798_v40 = vld [vmem:[#allocation218_spill] sm:$0xff] }
 0x2f0   : > { %8506 = vmatmul.mubr.f32.gmra.mrb[100].mxu1 %v13775_v33 }
 0x2f1   : > { %9148 = vmatmul.mubr.f32.gmra.mrb[100].mxu0 %v13776_v27  ;;  %8508 = vmatprep.mubr.f32.mxu1 %v13777_v22 }
 0x2f2   : > { %9150 = vmatprep.mubr.f32.mxu0 %v13778_v6  ;;  %v13799_v6 = vld [vmem:[#allocation215_spill] sm:$0xff] }
 0x2f4   : > { %8509 = vmatmul.mubr.f32.gmra.mrb[102].mxu1 %v13779_v23  ;;  %v13800_v23 = vld [vmem:[#allocation220_spill] sm:$0xff] }
 0x2f5   : > { %9151 = vmatmul.mubr.f32.gmra.mrb[102].mxu0 %v13780_v55  ;;  %8511 = vmatprep.mubr.f32.mxu1 %v13781_v39  ;;  %v13801_v39 = vld [vmem:[#allocation217_spill] sm:$0xff] }
 0x2f6   : > { %9153 = vmatprep.mubr.f32.mxu0 %v13782_v8 }
 0x2f8   : > { %8512 = vmatmul.mubr.f32.gmra.mrb[104].mxu1 %v13783_v37 }
 0x2f9   : > { %9154 = vmatmul.mubr.f32.gmra.mrb[104].mxu0 %v13784_v57  ;;  %8514 = vmatprep.mubr.f32.mxu1 %v13785_v31 }
 0x2fa   : > { %9156 = vmatprep.mubr.f32.mxu0 %v13786_v20 }
 0x2fb   : > { %v8357_v38 = vpop.f32.mrb[0].mxu1 }
 0x2fc   : > { %v9309_v10 = vadd.f32 %v8357_v38, %v12264_v63  ;;  %v8999_v51 = vpop.f32.mrb[0].mxu0  ;;  %v3043_v28 = vpop.f32.mrb[1].mxu1  ;;  %8515 = vmatmul.mubr.f32.gmra.mrb[106].mxu1 %v13787_v58 }
 0x2fd   : > { %v9311_v9 = vadd.f32 %v12264_v63, %v3043_v28  ;;  %v5980_v11 = vpop.f32.mrb[1].mxu0  ;;  %9157 = vmatmul.mubr.f32.gmra.mrb[106].mxu0 %v13788_v44  ;;  %8517 = vmatprep.mubr.f32.mxu1 %v13789_v15 }
 0x2fe   : > { %v9310_v42 = vadd.f32 %v9309_v10, %v8999_v51  ;;  %9159 = vmatprep.mubr.f32.mxu0 %v13790_v43  ;;  %v13802_v10 = vld [vmem:[#allocation222_spill] sm:$0xff] }
 0x2ff   : > { %v9312_v49 = vadd.f32 %v9311_v9, %v5980_v11  ;;  %v8360_v50 = vpop.f32.mrb[2].mxu1  ;;  %v13803_v9 = vld [vmem:[#allocation219_spill] sm:$0xff]  ;;  %v13804_v11 = vld [vmem:[#allocation224_spill] sm:$0xff] }
 0x300   : > { %v6747_v54 = vmax.f32 %v9310_v42, 0.0  ;;  %v9313_v7 = vadd.f32 %v8360_v50, %v12264_v63  ;;  %v9002_v59 = vpop.f32.mrb[2].mxu0  ;;  %v3057_v0 = vpop.f32.mrb[3].mxu1  ;;  %8518 = vmatmul.mubr.f32.gmra.mrb[108].mxu1 %v13791_v32 }
 0x301   : > { %v6746_v1 = vmax.f32 %v9312_v49, 0.0  ;;  %v9315_v5 = vadd.f32 %v12264_v63, %v3057_v0  ;;  %v5992_v4 = vpop.f32.mrb[3].mxu0  ;;  %9160 = vmatmul.mubr.f32.gmra.mrb[108].mxu0 %v13792_v45  ;;  %8520 = vmatprep.mubr.f32.mxu1 %v13793_v2 }
 0x302   : > { %6876 = vst.msk [vmem:[%s12279_s28 + $0x8] sm:$0xff] %vm6874_vm2, %v6747_v54  ;;  %v9314_v36 = vadd.f32 %v9313_v7, %v9002_v59  ;;  %9162 = vmatprep.mubr.f32.mxu0 %v13613_v12  ;;  %v13805_v7 = vld [vmem:[#allocation225_spill] sm:$0xff] }
 0x303   : > { %6875 = vst.msk [vmem:[%s12279_s28] sm:$0xff] %vm6874_vm2, %v6746_v1  ;;  %v9316_v18 = vadd.f32 %v9315_v5, %v5992_v4  ;;  %v8363_v3 = vpop.f32.mrb[4].mxu1  ;;  %v13806_v1 = vld [vmem:[#allocation227_spill] sm:$0xff] }
 0x304   : > { %v6749_v48 = vmax.f32 %v9314_v36, 0.0  ;;  %v9317_v17 = vadd.f32 %v8363_v3, %v12264_v63  ;;  %v9005_v24 = vpop.f32.mrb[4].mxu0  ;;  %v3071_v29 = vpop.f32.mrb[5].mxu1  ;;  %8521 = vmatmul.mubr.f32.gmra.mrb[110].mxu1 %v13794_v35  ;;  %v13807_v3 = vld [vmem:[#allocation229_spill] sm:$0xff] }
 0x305   : > { %v6748_v30 = vmax.f32 %v9316_v18, 0.0  ;;  %v9319_v41 = vadd.f32 %v12264_v63, %v3071_v29  ;;  %v6004_v52 = vpop.f32.mrb[5].mxu0  ;;  %9163 = vmatmul.mubr.f32.gmra.mrb[110].mxu0 %v13795_v25  ;;  %8523 = vmatprep.mubr.f32.mxu1 %v13796_v60  ;;  %v13809_v60 = vld [vmem:[#allocation233_spill] sm:$0xff] }
 0x306   : > { %6878 = vst.msk [vmem:[%s12279_s28 + $0x18] sm:$0xff] %vm6874_vm2, %v6749_v48  ;;  %v9318_v12 = vadd.f32 %v9317_v17, %v9005_v24  ;;  %9165 = vmatprep.mubr.f32.mxu0 %v13797_v47  ;;  %v13808_v24 = vld [vmem:[#allocation231_spill] sm:$0xff] }
 0x307   : > { %6877 = vst.msk [vmem:[%s12279_s28 + $0x10] sm:$0xff] %vm6874_vm2, %v6748_v30  ;;  %v9320_v21 = vadd.f32 %v9319_v41, %v6004_v52  ;;  %v8366_v26 = vpop.f32.mrb[6].mxu1 }
 0x308   : > { %v6751_v19 = vmax.f32 %v9318_v12, 0.0  ;;  %v9321_v53 = vadd.f32 %v8366_v26, %v12264_v63  ;;  %v9008_v56 = vpop.f32.mrb[6].mxu0  ;;  %v3085_v14 = vpop.f32.mrb[7].mxu1  ;;  %8524 = vmatmul.mubr.f32.gmra.mrb[112].mxu1 %v13798_v40  ;;  %v13811_v26 = vld [vmem:[#allocation232_spill] sm:$0xff] }
 0x309   : > { %v6750_v33 = vmax.f32 %v9320_v21, 0.0  ;;  %v9323_v27 = vadd.f32 %v12264_v63, %v3085_v14  ;;  %v6016_v22 = vpop.f32.mrb[7].mxu0  ;;  %9166 = vmatmul.mubr.f32.gmra.mrb[112].mxu0 %v13799_v6  ;;  %8526 = vmatprep.mubr.f32.mxu1 %v13800_v23  ;;  %v13810_v21 = vld [vmem:[#allocation235_spill] sm:$0xff]  ;;  %v13813_v23 = vld [vmem:[#allocation234_spill] sm:$0xff] }
 0x30a   : > { %6880 = vst.msk [vmem:[%s12279_s28 + $0x28] sm:$0xff] %vm6874_vm2, %v6751_v19  ;;  %v9322_v55 = vadd.f32 %v9321_v53, %v9008_v56  ;;  %9168 = vmatprep.mubr.f32.mxu0 %v13801_v39 }
 0x30b   : > { %6879 = vst.msk [vmem:[%s12279_s28 + $0x20] sm:$0xff] %vm6874_vm2, %v6750_v33  ;;  %v9324_v8 = vadd.f32 %v9323_v27, %v6016_v22  ;;  %v8369_v37 = vpop.f32.mrb[8].mxu1  ;;  %v13812_v27 = vld [vmem:[#allocation237_spill] sm:$0xff] }
 0x30c   : > { %v6753_v57 = vmax.f32 %v9322_v55, 0.0  ;;  %v9325_v31 = vadd.f32 %v8369_v37, %v12264_v63  ;;  %v9011_v20 = vpop.f32.mrb[8].mxu0  ;;  %v3099_v38 = vpop.f32.mrb[9].mxu1  ;;  %8527 = vmatmul.mubr.f32.gmra.mrb[114].mxu1 %v13802_v10  ;;  %v13814_v55 = vld [vmem:[#allocation239_spill] sm:$0xff] }
 0x30d   : > { %v6752_v51 = vmax.f32 %v9324_v8, 0.0  ;;  %v9327_v28 = vadd.f32 %v12264_v63, %v3099_v38  ;;  %v6028_v58 = vpop.f32.mrb[9].mxu0  ;;  %9169 = vmatmul.mubr.f32.gmra.mrb[114].mxu0 %v13803_v9  ;;  %8529 = vmatprep.mubr.f32.mxu1 %v13804_v11  ;;  %v13815_v8 = vld [vmem:[#allocation236_spill] sm:$0xff]  ;;  %v13817_v11 = vld [vmem:[#allocation238_spill] sm:$0xff] }
 0x30e   : > { %6882 = vst.msk [vmem:[%s12279_s28 + $0x38] sm:$0xff] %vm6874_vm2, %v6753_v57  ;;  %v9326_v44 = vadd.f32 %v9325_v31, %v9011_v20  ;;  %9171 = vmatprep.mubr.f32.mxu0 %v11651_v46 }
 0x30f   : > { %6881 = vst.msk [vmem:[%s12279_s28 + $0x30] sm:$0xff] %vm6874_vm2, %v6752_v51  ;;  %v9328_v15 = vadd.f32 %v9327_v28, %v6028_v58  ;;  %v8372_v42 = vpop.f32.mrb[10].mxu1  ;;  %v13816_v51 = vld [vmem:[#allocation241_spill] sm:$0xff] }
 0x310   : > { %v6755_v43 = vmax.f32 %v9326_v44, 0.0  ;;  %v9329_v49 = vadd.f32 %v8372_v42, %v12264_v63  ;;  %v9014_v50 = vpop.f32.mrb[10].mxu0  ;;  %v3113_v54 = vpop.f32.mrb[11].mxu1  ;;  %8530 = vmatmul.mubr.f32.gmra.mrb[116].mxu1 %v13805_v7  ;;  %v13818_v44 = vld [vmem:[#allocation243_spill] sm:$0xff]  ;;  %v13819_v42 = vld [vmem:[#allocation240_spill] sm:$0xff] }
 0x311   : > { %v6754_v59 = vmax.f32 %v9328_v15, 0.0  ;;  %v9331_v0 = vadd.f32 %v12264_v63, %v3113_v54  ;;  %v6040_v32 = vpop.f32.mrb[11].mxu0  ;;  %9172 = vmatmul.mubr.f32.gmra.mrb[116].mxu0 %v13619_v13  ;;  %8532 = vmatprep.mubr.f32.mxu1 %v13806_v1 }
 0x312   : > { %6884 = vst.msk [vmem:[%s12279_s28 + $0x48] sm:$0xff] %vm6874_vm2, %v6755_v43  ;;  %v9330_v46 = vadd.f32 %v9329_v49, %v9014_v50  ;;  %9174 = vmatprep.mubr.f32.mxu0 %v13620_v16 }
 0x313   : > { %6883 = vst.msk [vmem:[%s12279_s28 + $0x40] sm:$0xff] %vm6874_vm2, %v6754_v59  ;;  %v9332_v5 = vadd.f32 %v9331_v0, %v6040_v32  ;;  %v8375_v4 = vpop.f32.mrb[12].mxu1  ;;  %v13820_v0 = vld [vmem:[#allocation244_spill] sm:$0xff] }
 0x314   : > { %v6757_v45 = vmax.f32 %v9330_v46, 0.0  ;;  %v9333_v2 = vadd.f32 %v8375_v4, %v12264_v63  ;;  %v9017_v36 = vpop.f32.mrb[12].mxu0  ;;  %v3127_v18 = vpop.f32.mrb[13].mxu1  ;;  %8533 = vmatmul.mubr.f32.gmra.mrb[118].mxu1 %v13807_v3 }
 0x315   : > { %v6756_v13 = vmax.f32 %v9332_v5, 0.0  ;;  %v9335_v48 = vadd.f32 %v12264_v63, %v3127_v18  ;;  %v6052_v17 = vpop.f32.mrb[13].mxu0  ;;  %9175 = vmatmul.mubr.f32.gmra.mrb[118].mxu0 %v13621_v61  ;;  %8535 = vmatprep.mubr.f32.mxu1 %v13808_v24  ;;  %v13821_v5 = vld [vmem:[#allocation242_spill] sm:$0xff] }
 0x316   : > { %6886 = vst.msk [vmem:[%s12279_s28 + $0x58] sm:$0xff] %vm6874_vm2, %v6757_v45  ;;  %v9334_v16 = vadd.f32 %v9333_v2, %v9017_v36  ;;  %9177 = vmatprep.mubr.f32.mxu0 %v13622_v62 }
 0x317   : > { %6885 = vst.msk [vmem:[%s12279_s28 + $0x50] sm:$0xff] %vm6874_vm2, %v6756_v13  ;;  %v9336_v29 = vadd.f32 %v9335_v48, %v6052_v17  ;;  %v8378_v35 = vpop.f32.mrb[14].mxu1 }
 0x318   : > { %v6759_v30 = vmax.f32 %v9334_v16, 0.0  ;;  %v9337_v41 = vadd.f32 %v8378_v35, %v12264_v63  ;;  %v9020_v52 = vpop.f32.mrb[14].mxu0  ;;  %v3141_v25 = vpop.f32.mrb[15].mxu1  ;;  %8536 = vmatmul.mubr.f32.gmra.mrb[120].mxu1 %v13809_v60 }
 0x319   : > { %v6758_v61 = vmax.f32 %v9336_v29, 0.0  ;;  %v9339_v12 = vadd.f32 %v12264_v63, %v3141_v25  ;;  %v6064_v47 = vpop.f32.mrb[15].mxu0  ;;  %9178 = vmatmul.mubr.f32.gmra.mrb[120].mxu0 %v13623_v34  ;;  %8538 = vmatprep.mubr.f32.mxu1 %v13810_v21 }
 0x31a   : > { %6888 = vst.msk [vmem:[%s12279_s28 + $0x68] sm:$0xff] %vm6874_vm2, %v6759_v30  ;;  %v9338_v62 = vadd.f32 %v9337_v41, %v9020_v52  ;;  %9180 = vmatprep.mubr.f32.mxu0 %v13811_v26 }
 0x31b   : > { %6887 = vst.msk [vmem:[%s12279_s28 + $0x60] sm:$0xff] %vm6874_vm2, %v6758_v61  ;;  %v9340_v19 = vadd.f32 %v9339_v12, %v6064_v47  ;;  %v8381_v53 = vpop.f32.mrb[16].mxu1 }
 0x31c   : > { %v6761_v56 = vmax.f32 %v9338_v62, 0.0  ;;  %v9341_v14 = vadd.f32 %v8381_v53, %v12264_v63  ;;  %v9023_v40 = vpop.f32.mrb[16].mxu0  ;;  %v3155_v33 = vpop.f32.mrb[17].mxu1  ;;  %8539 = vmatmul.mubr.f32.gmra.mrb[122].mxu1 %v13812_v27 }
 0x31d   : > { %v6760_v34 = vmax.f32 %v9340_v19, 0.0  ;;  %v9343_v22 = vadd.f32 %v12264_v63, %v3155_v33  ;;  %v6076_v6 = vpop.f32.mrb[17].mxu0  ;;  %9181 = vmatmul.mubr.f32.gmra.mrb[122].mxu0 %v13813_v23  ;;  %8541 = vmatprep.mubr.f32.mxu1 %v13814_v55 }
 0x31e   : > { %6890 = vst.msk [vmem:[%s12279_s28 + $0x78] sm:$0xff] %vm6874_vm2, %v6761_v56  ;;  %v9342_v39 = vadd.f32 %v9341_v14, %v9023_v40  ;;  %9183 = vmatprep.mubr.f32.mxu0 %v13815_v8 }
 0x31f   : > { %6889 = vst.msk [vmem:[%s12279_s28 + $0x70] sm:$0xff] %vm6874_vm2, %v6760_v34  ;;  %v9344_v37 = vadd.f32 %v9343_v22, %v6076_v6  ;;  %v8384_v57 = vpop.f32.mrb[18].mxu1 }
 0x320   : > { %v6763_v31 = vmax.f32 %v9342_v39, 0.0  ;;  %v9345_v20 = vadd.f32 %v8384_v57, %v12264_v63  ;;  %v9026_v38 = vpop.f32.mrb[18].mxu0  ;;  %v3169_v10 = vpop.f32.mrb[19].mxu1  ;;  %8542 = vmatmul.mubr.f32.gmra.mrb[124].mxu1 %v13816_v51 }
 0x321   : > { %v6762_v28 = vmax.f32 %v9344_v37, 0.0  ;;  %v9347_v58 = vadd.f32 %v12264_v63, %v3169_v10  ;;  %v6088_v9 = vpop.f32.mrb[19].mxu0  ;;  %9184 = vmatmul.mubr.f32.gmra.mrb[124].mxu0 %v13817_v11  ;;  %8544 = vmatprep.mubr.f32.mxu1 %v13818_v44 }
 0x322   : > { %6892 = vst.msk [vmem:[%s12279_s28 + $0x88] sm:$0xff] %vm6874_vm2, %v6763_v31  ;;  %v9346_v15 = vadd.f32 %v9345_v20, %v9026_v38  ;;  %9186 = vmatprep.mubr.f32.mxu0 %v13819_v42 }
 0x323   : > { %6891 = vst.msk [vmem:[%s12279_s28 + $0x80] sm:$0xff] %vm6874_vm2, %v6762_v28  ;;  %v9348_v43 = vadd.f32 %v9347_v58, %v6088_v9  ;;  %v8387_v49 = vpop.f32.mrb[20].mxu1 }
 0x324   : > { %v6765_v50 = vmax.f32 %v9346_v15, 0.0  ;;  %v9349_v54 = vadd.f32 %v8387_v49, %v12264_v63  ;;  %v9029_v7 = vpop.f32.mrb[20].mxu0  ;;  %v3183_v59 = vpop.f32.mrb[21].mxu1  ;;  %8545 = vmatmul.mubr.f32.gmra.mrb[126].mxu1 %v13820_v0 }
 0x325   : > { %v6764_v32 = vmax.f32 %v9348_v43, 0.0  ;;  %v9351_v1 = vadd.f32 %v12264_v63, %v3183_v59  ;;  %v6100_v46 = vpop.f32.mrb[21].mxu0  ;;  %9187 = vmatmul.mubr.f32.gmra.mrb[126].mxu0 %v13821_v5 }
 0x326   : > { %6894 = vst.msk [vmem:[%s12279_s28 + $0x98] sm:$0xff] %vm6874_vm2, %v6765_v50  ;;  %v9350_v4 = vadd.f32 %v9349_v54, %v9029_v7 }
 0x327   : > { %6893 = vst.msk [vmem:[%s12279_s28 + $0x90] sm:$0xff] %vm6874_vm2, %v6764_v32  ;;  %v9352_v45 = vadd.f32 %v9351_v1, %v6100_v46  ;;  %v8390_v2 = vpop.f32.mrb[22].mxu1 }
 0x328   : > { %v6767_v36 = vmax.f32 %v9350_v4, 0.0  ;;  %v9353_v18 = vadd.f32 %v8390_v2, %v12264_v63  ;;  %v9032_v3 = vpop.f32.mrb[22].mxu0  ;;  %v3197_v13 = vpop.f32.mrb[23].mxu1 }
 0x329   : > { %v6766_v48 = vmax.f32 %v9352_v45, 0.0  ;;  %v9355_v17 = vadd.f32 %v12264_v63, %v3197_v13  ;;  %v6112_v24 = vpop.f32.mrb[23].mxu0 }
 0x32a   : > { %6896 = vst.msk [vmem:[%s12279_s28 + $0xa8] sm:$0xff] %vm6874_vm2, %v6767_v36  ;;  %v9354_v16 = vadd.f32 %v9353_v18, %v9032_v3 }
 0x32b   : > { %6895 = vst.msk [vmem:[%s12279_s28 + $0xa0] sm:$0xff] %vm6874_vm2, %v6766_v48  ;;  %v9356_v29 = vadd.f32 %v9355_v17, %v6112_v24  ;;  %v8393_v35 = vpop.f32.mrb[24].mxu1 }
 0x32c   : > { %v6769_v30 = vmax.f32 %v9354_v16, 0.0  ;;  %v9357_v41 = vadd.f32 %v8393_v35, %v12264_v63  ;;  %v9035_v52 = vpop.f32.mrb[24].mxu0  ;;  %v3211_v25 = vpop.f32.mrb[25].mxu1 }
 0x32d   : > { %v6768_v60 = vmax.f32 %v9356_v29, 0.0  ;;  %v9359_v61 = vadd.f32 %v12264_v63, %v3211_v25  ;;  %v6124_v12 = vpop.f32.mrb[25].mxu0 }
 0x32e   : > { %6898 = vst.msk [vmem:[%s12279_s28 + $0xb8] sm:$0xff] %vm6874_vm2, %v6769_v30  ;;  %v9358_v47 = vadd.f32 %v9357_v41, %v9035_v52 }
 0x32f   : > { %6897 = vst.msk [vmem:[%s12279_s28 + $0xb0] sm:$0xff] %vm6874_vm2, %v6768_v60  ;;  %v9360_v21 = vadd.f32 %v9359_v61, %v6124_v12  ;;  %v8396_v62 = vpop.f32.mrb[26].mxu1 }
 0x330   : > { %v6771_v26 = vmax.f32 %v9358_v47, 0.0  ;;  %v9361_v19 = vadd.f32 %v8396_v62, %v12264_v63  ;;  %v9038_v53 = vpop.f32.mrb[26].mxu0  ;;  %v3225_v56 = vpop.f32.mrb[27].mxu1 }
 0x331   : > { %v6770_v14 = vmax.f32 %v9360_v21, 0.0  ;;  %v9363_v40 = vadd.f32 %v12264_v63, %v3225_v56  ;;  %v6136_v33 = vpop.f32.mrb[27].mxu0 }
 0x332   : > { %6900 = vst.msk [vmem:[%s12279_s28 + $0xc8] sm:$0xff] %vm6874_vm2, %v6771_v26  ;;  %v9362_v27 = vadd.f32 %v9361_v19, %v9038_v53 }
 0x333   : > { %6899 = vst.msk [vmem:[%s12279_s28 + $0xc0] sm:$0xff] %vm6874_vm2, %v6770_v14  ;;  %v9364_v34 = vadd.f32 %v9363_v40, %v6136_v33  ;;  %v8399_v22 = vpop.f32.mrb[28].mxu1 }
 0x334   : > { %v6773_v6 = vmax.f32 %v9362_v27, 0.0  ;;  %v9365_v23 = vadd.f32 %v8399_v22, %v12264_v63  ;;  %v9041_v55 = vpop.f32.mrb[28].mxu0  ;;  %v3239_v39 = vpop.f32.mrb[29].mxu1 }
 0x335   : > { %v6772_v8 = vmax.f32 %v9364_v34, 0.0  ;;  %v9367_v37 = vadd.f32 %v12264_v63, %v3239_v39  ;;  %v6148_v57 = vpop.f32.mrb[29].mxu0 }
 0x336   : > { %6902 = vst.msk [vmem:[%s12279_s28 + $0xd8] sm:$0xff] %vm6874_vm2, %v6773_v6  ;;  %v9366_v31 = vadd.f32 %v9365_v23, %v9041_v55 }
 0x337   : > { %6901 = vst.msk [vmem:[%s12279_s28 + $0xd0] sm:$0xff] %vm6874_vm2, %v6772_v8  ;;  %v9368_v20 = vadd.f32 %v9367_v37, %v6148_v57  ;;  %v8402_v38 = vpop.f32.mrb[30].mxu1 }
 0x338   : > { %v6775_v10 = vmax.f32 %v9366_v31, 0.0  ;;  %v9369_v51 = vadd.f32 %v8402_v38, %v12264_v63  ;;  %v9044_v28 = vpop.f32.mrb[30].mxu0  ;;  %v3253_v58 = vpop.f32.mrb[31].mxu1 }
 0x339   : > { %v6774_v9 = vmax.f32 %v9368_v20, 0.0  ;;  %v9371_v11 = vadd.f32 %v12264_v63, %v3253_v58  ;;  %v6160_v44 = vpop.f32.mrb[31].mxu0 }
 0x33a   : > { %6904 = vst.msk [vmem:[%s12279_s28 + $0xe8] sm:$0xff] %vm6874_vm2, %v6775_v10  ;;  %v9370_v15 = vadd.f32 %v9369_v51, %v9044_v28 }
 0x33b   : > { %6903 = vst.msk [vmem:[%s12279_s28 + $0xe0] sm:$0xff] %vm6874_vm2, %v6774_v9  ;;  %v9372_v42 = vadd.f32 %v9371_v11, %v6160_v44  ;;  %v8405_v43 = vpop.f32.mrb[32].mxu1 }
 0x33c   : > { %v6777_v49 = vmax.f32 %v9370_v15, 0.0  ;;  %v9373_v50 = vadd.f32 %v8405_v43, %v12264_v63  ;;  %v9047_v54 = vpop.f32.mrb[32].mxu0  ;;  %v3267_v7 = vpop.f32.mrb[33].mxu1 }
 0x33d   : > { %v6776_v59 = vmax.f32 %v9372_v42, 0.0  ;;  %v9375_v0 = vadd.f32 %v12264_v63, %v3267_v7  ;;  %v6172_v32 = vpop.f32.mrb[33].mxu0 }
 0x33e   : > { %6906 = vst.msk [vmem:[%s12279_s28 + $0xf8] sm:$0xff] %vm6874_vm2, %v6777_v49  ;;  %v9374_v1 = vadd.f32 %v9373_v50, %v9047_v54 }
 0x33f   : > { %6905 = vst.msk [vmem:[%s12279_s28 + $0xf0] sm:$0xff] %vm6874_vm2, %v6776_v59  ;;  %v9376_v46 = vadd.f32 %v9375_v0, %v6172_v32  ;;  %v8408_v5 = vpop.f32.mrb[34].mxu1 }
 0x340   : > { %v6779_v4 = vmax.f32 %v9374_v1, 0.0  ;;  %v9377_v45 = vadd.f32 %v8408_v5, %v12264_v63  ;;  %v9050_v2 = vpop.f32.mrb[34].mxu0  ;;  %v3281_v36 = vpop.f32.mrb[35].mxu1 }
 0x341   : > { %v6778_v18 = vmax.f32 %v9376_v46, 0.0  ;;  %v9379_v3 = vadd.f32 %v12264_v63, %v3281_v36  ;;  %v6184_v13 = vpop.f32.mrb[35].mxu0 }
 0x342   : > { %6908 = vst.msk [vmem:[%s12279_s28 + $0x108] sm:$0xff] %vm6874_vm2, %v6779_v4  ;;  %v9378_v48 = vadd.f32 %v9377_v45, %v9050_v2 }
 0x343   : > { %6907 = vst.msk [vmem:[%s12279_s28 + $0x100] sm:$0xff] %vm6874_vm2, %v6778_v18  ;;  %v9380_v17 = vadd.f32 %v9379_v3, %v6184_v13  ;;  %v8411_v24 = vpop.f32.mrb[36].mxu1 }
 0x344   : > { %v6781_v16 = vmax.f32 %v9378_v48, 0.0  ;;  %v9381_v29 = vadd.f32 %v8411_v24, %v12264_v63  ;;  %v9053_v35 = vpop.f32.mrb[36].mxu0  ;;  %v3295_v30 = vpop.f32.mrb[37].mxu1 }
 0x345   : > { %v6780_v41 = vmax.f32 %v9380_v17, 0.0  ;;  %v9383_v52 = vadd.f32 %v12264_v63, %v3295_v30  ;;  %v6196_v25 = vpop.f32.mrb[37].mxu0 }
 0x346   : > { %6910 = vst.msk [vmem:[%s12279_s28 + $0x118] sm:$0xff] %vm6874_vm2, %v6781_v16  ;;  %v9382_v60 = vadd.f32 %v9381_v29, %v9053_v35 }
 0x347   : > { %6909 = vst.msk [vmem:[%s12279_s28 + $0x110] sm:$0xff] %vm6874_vm2, %v6780_v41  ;;  %v9384_v61 = vadd.f32 %v9383_v52, %v6196_v25  ;;  %v8414_v12 = vpop.f32.mrb[38].mxu1 }
 0x348   : > { %v6783_v47 = vmax.f32 %v9382_v60, 0.0  ;;  %v9385_v21 = vadd.f32 %v8414_v12, %v12264_v63  ;;  %v9056_v62 = vpop.f32.mrb[38].mxu0  ;;  %v3309_v26 = vpop.f32.mrb[39].mxu1 }
 0x349   : > { %v6782_v19 = vmax.f32 %v9384_v61, 0.0  ;;  %v9387_v53 = vadd.f32 %v12264_v63, %v3309_v26  ;;  %v6208_v56 = vpop.f32.mrb[39].mxu0 }
 0x34a   : > { %6912 = vst.msk [vmem:[%s12279_s28 + $0x128] sm:$0xff] %vm6874_vm2, %v6783_v47  ;;  %v9386_v14 = vadd.f32 %v9385_v21, %v9056_v62 }
 0x34b   : > { %6911 = vst.msk [vmem:[%s12279_s28 + $0x120] sm:$0xff] %vm6874_vm2, %v6782_v19  ;;  %v9388_v40 = vadd.f32 %v9387_v53, %v6208_v56  ;;  %v8417_v33 = vpop.f32.mrb[40].mxu1 }
 0x34c   : > { %v6785_v27 = vmax.f32 %v9386_v14, 0.0  ;;  %v9389_v34 = vadd.f32 %v8417_v33, %v12264_v63  ;;  %v9059_v22 = vpop.f32.mrb[40].mxu0  ;;  %v3323_v6 = vpop.f32.mrb[41].mxu1 }
 0x34d   : > { %v6784_v23 = vmax.f32 %v9388_v40, 0.0  ;;  %v9391_v55 = vadd.f32 %v12264_v63, %v3323_v6  ;;  %v6220_v39 = vpop.f32.mrb[41].mxu0 }
 0x34e   : > { %6914 = vst.msk [vmem:[%s12279_s28 + $0x138] sm:$0xff] %vm6874_vm2, %v6785_v27  ;;  %v9390_v8 = vadd.f32 %v9389_v34, %v9059_v22 }
 0x34f   : > { %6913 = vst.msk [vmem:[%s12279_s28 + $0x130] sm:$0xff] %vm6874_vm2, %v6784_v23  ;;  %v9392_v37 = vadd.f32 %v9391_v55, %v6220_v39  ;;  %v8420_v57 = vpop.f32.mrb[42].mxu1 }
 0x350   : > { %v6787_v31 = vmax.f32 %v9390_v8, 0.0  ;;  %v9393_v20 = vadd.f32 %v8420_v57, %v12264_v63  ;;  %v9062_v38 = vpop.f32.mrb[42].mxu0  ;;  %v3337_v10 = vpop.f32.mrb[43].mxu1 }
 0x351   : > { %v6786_v51 = vmax.f32 %v9392_v37, 0.0  ;;  %v9395_v28 = vadd.f32 %v12264_v63, %v3337_v10  ;;  %v6232_v58 = vpop.f32.mrb[43].mxu0 }
 0x352   : > { %6916 = vst.msk [vmem:[%s12279_s28 + $0x148] sm:$0xff] %vm6874_vm2, %v6787_v31  ;;  %v9394_v9 = vadd.f32 %v9393_v20, %v9062_v38 }
 0x353   : > { %6915 = vst.msk [vmem:[%s12279_s28 + $0x140] sm:$0xff] %vm6874_vm2, %v6786_v51  ;;  %v9396_v11 = vadd.f32 %v9395_v28, %v6232_v58  ;;  %v8423_v44 = vpop.f32.mrb[44].mxu1 }
 0x354   : > { %v6789_v15 = vmax.f32 %v9394_v9, 0.0  ;;  %v9397_v42 = vadd.f32 %v8423_v44, %v12264_v63  ;;  %v9065_v43 = vpop.f32.mrb[44].mxu0  ;;  %v3351_v49 = vpop.f32.mrb[45].mxu1 }
 0x355   : > { %v6788_v50 = vmax.f32 %v9396_v11, 0.0  ;;  %v9399_v54 = vadd.f32 %v12264_v63, %v3351_v49  ;;  %v6244_v7 = vpop.f32.mrb[45].mxu0 }
 0x356   : > { %6918 = vst.msk [vmem:[%s12279_s28 + $0x158] sm:$0xff] %vm6874_vm2, %v6789_v15  ;;  %v9398_v59 = vadd.f32 %v9397_v42, %v9065_v43 }
 0x357   : > { %6917 = vst.msk [vmem:[%s12279_s28 + $0x150] sm:$0xff] %vm6874_vm2, %v6788_v50  ;;  %v9400_v0 = vadd.f32 %v9399_v54, %v6244_v7  ;;  %v8426_v32 = vpop.f32.mrb[46].mxu1 }
 0x358   : > { %v6791_v1 = vmax.f32 %v9398_v59, 0.0  ;;  %v9401_v46 = vadd.f32 %v8426_v32, %v12264_v63  ;;  %v9068_v5 = vpop.f32.mrb[46].mxu0  ;;  %v3365_v4 = vpop.f32.mrb[47].mxu1 }
 0x359   : > { %v6790_v45 = vmax.f32 %v9400_v0, 0.0  ;;  %v9403_v2 = vadd.f32 %v12264_v63, %v3365_v4  ;;  %v6256_v36 = vpop.f32.mrb[47].mxu0 }
 0x35a   : > { %6920 = vst.msk [vmem:[%s12279_s28 + $0x168] sm:$0xff] %vm6874_vm2, %v6791_v1  ;;  %v9402_v18 = vadd.f32 %v9401_v46, %v9068_v5 }
 0x35b   : > { %6919 = vst.msk [vmem:[%s12279_s28 + $0x160] sm:$0xff] %vm6874_vm2, %v6790_v45  ;;  %v9404_v3 = vadd.f32 %v9403_v2, %v6256_v36  ;;  %v8429_v13 = vpop.f32.mrb[48].mxu1 }
 0x35c   : > { %v6793_v48 = vmax.f32 %v9402_v18, 0.0  ;;  %v9405_v17 = vadd.f32 %v8429_v13, %v12264_v63  ;;  %v9071_v24 = vpop.f32.mrb[48].mxu0  ;;  %v3379_v16 = vpop.f32.mrb[49].mxu1 }
 0x35d   : > { %v6792_v29 = vmax.f32 %v9404_v3, 0.0  ;;  %v9407_v35 = vadd.f32 %v12264_v63, %v3379_v16  ;;  %v6268_v30 = vpop.f32.mrb[49].mxu0 }
 0x35e   : > { %6922 = vst.msk [vmem:[%s12279_s28 + $0x178] sm:$0xff] %vm6874_vm2, %v6793_v48  ;;  %v9406_v41 = vadd.f32 %v9405_v17, %v9071_v24 }
 0x35f   : > { %6921 = vst.msk [vmem:[%s12279_s28 + $0x170] sm:$0xff] %vm6874_vm2, %v6792_v29  ;;  %v9408_v52 = vadd.f32 %v9407_v35, %v6268_v30  ;;  %v8432_v25 = vpop.f32.mrb[50].mxu1 }
 0x360   : > { %v6795_v60 = vmax.f32 %v9406_v41, 0.0  ;;  %v9409_v61 = vadd.f32 %v8432_v25, %v12264_v63  ;;  %v9074_v12 = vpop.f32.mrb[50].mxu0  ;;  %v3393_v47 = vpop.f32.mrb[51].mxu1 }
 0x361   : > { %v6794_v21 = vmax.f32 %v9408_v52, 0.0  ;;  %v9411_v62 = vadd.f32 %v12264_v63, %v3393_v47  ;;  %v6280_v26 = vpop.f32.mrb[51].mxu0 }
 0x362   : > { %6924 = vst.msk [vmem:[%s12279_s28 + $0x188] sm:$0xff] %vm6874_vm2, %v6795_v60  ;;  %v9410_v19 = vadd.f32 %v9409_v61, %v9074_v12 }
 0x363   : > { %6923 = vst.msk [vmem:[%s12279_s28 + $0x180] sm:$0xff] %vm6874_vm2, %v6794_v21  ;;  %v9412_v53 = vadd.f32 %v9411_v62, %v6280_v26  ;;  %v8435_v56 = vpop.f32.mrb[52].mxu1 }
 0x364   : > { %v6797_v14 = vmax.f32 %v9410_v19, 0.0  ;;  %v9413_v40 = vadd.f32 %v8435_v56, %v12264_v63  ;;  %v9077_v33 = vpop.f32.mrb[52].mxu0  ;;  %v3407_v27 = vpop.f32.mrb[53].mxu1 }
 0x365   : > { %v6796_v34 = vmax.f32 %v9412_v53, 0.0  ;;  %v9415_v22 = vadd.f32 %v12264_v63, %v3407_v27  ;;  %v6292_v6 = vpop.f32.mrb[53].mxu0 }
 0x366   : > { %6926 = vst.msk [vmem:[%s12279_s28 + $0x198] sm:$0xff] %vm6874_vm2, %v6797_v14  ;;  %v9414_v23 = vadd.f32 %v9413_v40, %v9077_v33 }
 0x367   : > { %6925 = vst.msk [vmem:[%s12279_s28 + $0x190] sm:$0xff] %vm6874_vm2, %v6796_v34  ;;  %v9416_v55 = vadd.f32 %v9415_v22, %v6292_v6  ;;  %v8438_v39 = vpop.f32.mrb[54].mxu1 }
 0x368   : > { %v6799_v8 = vmax.f32 %v9414_v23, 0.0  ;;  %v9417_v37 = vadd.f32 %v8438_v39, %v12264_v63  ;;  %v9080_v57 = vpop.f32.mrb[54].mxu0  ;;  %v3421_v31 = vpop.f32.mrb[55].mxu1 }
 0x369   : > { %v6798_v20 = vmax.f32 %v9416_v55, 0.0  ;;  %v9419_v38 = vadd.f32 %v12264_v63, %v3421_v31  ;;  %v6304_v10 = vpop.f32.mrb[55].mxu0 }
 0x36a   : > { %6928 = vst.msk [vmem:[%s12279_s28 + $0x1a8] sm:$0xff] %vm6874_vm2, %v6799_v8  ;;  %v9418_v51 = vadd.f32 %v9417_v37, %v9080_v57 }
 0x36b   : > { %6927 = vst.msk [vmem:[%s12279_s28 + $0x1a0] sm:$0xff] %vm6874_vm2, %v6798_v20  ;;  %v9420_v28 = vadd.f32 %v9419_v38, %v6304_v10  ;;  %v8441_v58 = vpop.f32.mrb[56].mxu1 }
 0x36c   : > { %v6801_v9 = vmax.f32 %v9418_v51, 0.0  ;;  %v9421_v11 = vadd.f32 %v8441_v58, %v12264_v63  ;;  %v9083_v44 = vpop.f32.mrb[56].mxu0  ;;  %v3435_v15 = vpop.f32.mrb[57].mxu1 }
 0x36d   : > { %v6800_v42 = vmax.f32 %v9420_v28, 0.0  ;;  %v9423_v43 = vadd.f32 %v12264_v63, %v3435_v15  ;;  %v6316_v49 = vpop.f32.mrb[57].mxu0 }
 0x36e   : > { %6930 = vst.msk [vmem:[%s12279_s28 + $0x1b8] sm:$0xff] %vm6874_vm2, %v6801_v9  ;;  %v9422_v50 = vadd.f32 %v9421_v11, %v9083_v44 }
 0x36f   : > { %6929 = vst.msk [vmem:[%s12279_s28 + $0x1b0] sm:$0xff] %vm6874_vm2, %v6800_v42  ;;  %v9424_v54 = vadd.f32 %v9423_v43, %v6316_v49  ;;  %v8444_v7 = vpop.f32.mrb[58].mxu1 }
 0x370   : > { %v6803_v59 = vmax.f32 %v9422_v50, 0.0  ;;  %v9425_v0 = vadd.f32 %v8444_v7, %v12264_v63  ;;  %v9086_v32 = vpop.f32.mrb[58].mxu0  ;;  %v3449_v1 = vpop.f32.mrb[59].mxu1 }
 0x371   : > { %v6802_v46 = vmax.f32 %v9424_v54, 0.0  ;;  %v9427_v5 = vadd.f32 %v12264_v63, %v3449_v1  ;;  %v6328_v4 = vpop.f32.mrb[59].mxu0 }
 0x372   : > { %6932 = vst.msk [vmem:[%s12279_s28 + $0x1c8] sm:$0xff] %vm6874_vm2, %v6803_v59  ;;  %v9426_v45 = vadd.f32 %v9425_v0, %v9086_v32 }
 0x373   : > { %6931 = vst.msk [vmem:[%s12279_s28 + $0x1c0] sm:$0xff] %vm6874_vm2, %v6802_v46  ;;  %v9428_v2 = vadd.f32 %v9427_v5, %v6328_v4  ;;  %v8447_v36 = vpop.f32.mrb[60].mxu1 }
 0x374   : > { %v6805_v18 = vmax.f32 %v9426_v45, 0.0  ;;  %v9429_v3 = vadd.f32 %v8447_v36, %v12264_v63  ;;  %v9089_v13 = vpop.f32.mrb[60].mxu0  ;;  %v3463_v48 = vpop.f32.mrb[61].mxu1 }
 0x375   : > { %v6804_v17 = vmax.f32 %v9428_v2, 0.0  ;;  %v9431_v24 = vadd.f32 %v12264_v63, %v3463_v48  ;;  %v6340_v16 = vpop.f32.mrb[61].mxu0 }
 0x376   : > { %6934 = vst.msk [vmem:[%s12279_s28 + $0x1d8] sm:$0xff] %vm6874_vm2, %v6805_v18  ;;  %v9430_v29 = vadd.f32 %v9429_v3, %v9089_v13 }
 0x377   : > { %6933 = vst.msk [vmem:[%s12279_s28 + $0x1d0] sm:$0xff] %vm6874_vm2, %v6804_v17  ;;  %v9432_v35 = vadd.f32 %v9431_v24, %v6340_v16  ;;  %v8450_v30 = vpop.f32.mrb[62].mxu1 }
 0x378   : > { %v6807_v41 = vmax.f32 %v9430_v29, 0.0  ;;  %v9433_v52 = vadd.f32 %v8450_v30, %v12264_v63  ;;  %v9092_v25 = vpop.f32.mrb[62].mxu0  ;;  %v3477_v60 = vpop.f32.mrb[63].mxu1 }
 0x379   : > { %v6806_v61 = vmax.f32 %v9432_v35, 0.0  ;;  %v9435_v12 = vadd.f32 %v12264_v63, %v3477_v60  ;;  %v6352_v47 = vpop.f32.mrb[63].mxu0 }
 0x37a   : > { %6936 = vst.msk [vmem:[%s12279_s28 + $0x1e8] sm:$0xff] %vm6874_vm2, %v6807_v41  ;;  %v9434_v21 = vadd.f32 %v9433_v52, %v9092_v25 }
 0x37b   : > { %6935 = vst.msk [vmem:[%s12279_s28 + $0x1e0] sm:$0xff] %vm6874_vm2, %v6806_v61  ;;  %v9436_v62 = vadd.f32 %v9435_v12, %v6352_v47  ;;  %v8453_v26 = vpop.f32.mrb[64].mxu1 }
 0x37c   : > { %v6809_v19 = vmax.f32 %v9434_v21, 0.0  ;;  %v9437_v53 = vadd.f32 %v8453_v26, %v12264_v63  ;;  %v9095_v56 = vpop.f32.mrb[64].mxu0  ;;  %v3491_v14 = vpop.f32.mrb[65].mxu1 }
 0x37d   : > { %v6808_v40 = vmax.f32 %v9436_v62, 0.0  ;;  %v9439_v33 = vadd.f32 %v12264_v63, %v3491_v14  ;;  %v6364_v27 = vpop.f32.mrb[65].mxu0 }
 0x37e   : > { %6938 = vst.msk [vmem:[%s12279_s28 + $0x1f8] sm:$0xff] %vm6874_vm2, %v6809_v19  ;;  %v9438_v34 = vadd.f32 %v9437_v53, %v9095_v56 }
 0x37f   : > { %6937 = vst.msk [vmem:[%s12279_s28 + $0x1f0] sm:$0xff] %vm6874_vm2, %v6808_v40  ;;  %v9440_v22 = vadd.f32 %v9439_v33, %v6364_v27  ;;  %v8456_v6 = vpop.f32.mrb[66].mxu1 }
 0x380   : > { %v6811_v23 = vmax.f32 %v9438_v34, 0.0  ;;  %v9441_v55 = vadd.f32 %v8456_v6, %v12264_v63  ;;  %v9098_v39 = vpop.f32.mrb[66].mxu0  ;;  %v3505_v8 = vpop.f32.mrb[67].mxu1 }
 0x381   : > { %v6810_v37 = vmax.f32 %v9440_v22, 0.0  ;;  %v9443_v57 = vadd.f32 %v12264_v63, %v3505_v8  ;;  %v6376_v31 = vpop.f32.mrb[67].mxu0  ;;  %v12550_v22 = vld [vmem:[%s12711_s2] ss:$0 sm:$0xff] }
 0x382   : > { %6940 = vst.msk [vmem:[%s12279_s28 + $0x208] sm:$0xff] %vm6874_vm2, %v6811_v23  ;;  %v9442_v20 = vadd.f32 %v9441_v55, %v9098_v39 }
 0x383   : > { %6939 = vst.msk [vmem:[%s12279_s28 + $0x200] sm:$0xff] %vm6874_vm2, %v6810_v37  ;;  %v9444_v38 = vadd.f32 %v9443_v57, %v6376_v31  ;;  %v8459_v10 = vpop.f32.mrb[68].mxu1 }
 0x384   : > { %v6813_v51 = vmax.f32 %v9442_v20, 0.0  ;;  %v9445_v28 = vadd.f32 %v8459_v10, %v12264_v63  ;;  %v9101_v58 = vpop.f32.mrb[68].mxu0  ;;  %v3519_v9 = vpop.f32.mrb[69].mxu1 }
 0x385   : > { %v6812_v11 = vmax.f32 %v9444_v38, 0.0  ;;  %v9447_v44 = vadd.f32 %v12264_v63, %v3519_v9  ;;  %v6388_v15 = vpop.f32.mrb[69].mxu0 }
 0x386   : > { %6942 = vst.msk [vmem:[%s12279_s28 + $0x218] sm:$0xff] %vm6874_vm2, %v6813_v51  ;;  %v9446_v42 = vadd.f32 %v9445_v28, %v9101_v58 }
 0x387   : > { %6941 = vst.msk [vmem:[%s12279_s28 + $0x210] sm:$0xff] %vm6874_vm2, %v6812_v11  ;;  %v9448_v43 = vadd.f32 %v9447_v44, %v6388_v15  ;;  %v8462_v49 = vpop.f32.mrb[70].mxu1 }
 0x388   : > { %v6815_v50 = vmax.f32 %v9446_v42, 0.0  ;;  %v9449_v54 = vadd.f32 %v8462_v49, %v12264_v63  ;;  %v9104_v7 = vpop.f32.mrb[70].mxu0  ;;  %v3533_v59 = vpop.f32.mrb[71].mxu1 }
 0x389   : > { %v6814_v0 = vmax.f32 %v9448_v43, 0.0  ;;  %v9451_v32 = vadd.f32 %v12264_v63, %v3533_v59  ;;  %v6400_v1 = vpop.f32.mrb[71].mxu0 }
 0x38a   : > { %6944 = vst.msk [vmem:[%s12279_s28 + $0x228] sm:$0xff] %vm6874_vm2, %v6815_v50  ;;  %v9450_v46 = vadd.f32 %v9449_v54, %v9104_v7 }
 0x38b   : > { %6943 = vst.msk [vmem:[%s12279_s28 + $0x220] sm:$0xff] %vm6874_vm2, %v6814_v0  ;;  %v9452_v5 = vadd.f32 %v9451_v32, %v6400_v1  ;;  %v8465_v4 = vpop.f32.mrb[72].mxu1 }
 0x38c   : > { %v6817_v45 = vmax.f32 %v9450_v46, 0.0  ;;  %v9453_v2 = vadd.f32 %v8465_v4, %v12264_v63  ;;  %v9107_v36 = vpop.f32.mrb[72].mxu0  ;;  %v3547_v18 = vpop.f32.mrb[73].mxu1 }
 0x38d   : > { %v6816_v3 = vmax.f32 %v9452_v5, 0.0  ;;  %v9455_v13 = vadd.f32 %v12264_v63, %v3547_v18  ;;  %v6412_v48 = vpop.f32.mrb[73].mxu0 }
 0x38e   : > { %6946 = vst.msk [vmem:[%s12279_s28 + $0x238] sm:$0xff] %vm6874_vm2, %v6817_v45  ;;  %v9454_v17 = vadd.f32 %v9453_v2, %v9107_v36 }
 0x38f   : > { %6945 = vst.msk [vmem:[%s12279_s28 + $0x230] sm:$0xff] %vm6874_vm2, %v6816_v3  ;;  %v9456_v24 = vadd.f32 %v9455_v13, %v6412_v48  ;;  %v8468_v16 = vpop.f32.mrb[74].mxu1 }
 0x390   : > { %v6819_v29 = vmax.f32 %v9454_v17, 0.0  ;;  %v9457_v35 = vadd.f32 %v8468_v16, %v12264_v63  ;;  %v9110_v30 = vpop.f32.mrb[74].mxu0  ;;  %v3561_v41 = vpop.f32.mrb[75].mxu1 }
 0x391   : > { %v6818_v52 = vmax.f32 %v9456_v24, 0.0  ;;  %v9459_v25 = vadd.f32 %v12264_v63, %v3561_v41  ;;  %v6424_v60 = vpop.f32.mrb[75].mxu0 }
 0x392   : > { %6948 = vst.msk [vmem:[%s12279_s28 + $0x248] sm:$0xff] %vm6874_vm2, %v6819_v29  ;;  %v9458_v61 = vadd.f32 %v9457_v35, %v9110_v30 }
 0x393   : > { %6947 = vst.msk [vmem:[%s12279_s28 + $0x240] sm:$0xff] %vm6874_vm2, %v6818_v52  ;;  %v9460_v12 = vadd.f32 %v9459_v25, %v6424_v60  ;;  %v8471_v47 = vpop.f32.mrb[76].mxu1 }
 0x394   : > { %v6821_v21 = vmax.f32 %v9458_v61, 0.0  ;;  %v9461_v62 = vadd.f32 %v8471_v47, %v12264_v63  ;;  %v9113_v26 = vpop.f32.mrb[76].mxu0  ;;  %v3575_v19 = vpop.f32.mrb[77].mxu1 }
 0x395   : > { %v6820_v53 = vmax.f32 %v9460_v12, 0.0  ;;  %v9463_v56 = vadd.f32 %v12264_v63, %v3575_v19  ;;  %v6436_v14 = vpop.f32.mrb[77].mxu0 }
 0x396   : > { %6950 = vst.msk [vmem:[%s12279_s28 + $0x258] sm:$0xff] %vm6874_vm2, %v6821_v21  ;;  %v9462_v40 = vadd.f32 %v9461_v62, %v9113_v26 }
 0x397   : > { %6949 = vst.msk [vmem:[%s12279_s28 + $0x250] sm:$0xff] %vm6874_vm2, %v6820_v53  ;;  %v9464_v33 = vadd.f32 %v9463_v56, %v6436_v14  ;;  %v8474_v27 = vpop.f32.mrb[78].mxu1 }
 0x398   : > { %v6823_v34 = vmax.f32 %v9462_v40, 0.0  ;;  %v9465_v6 = vadd.f32 %v12550_v22, %v8474_v27  ;;  %v9116_v23 = vpop.f32.mrb[78].mxu0  ;;  %v3589_v55 = vpop.f32.mrb[79].mxu1 }
 0x399   : > { %v6822_v63 = vmax.f32 %v9464_v33, 0.0  ;;  %v9467_v39 = vadd.f32 %v12550_v22, %v3589_v55  ;;  %v6448_v8 = vpop.f32.mrb[79].mxu0 }
 0x39a   : > { %6952 = vst.msk [vmem:[%s12279_s28 + $0x268] sm:$0xff] %vm6874_vm2, %v6823_v34  ;;  %v9466_v37 = vadd.f32 %v9465_v6, %v9116_v23 }
 0x39b   : > { %6951 = vst.msk [vmem:[%s12279_s28 + $0x260] sm:$0xff] %vm6874_vm2, %v6822_v63  ;;  %v9468_v57 = vadd.f32 %v9467_v39, %v6448_v8  ;;  %v8477_v31 = vpop.f32.mrb[80].mxu1 }
 0x39c   : > { %v6825_v20 = vmax.f32 %v9466_v37, 0.0  ;;  %v9469_v38 = vadd.f32 %v12550_v22, %v8477_v31  ;;  %v9119_v10 = vpop.f32.mrb[80].mxu0  ;;  %v3603_v51 = vpop.f32.mrb[81].mxu1 }
 0x39d   : > { %v6824_v28 = vmax.f32 %v9468_v57, 0.0  ;;  %v9471_v58 = vadd.f32 %v12550_v22, %v3603_v51  ;;  %v6460_v9 = vpop.f32.mrb[81].mxu0 }
 0x39e   : > { %6954 = vst.msk [vmem:[%s12279_s28 + $0x278] sm:$0xff] %vm6874_vm2, %v6825_v20  ;;  %v9470_v11 = vadd.f32 %v9469_v38, %v9119_v10 }
 0x39f   : > { %6953 = vst.msk [vmem:[%s12279_s28 + $0x270] sm:$0xff] %vm6874_vm2, %v6824_v28  ;;  %v9472_v44 = vadd.f32 %v9471_v58, %v6460_v9  ;;  %v8480_v15 = vpop.f32.mrb[82].mxu1 }
 0x3a0   : > { %v6827_v42 = vmax.f32 %v9470_v11, 0.0  ;;  %v9473_v43 = vadd.f32 %v12550_v22, %v8480_v15  ;;  %v9122_v49 = vpop.f32.mrb[82].mxu0  ;;  %v3617_v50 = vpop.f32.mrb[83].mxu1 }
 0x3a1   : > { %v6826_v54 = vmax.f32 %v9472_v44, 0.0  ;;  %v9475_v7 = vadd.f32 %v12550_v22, %v3617_v50  ;;  %v6472_v59 = vpop.f32.mrb[83].mxu0 }
 0x3a2   : > { %6956 = vst.msk [vmem:[%s12279_s28 + $0x288] sm:$0xff] %vm6874_vm2, %v6827_v42  ;;  %v9474_v0 = vadd.f32 %v9473_v43, %v9122_v49 }
 0x3a3   : > { %6955 = vst.msk [vmem:[%s12279_s28 + $0x280] sm:$0xff] %vm6874_vm2, %v6826_v54  ;;  %v9476_v32 = vadd.f32 %v9475_v7, %v6472_v59  ;;  %v8483_v1 = vpop.f32.mrb[84].mxu1 }
 0x3a4   : > { %v6829_v46 = vmax.f32 %v9474_v0, 0.0  ;;  %v9477_v5 = vadd.f32 %v12550_v22, %v8483_v1  ;;  %v9125_v4 = vpop.f32.mrb[84].mxu0  ;;  %v3631_v45 = vpop.f32.mrb[85].mxu1 }
 0x3a5   : > { %v6828_v2 = vmax.f32 %v9476_v32, 0.0  ;;  %v9479_v36 = vadd.f32 %v12550_v22, %v3631_v45  ;;  %v6484_v18 = vpop.f32.mrb[85].mxu0 }
 0x3a6   : > { %6958 = vst.msk [vmem:[%s12279_s28 + $0x298] sm:$0xff] %vm6874_vm2, %v6829_v46  ;;  %v9478_v3 = vadd.f32 %v9477_v5, %v9125_v4 }
 0x3a7   : > { %6957 = vst.msk [vmem:[%s12279_s28 + $0x290] sm:$0xff] %vm6874_vm2, %v6828_v2  ;;  %v9480_v13 = vadd.f32 %v9479_v36, %v6484_v18  ;;  %v8486_v48 = vpop.f32.mrb[86].mxu1 }
 0x3a8   : > { %v6831_v17 = vmax.f32 %v9478_v3, 0.0  ;;  %v9481_v24 = vadd.f32 %v12550_v22, %v8486_v48  ;;  %v9128_v16 = vpop.f32.mrb[86].mxu0  ;;  %v3645_v29 = vpop.f32.mrb[87].mxu1 }
 0x3a9   : > { %v6830_v35 = vmax.f32 %v9480_v13, 0.0  ;;  %v9483_v30 = vadd.f32 %v12550_v22, %v3645_v29  ;;  %v6496_v41 = vpop.f32.mrb[87].mxu0 }
 0x3aa   : > { %6960 = vst.msk [vmem:[%s12279_s28 + $0x2a8] sm:$0xff] %vm6874_vm2, %v6831_v17  ;;  %v9482_v52 = vadd.f32 %v9481_v24, %v9128_v16 }
 0x3ab   : > { %6959 = vst.msk [vmem:[%s12279_s28 + $0x2a0] sm:$0xff] %vm6874_vm2, %v6830_v35  ;;  %v9484_v25 = vadd.f32 %v9483_v30, %v6496_v41  ;;  %v8489_v60 = vpop.f32.mrb[88].mxu1 }
 0x3ac   : > { %v6833_v61 = vmax.f32 %v9482_v52, 0.0  ;;  %v9485_v12 = vadd.f32 %v12550_v22, %v8489_v60  ;;  %v9131_v47 = vpop.f32.mrb[88].mxu0  ;;  %v3659_v21 = vpop.f32.mrb[89].mxu1 }
 0x3ad   : > { %v6832_v62 = vmax.f32 %v9484_v25, 0.0  ;;  %v9487_v26 = vadd.f32 %v12550_v22, %v3659_v21  ;;  %v6508_v19 = vpop.f32.mrb[89].mxu0 }
 0x3ae   : > { %6962 = vst.msk [vmem:[%s12279_s28 + $0x2b8] sm:$0xff] %vm6874_vm2, %v6833_v61  ;;  %v9486_v53 = vadd.f32 %v9485_v12, %v9131_v47 }
 0x3af   : > { %6961 = vst.msk [vmem:[%s12279_s28 + $0x2b0] sm:$0xff] %vm6874_vm2, %v6832_v62  ;;  %v9488_v56 = vadd.f32 %v9487_v26, %v6508_v19  ;;  %v8492_v14 = vpop.f32.mrb[90].mxu1 }
 0x3b0   : > { %v6835_v40 = vmax.f32 %v9486_v53, 0.0  ;;  %v9489_v33 = vadd.f32 %v12550_v22, %v8492_v14  ;;  %v9134_v27 = vpop.f32.mrb[90].mxu0  ;;  %v3673_v34 = vpop.f32.mrb[91].mxu1 }
 0x3b1   : > { %v6834_v6 = vmax.f32 %v9488_v56, 0.0  ;;  %v9491_v23 = vadd.f32 %v12550_v22, %v3673_v34  ;;  %v6520_v55 = vpop.f32.mrb[91].mxu0 }
 0x3b2   : > { %6964 = vst.msk [vmem:[%s12279_s28 + $0x2c8] sm:$0xff] %vm6874_vm2, %v6835_v40  ;;  %v9490_v63 = vadd.f32 %v9489_v33, %v9134_v27 }
 0x3b3   : > { %6963 = vst.msk [vmem:[%s12279_s28 + $0x2c0] sm:$0xff] %vm6874_vm2, %v6834_v6  ;;  %v9492_v39 = vadd.f32 %v9491_v23, %v6520_v55  ;;  %v8495_v8 = vpop.f32.mrb[92].mxu1 }
 0x3b4   : > { %v6837_v37 = vmax.f32 %v9490_v63, 0.0  ;;  %v9493_v57 = vadd.f32 %v12550_v22, %v8495_v8  ;;  %v9137_v31 = vpop.f32.mrb[92].mxu0  ;;  %v3687_v20 = vpop.f32.mrb[93].mxu1 }
 0x3b5   : > { %v6836_v38 = vmax.f32 %v9492_v39, 0.0  ;;  %v9495_v10 = vadd.f32 %v12550_v22, %v3687_v20  ;;  %v6532_v51 = vpop.f32.mrb[93].mxu0 }
 0x3b6   : > { %6966 = vst.msk [vmem:[%s12279_s28 + $0x2d8] sm:$0xff] %vm6874_vm2, %v6837_v37  ;;  %v9494_v28 = vadd.f32 %v9493_v57, %v9137_v31 }
 0x3b7   : > { %6965 = vst.msk [vmem:[%s12279_s28 + $0x2d0] sm:$0xff] %vm6874_vm2, %v6836_v38  ;;  %v9496_v58 = vadd.f32 %v9495_v10, %v6532_v51  ;;  %v8498_v9 = vpop.f32.mrb[94].mxu1 }
 0x3b8   : > { %v6839_v11 = vmax.f32 %v9494_v28, 0.0  ;;  %v9497_v44 = vadd.f32 %v12550_v22, %v8498_v9  ;;  %v9140_v15 = vpop.f32.mrb[94].mxu0  ;;  %v3701_v42 = vpop.f32.mrb[95].mxu1 }
 0x3b9   : > { %v6838_v43 = vmax.f32 %v9496_v58, 0.0  ;;  %v9499_v49 = vadd.f32 %v12550_v22, %v3701_v42  ;;  %v6544_v50 = vpop.f32.mrb[95].mxu0 }
 0x3ba   : > { %6968 = vst.msk [vmem:[%s12279_s28 + $0x2e8] sm:$0xff] %vm6874_vm2, %v6839_v11  ;;  %v9498_v54 = vadd.f32 %v9497_v44, %v9140_v15 }
 0x3bb   : > { %6967 = vst.msk [vmem:[%s12279_s28 + $0x2e0] sm:$0xff] %vm6874_vm2, %v6838_v43  ;;  %v9500_v7 = vadd.f32 %v9499_v49, %v6544_v50  ;;  %v8501_v59 = vpop.f32.mrb[96].mxu1 }
 0x3bc   : > { %v6841_v0 = vmax.f32 %v9498_v54, 0.0  ;;  %v9501_v32 = vadd.f32 %v12550_v22, %v8501_v59  ;;  %v9143_v1 = vpop.f32.mrb[96].mxu0  ;;  %v3715_v46 = vpop.f32.mrb[97].mxu1 }
 0x3bd   : > { %v6840_v5 = vmax.f32 %v9500_v7, 0.0  ;;  %v9503_v4 = vadd.f32 %v12550_v22, %v3715_v46  ;;  %v6556_v45 = vpop.f32.mrb[97].mxu0 }
 0x3be   : > { %6970 = vst.msk [vmem:[%s12279_s28 + $0x2f8] sm:$0xff] %vm6874_vm2, %v6841_v0  ;;  %v9502_v2 = vadd.f32 %v9501_v32, %v9143_v1 }
 0x3bf   : > { %6969 = vst.msk [vmem:[%s12279_s28 + $0x2f0] sm:$0xff] %vm6874_vm2, %v6840_v5  ;;  %v9504_v36 = vadd.f32 %v9503_v4, %v6556_v45  ;;  %v8504_v18 = vpop.f32.mrb[98].mxu1 }
 0x3c0   : > { %v6843_v3 = vmax.f32 %v9502_v2, 0.0  ;;  %v9505_v13 = vadd.f32 %v12550_v22, %v8504_v18  ;;  %v9146_v48 = vpop.f32.mrb[98].mxu0  ;;  %v3729_v17 = vpop.f32.mrb[99].mxu1 }
 0x3c1   : > { %v6842_v24 = vmax.f32 %v9504_v36, 0.0  ;;  %v9507_v16 = vadd.f32 %v12550_v22, %v3729_v17  ;;  %v6568_v29 = vpop.f32.mrb[99].mxu0 }
 0x3c2   : > { %6972 = vst.msk [vmem:[%s12279_s28 + $0x308] sm:$0xff] %vm6874_vm2, %v6843_v3  ;;  %v9506_v35 = vadd.f32 %v9505_v13, %v9146_v48 }
 0x3c3   : > { %6971 = vst.msk [vmem:[%s12279_s28 + $0x300] sm:$0xff] %vm6874_vm2, %v6842_v24  ;;  %v9508_v30 = vadd.f32 %v9507_v16, %v6568_v29  ;;  %v8507_v41 = vpop.f32.mrb[100].mxu1 }
 0x3c4   : > { %v6845_v52 = vmax.f32 %v9506_v35, 0.0  ;;  %v9509_v25 = vadd.f32 %v12550_v22, %v8507_v41  ;;  %v9149_v60 = vpop.f32.mrb[100].mxu0  ;;  %v3743_v61 = vpop.f32.mrb[101].mxu1 }
 0x3c5   : > { %v6844_v12 = vmax.f32 %v9508_v30, 0.0  ;;  %v9511_v47 = vadd.f32 %v12550_v22, %v3743_v61  ;;  %v6580_v21 = vpop.f32.mrb[101].mxu0 }
 0x3c6   : > { %6974 = vst.msk [vmem:[%s12279_s28 + $0x318] sm:$0xff] %vm6874_vm2, %v6845_v52  ;;  %v9510_v62 = vadd.f32 %v9509_v25, %v9149_v60 }
 0x3c7   : > { %6973 = vst.msk [vmem:[%s12279_s28 + $0x310] sm:$0xff] %vm6874_vm2, %v6844_v12  ;;  %v9512_v26 = vadd.f32 %v9511_v47, %v6580_v21  ;;  %v8510_v19 = vpop.f32.mrb[102].mxu1 }
 0x3c8   : > { %v6847_v53 = vmax.f32 %v9510_v62, 0.0  ;;  %v9513_v56 = vadd.f32 %v12550_v22, %v8510_v19  ;;  %v9152_v14 = vpop.f32.mrb[102].mxu0  ;;  %v3757_v40 = vpop.f32.mrb[103].mxu1 }
 0x3c9   : > { %v6846_v33 = vmax.f32 %v9512_v26, 0.0  ;;  %v9515_v27 = vadd.f32 %v12550_v22, %v3757_v40  ;;  %v6592_v34 = vpop.f32.mrb[103].mxu0 }
 0x3ca   : > { %6976 = vst.msk [vmem:[%s12279_s28 + $0x328] sm:$0xff] %vm6874_vm2, %v6847_v53  ;;  %v9514_v6 = vadd.f32 %v9513_v56, %v9152_v14 }
 0x3cb   : > { %6975 = vst.msk [vmem:[%s12279_s28 + $0x320] sm:$0xff] %vm6874_vm2, %v6846_v33  ;;  %v9516_v23 = vadd.f32 %v9515_v27, %v6592_v34  ;;  %v8513_v55 = vpop.f32.mrb[104].mxu1 }
 0x3cc   : > { %v6849_v63 = vmax.f32 %v9514_v6, 0.0  ;;  %v9517_v39 = vadd.f32 %v12550_v22, %v8513_v55  ;;  %v9155_v8 = vpop.f32.mrb[104].mxu0  ;;  %v3771_v37 = vpop.f32.mrb[105].mxu1 }
 0x3cd   : > { %v6848_v57 = vmax.f32 %v9516_v23, 0.0  ;;  %v9519_v31 = vadd.f32 %v12550_v22, %v3771_v37  ;;  %v6604_v20 = vpop.f32.mrb[105].mxu0 }
 0x3ce   : > { %6978 = vst.msk [vmem:[%s12279_s28 + $0x338] sm:$0xff] %vm6874_vm2, %v6849_v63  ;;  %v9518_v38 = vadd.f32 %v9517_v39, %v9155_v8 }
 0x3cf   : > { %6977 = vst.msk [vmem:[%s12279_s28 + $0x330] sm:$0xff] %vm6874_vm2, %v6848_v57  ;;  %v9520_v10 = vadd.f32 %v9519_v31, %v6604_v20  ;;  %v8516_v51 = vpop.f32.mrb[106].mxu1 }
 0x3d0   : > { %v6851_v28 = vmax.f32 %v9518_v38, 0.0  ;;  %v9521_v58 = vadd.f32 %v12550_v22, %v8516_v51  ;;  %v9158_v9 = vpop.f32.mrb[106].mxu0  ;;  %v3785_v11 = vpop.f32.mrb[107].mxu1 }
 0x3d1   : > { %v6850_v44 = vmax.f32 %v9520_v10, 0.0  ;;  %v9523_v15 = vadd.f32 %v12550_v22, %v3785_v11  ;;  %v6616_v42 = vpop.f32.mrb[107].mxu0 }
 0x3d2   : > { %6980 = vst.msk [vmem:[%s12279_s28 + $0x348] sm:$0xff] %vm6874_vm2, %v6851_v28  ;;  %v9522_v43 = vadd.f32 %v9521_v58, %v9158_v9 }
 0x3d3   : > { %6979 = vst.msk [vmem:[%s12279_s28 + $0x340] sm:$0xff] %vm6874_vm2, %v6850_v44  ;;  %v9524_v49 = vadd.f32 %v9523_v15, %v6616_v42  ;;  %v8519_v50 = vpop.f32.mrb[108].mxu1 }
 0x3d4   : > { %v6853_v54 = vmax.f32 %v9522_v43, 0.0  ;;  %v9525_v7 = vadd.f32 %v12550_v22, %v8519_v50  ;;  %v9161_v59 = vpop.f32.mrb[108].mxu0  ;;  %v3799_v0 = vpop.f32.mrb[109].mxu1 }
 0x3d5   : > { %v6852_v32 = vmax.f32 %v9524_v49, 0.0  ;;  %v9527_v1 = vadd.f32 %v12550_v22, %v3799_v0  ;;  %v6628_v46 = vpop.f32.mrb[109].mxu0 }
 0x3d6   : > { %6982 = vst.msk [vmem:[%s12279_s28 + $0x358] sm:$0xff] %vm6874_vm2, %v6853_v54  ;;  %v9526_v5 = vadd.f32 %v9525_v7, %v9161_v59 }
 0x3d7   : > { %6981 = vst.msk [vmem:[%s12279_s28 + $0x350] sm:$0xff] %vm6874_vm2, %v6852_v32  ;;  %v9528_v4 = vadd.f32 %v9527_v1, %v6628_v46  ;;  %v8522_v45 = vpop.f32.mrb[110].mxu1 }
 0x3d8   : > { %v6855_v2 = vmax.f32 %v9526_v5, 0.0  ;;  %v9529_v36 = vadd.f32 %v12550_v22, %v8522_v45  ;;  %v9164_v18 = vpop.f32.mrb[110].mxu0  ;;  %v3813_v3 = vpop.f32.mrb[111].mxu1 }
 0x3d9   : > { %v6854_v13 = vmax.f32 %v9528_v4, 0.0  ;;  %v9531_v48 = vadd.f32 %v12550_v22, %v3813_v3  ;;  %v6640_v17 = vpop.f32.mrb[111].mxu0 }
 0x3da   : > { %6984 = vst.msk [vmem:[%s12279_s28 + $0x368] sm:$0xff] %vm6874_vm2, %v6855_v2  ;;  %v9530_v24 = vadd.f32 %v9529_v36, %v9164_v18 }
 0x3db   : > { %6983 = vst.msk [vmem:[%s12279_s28 + $0x360] sm:$0xff] %vm6874_vm2, %v6854_v13  ;;  %v9532_v16 = vadd.f32 %v9531_v48, %v6640_v17  ;;  %v8525_v29 = vpop.f32.mrb[112].mxu1 }
 0x3dc   : > { %v6857_v35 = vmax.f32 %v9530_v24, 0.0  ;;  %v9533_v30 = vadd.f32 %v12550_v22, %v8525_v29  ;;  %v9167_v41 = vpop.f32.mrb[112].mxu0  ;;  %v3827_v52 = vpop.f32.mrb[113].mxu1 }
 0x3dd   : > { %v6856_v25 = vmax.f32 %v9532_v16, 0.0  ;;  %v9535_v60 = vadd.f32 %v12550_v22, %v3827_v52  ;;  %v6652_v61 = vpop.f32.mrb[113].mxu0 }
 0x3de   : > { %6986 = vst.msk [vmem:[%s12279_s28 + $0x378] sm:$0xff] %vm6874_vm2, %v6857_v35  ;;  %v9534_v12 = vadd.f32 %v9533_v30, %v9167_v41 }
 0x3df   : > { %6985 = vst.msk [vmem:[%s12279_s28 + $0x370] sm:$0xff] %vm6874_vm2, %v6856_v25  ;;  %v9536_v47 = vadd.f32 %v9535_v60, %v6652_v61  ;;  %v8528_v21 = vpop.f32.mrb[114].mxu1 }
 0x3e0   : > { %v6859_v62 = vmax.f32 %v9534_v12, 0.0  ;;  %v9537_v26 = vadd.f32 %v12550_v22, %v8528_v21  ;;  %v9170_v19 = vpop.f32.mrb[114].mxu0  ;;  %v3841_v53 = vpop.f32.mrb[115].mxu1 }
 0x3e1   : > { %v6858_v56 = vmax.f32 %v9536_v47, 0.0  ;;  %v9539_v14 = vadd.f32 %v12550_v22, %v3841_v53  ;;  %v6664_v40 = vpop.f32.mrb[115].mxu0 }
 0x3e2   : > { %6988 = vst.msk [vmem:[%s12279_s28 + $0x388] sm:$0xff] %vm6874_vm2, %v6859_v62  ;;  %v9538_v33 = vadd.f32 %v9537_v26, %v9170_v19 }
 0x3e3   : > { %6987 = vst.msk [vmem:[%s12279_s28 + $0x380] sm:$0xff] %vm6874_vm2, %v6858_v56  ;;  %v9540_v27 = vadd.f32 %v9539_v14, %v6664_v40  ;;  %v8531_v34 = vpop.f32.mrb[116].mxu1 }
 0x3e4   : > { %v6861_v6 = vmax.f32 %v9538_v33, 0.0  ;;  %v9541_v23 = vadd.f32 %v12550_v22, %v8531_v34  ;;  %v9173_v55 = vpop.f32.mrb[116].mxu0  ;;  %v3855_v63 = vpop.f32.mrb[117].mxu1 }
 0x3e5   : > { %v6860_v39 = vmax.f32 %v9540_v27, 0.0  ;;  %v9543_v8 = vadd.f32 %v12550_v22, %v3855_v63  ;;  %v6676_v37 = vpop.f32.mrb[117].mxu0 }
 0x3e6   : > { %6990 = vst.msk [vmem:[%s12279_s28 + $0x398] sm:$0xff] %vm6874_vm2, %v6861_v6  ;;  %v9542_v57 = vadd.f32 %v9541_v23, %v9173_v55 }
 0x3e7   : > { %6989 = vst.msk [vmem:[%s12279_s28 + $0x390] sm:$0xff] %vm6874_vm2, %v6860_v39  ;;  %v9544_v31 = vadd.f32 %v9543_v8, %v6676_v37  ;;  %v8534_v20 = vpop.f32.mrb[118].mxu1 }
 0x3e8   : > { %v6863_v38 = vmax.f32 %v9542_v57, 0.0  ;;  %v9545_v10 = vadd.f32 %v12550_v22, %v8534_v20  ;;  %v9176_v51 = vpop.f32.mrb[118].mxu0  ;;  %v3869_v28 = vpop.f32.mrb[119].mxu1 }
 0x3e9   : > { %v6862_v58 = vmax.f32 %v9544_v31, 0.0  ;;  %v9547_v9 = vadd.f32 %v12550_v22, %v3869_v28  ;;  %v6688_v11 = vpop.f32.mrb[119].mxu0 }
 0x3ea   : > { %6992 = vst.msk [vmem:[%s12279_s28 + $0x3a8] sm:$0xff] %vm6874_vm2, %v6863_v38  ;;  %v9546_v44 = vadd.f32 %v9545_v10, %v9176_v51 }
 0x3eb   : > { %6991 = vst.msk [vmem:[%s12279_s28 + $0x3a0] sm:$0xff] %vm6874_vm2, %v6862_v58  ;;  %v9548_v15 = vadd.f32 %v9547_v9, %v6688_v11  ;;  %v8537_v42 = vpop.f32.mrb[120].mxu1 }
 0x3ec   : > { %v6865_v43 = vmax.f32 %v9546_v44, 0.0  ;;  %v9549_v49 = vadd.f32 %v12550_v22, %v8537_v42  ;;  %v9179_v50 = vpop.f32.mrb[120].mxu0  ;;  %v3883_v54 = vpop.f32.mrb[121].mxu1 }
 0x3ed   : > { %v6864_v7 = vmax.f32 %v9548_v15, 0.0  ;;  %v9551_v59 = vadd.f32 %v12550_v22, %v3883_v54  ;;  %v6700_v0 = vpop.f32.mrb[121].mxu0 }
 0x3ee   : > { %6994 = vst.msk [vmem:[%s12279_s28 + $0x3b8] sm:$0xff] %vm6874_vm2, %v6865_v43  ;;  %v9550_v32 = vadd.f32 %v9549_v49, %v9179_v50 }
 0x3ef   : > { %6993 = vst.msk [vmem:[%s12279_s28 + $0x3b0] sm:$0xff] %vm6874_vm2, %v6864_v7  ;;  %v9552_v1 = vadd.f32 %v9551_v59, %v6700_v0  ;;  %v8540_v46 = vpop.f32.mrb[122].mxu1 }
 0x3f0   : > { %v6867_v5 = vmax.f32 %v9550_v32, 0.0  ;;  %v9553_v4 = vadd.f32 %v12550_v22, %v8540_v46  ;;  %v9182_v45 = vpop.f32.mrb[122].mxu0  ;;  %v3897_v2 = vpop.f32.mrb[123].mxu1 }
 0x3f1   : > { %v6866_v36 = vmax.f32 %v9552_v1, 0.0  ;;  %v9555_v18 = vadd.f32 %v12550_v22, %v3897_v2  ;;  %v6712_v3 = vpop.f32.mrb[123].mxu0 }
 0x3f2   : > { %6996 = vst.msk [vmem:[%s12279_s28 + $0x3c8] sm:$0xff] %vm6874_vm2, %v6867_v5  ;;  %v9554_v13 = vadd.f32 %v9553_v4, %v9182_v45 }
 0x3f3   : > { %6995 = vst.msk [vmem:[%s12279_s28 + $0x3c0] sm:$0xff] %vm6874_vm2, %v6866_v36  ;;  %v9556_v48 = vadd.f32 %v9555_v18, %v6712_v3  ;;  %v8543_v17 = vpop.f32.mrb[124].mxu1 }
 0x3f4   : > { %v6869_v24 = vmax.f32 %v9554_v13, 0.0  ;;  %v9557_v16 = vadd.f32 %v12550_v22, %v8543_v17  ;;  %v9185_v29 = vpop.f32.mrb[124].mxu0  ;;  %v3911_v35 = vpop.f32.mrb[125].mxu1 }
 0x3f5   : > { %v6868_v30 = vmax.f32 %v9556_v48, 0.0  ;;  %v9559_v41 = vadd.f32 %v12550_v22, %v3911_v35  ;;  %v6724_v52 = vpop.f32.mrb[125].mxu0 }
 0x3f6   : > { %6998 = vst.msk [vmem:[%s12279_s28 + $0x3d8] sm:$0xff] %vm6874_vm2, %v6869_v24  ;;  %v9558_v25 = vadd.f32 %v9557_v16, %v9185_v29 }
 0x3f7   : > { %6997 = vst.msk [vmem:[%s12279_s28 + $0x3d0] sm:$0xff] %vm6874_vm2, %v6868_v30  ;;  %v9560_v60 = vadd.f32 %v9559_v41, %v6724_v52  ;;  %v8546_v61 = vpop.f32.mrb[126].mxu1 }
 0x3f8   : > { %v6871_v12 = vmax.f32 %v9558_v25, 0.0  ;;  %v9561_v47 = vadd.f32 %v12550_v22, %v8546_v61  ;;  %v9188_v21 = vpop.f32.mrb[126].mxu0  ;;  %v3925_v62 = vpop.f32.mrb[127].mxu1 }
 0x3f9   : > { %v6870_v26 = vmax.f32 %v9560_v60, 0.0  ;;  %v9563_v19 = vadd.f32 %v12550_v22, %v3925_v62  ;;  %v6736_v53 = vpop.f32.mrb[127].mxu0 }
 0x3fa   : > { %7000 = vst.msk [vmem:[%s12279_s28 + $0x3e8] sm:$0xff] %vm6874_vm2, %v6871_v12  ;;  %v9562_v56 = vadd.f32 %v9561_v47, %v9188_v21 }
 0x3fb   : > { %6999 = vst.msk [vmem:[%s12279_s28 + $0x3e0] sm:$0xff] %vm6874_vm2, %v6870_v26  ;;  %v9564_v14 = vadd.f32 %v9563_v19, %v6736_v53 }
 0x3fc   : > { %v6873_v40 = vmax.f32 %v9562_v56, 0.0 }
 0x3fd   : > { %v6872_v33 = vmax.f32 %v9564_v14, 0.0 }
 0x3fe   : > { %7002 = vst.msk [vmem:[%s12279_s28 + $0x3f8] sm:$0xff] %vm6874_vm2, %v6873_v40 }
 0x3ff   : > { %7001 = vst.msk [vmem:[%s12279_s28 + $0x3f0] sm:$0xff] %vm6874_vm2, %v6872_v33 }
 0x400 PF: > { %s13_s12 = sadd.s32 1, %s10096_s12  }
 0x401   : > { %p10_p4 = scmp.ge.s32.totalorder %s13_s12, 6  }
 0x403   :  { %12 = sbr.rel (!%p10_p4) target bundleno = 1 (0x1), region = 62 }

</bundles_post_ra>
